<compile_context>
chip_gen: v5e
topology: v5e:2x2
jax: 0.10.0
libtpu: 0.0.40
codegen_flags: <defaults>
</compile_context>

<pallas_src>
import jax
import jax.numpy as jnp
from jax import lax
from jax.experimental import pallas as pl
from jax.experimental.pallas import tpu as pltpu

# ---------------- config (small synthetic stand-in for bert-base-chinese) ----
VOCAB = 64
HIDDEN = 32
N_HEADS = 4
HEAD_DIM = HIDDEN // N_HEADS
INTERMEDIATE = 64
N_LAYERS = 2
MAX_POS = 16
SEQ = 8
BATCH = 2
LN_EPS = 1e-12
HEAD_PAD = 128          # lane-padded fused head output width (cols 0-1 logits, col 2 intensity)


# ---------------------------- fused Pallas kernel -----------------------------
def _fused_forward_kernel(
    x_ref, mask_ref, lex_ref,
    emb_ln_g_ref, emb_ln_b_ref,
    wq_ref, bq_ref, wk_ref, bk_ref, wv_ref, bv_ref,   # per-head stacked [L*NH, ...]
    wo_ref, bo_ref,
    ln1_g_ref, ln1_b_ref,
    w1_ref, b1_ref, w2_ref, b2_ref,
    ln2_g_ref, ln2_b_ref,
    pool_w_ref, pool_b_ref,
    head_w_ref, head_lex_w_ref, head_b_ref,
    out_ref,
    attn_ref,                                         # VMEM scratch [B*S, H]
):
    f32 = jnp.float32

    def matmul(a, b):
        return jnp.dot(a, b, preferred_element_type=f32)

    def layer_norm(x, g, b):
        mean = jnp.mean(x, axis=-1, keepdims=True)
        var = jnp.mean((x - mean) ** 2, axis=-1, keepdims=True)
        return (x - mean) * lax.rsqrt(var + LN_EPS) * g + b

    # embeddings -> LayerNorm (no zero residual stream)
    h = layer_norm(x_ref[...], emb_ln_g_ref[...], emb_ln_b_ref[...])

    # additive attention-mask bias, [B, S]
    mask_bias = (1.0 - mask_ref[...]) * -1e9

    # ---- transformer layers: fully unrolled, everything stays in VMEM ----
    for l in range(N_LAYERS):
        attn_ref[...] = jnp.zeros_like(attn_ref)

        for hd in range(N_HEADS):
            idx = l * N_HEADS + hd
            # per-head projections over all B*S rows (attention scale pre-folded into wq/bq)
            q_h = matmul(h, wq_ref[idx]) + bq_ref[idx]        # [B*S, dh]
            k_h = matmul(h, wk_ref[idx]) + bk_ref[idx]
            v_h = matmul(h, wv_ref[idx]) + bv_ref[idx]
            wo_h = wo_ref[idx]                                # [dh, H]
            for b in range(BATCH):
                r0 = b * SEQ
                q_bh = q_h[r0:r0 + SEQ, :]                    # [S, dh]
                k_bh = k_h[r0:r0 + SEQ, :]
                v_bh = v_h[r0:r0 + SEQ, :]
                scores = lax.dot_general(                     # q @ k^T, [S, S]
                    q_bh, k_bh, (((1,), (1,)), ((), ())),
                    preferred_element_type=f32) + mask_bias[b:b + 1, :]
                probs = jax.nn.softmax(scores, axis=-1)
                ctx = matmul(probs, v_bh)                     # [S, dh]
                # output projection accumulated head-by-head
                # (== concat_heads(ctx) @ Wo since Wo rows are grouped per head)
                attn_ref[r0:r0 + SEQ, :] += matmul(ctx, wo_h)

        h = layer_norm(attn_ref[...] + bo_ref[l] + h, ln1_g_ref[l], ln1_b_ref[l])

        ff = matmul(h, w1_ref[l]) + b1_ref[l]
        # TODO(synk): HF bert-base-chinese uses exact (erf) GELU; tanh approximation kept.
        ff = jax.nn.gelu(ff, approximate=True)
        ff = matmul(ff, w2_ref[l]) + b2_ref[l]
        h = layer_norm(ff + h, ln2_g_ref[l], ln2_b_ref[l])

    # ---- pooler (dense + tanh on [CLS]) + fused classifier/regressor heads ----
    # torch.cat([pooled, lex], 1) @ W == pooled @ W_h + lex * W_l  (split-weight trick),
    # emitted as a single lane-padded [B, HEAD_PAD] store.
    for b in range(BATCH):
        cls_b = h[b * SEQ:b * SEQ + 1, :]                     # [1, H]
        pooled = jnp.tanh(matmul(cls_b, pool_w_ref[...]) + pool_b_ref[...])
        lex_b = lex_ref[b:b + 1, :]                           # [1, 1]
        out_ref[b:b + 1, :] = (matmul(pooled, head_w_ref[...])
                               + lex_b * head_lex_w_ref[...] + head_b_ref[...])


# ------------------------------ parameters ------------------------------------
def init_params(key):
    keys = iter(jax.random.split(key, 64))

    def w(shape, scale=0.02):
        return (scale * jax.random.normal(next(keys), shape)).astype(jnp.float32)

    def zeros(shape):
        return jnp.zeros(shape, jnp.float32)

    def ones(shape):
        return jnp.ones(shape, jnp.float32)

    attn_scale = 1.0 / (HEAD_DIM ** 0.5)

    def per_head_in(wm):    # [H, H] -> [NH, H, dh]  (output columns split by head)
        return wm.reshape(HIDDEN, N_HEADS, HEAD_DIM).transpose(1, 0, 2)

    def per_head_bias(bv):  # [1, H] -> [NH, 1, dh]
        return bv.reshape(N_HEADS, 1, HEAD_DIM)

    def per_head_out(wm):   # [H, H] -> [NH, dh, H]  (input rows split by head)
        return wm.reshape(N_HEADS, HEAD_DIM, HIDDEN)

    L = {k: [] for k in ["wq_h", "bq_h", "wk_h", "bk_h", "wv_h", "bv_h",
                         "wo_h", "bo", "ln1_g", "ln1_b",
                         "w1", "b1", "w2", "b2", "ln2_g", "ln2_b"]}
    for _ in range(N_LAYERS):
        wq, wk, wv = w((HIDDEN, HIDDEN)), w((HIDDEN, HIDDEN)), w((HIDDEN, HIDDEN))
        wo = w((HIDDEN, HIDDEN))
        bq, bk, bv = zeros((1, HIDDEN)), zeros((1, HIDDEN)), zeros((1, HIDDEN))
        # fold the 1/sqrt(head_dim) attention scale into the query projection
        L["wq_h"].append(per_head_in(wq) * attn_scale)
        L["bq_h"].append(per_head_bias(bq) * attn_scale)
        L["wk_h"].append(per_head_in(wk)); L["bk_h"].append(per_head_bias(bk))
        L["wv_h"].append(per_head_in(wv)); L["bv_h"].append(per_head_bias(bv))
        L["wo_h"].append(per_head_out(wo)); L["bo"].append(zeros((1, HIDDEN)))
        L["ln1_g"].append(ones((1, HIDDEN))); L["ln1_b"].append(zeros((1, HIDDEN)))
        L["w1"].append(w((HIDDEN, INTERMEDIATE))); L["b1"].append(zeros((1, INTERMEDIATE)))
        L["w2"].append(w((INTERMEDIATE, HIDDEN))); L["b2"].append(zeros((1, HIDDEN)))
        L["ln2_g"].append(ones((1, HIDDEN))); L["ln2_b"].append(zeros((1, HIDDEN)))

    # classifier + regressor fused into one lane-padded head
    cls_w_h, cls_w_l, cls_b = w((HIDDEN, 2)), w((1, 2)), zeros((1, 2))
    reg_w_h, reg_w_l, reg_b = w((HIDDEN, 1)), w((1, 1)), zeros((1, 1))
    head_w = jnp.zeros((HIDDEN, HEAD_PAD), jnp.float32)
    head_w = head_w.at[:, 0:2].set(cls_w_h).at[:, 2:3].set(reg_w_h)
    head_lex_w = jnp.zeros((1, HEAD_PAD), jnp.float32)
    head_lex_w = head_lex_w.at[:, 0:2].set(cls_w_l).at[:, 2:3].set(reg_w_l)
    head_b = jnp.zeros((1, HEAD_PAD), jnp.float32)
    head_b = head_b.at[:, 0:2].set(cls_b).at[:, 2:3].set(reg_b)

    params = {
        "word_emb": w((VOCAB, HIDDEN)),
        "pos_emb": w((MAX_POS, HIDDEN)),
        "type_emb": w((2, HIDDEN)),
        "emb_ln_g": ones((1, HIDDEN)), "emb_ln_b": zeros((1, HIDDEN)),
        "pool_w": w((HIDDEN, HIDDEN)), "pool_b": zeros((1, HIDDEN)),
        "head_w": head_w, "head_lex_w": head_lex_w, "head_b": head_b,
    }
    # stack per-layer (and per-head) params with a flat leading index for the kernel
    for k, v in L.items():
        stacked = jnp.stack(v)                              # [L, ...]
        if stacked.ndim == 4:                               # per-head: [L, NH, ...] -> [L*NH, ...]
            stacked = stacked.reshape((N_LAYERS * N_HEADS,) + stacked.shape[2:])
        params[k] = stacked
    return params


# ------------------------------- forward --------------------------------------
def multitask_forward(params, input_ids, attention_mask, lexicon_feat):
    B, S = input_ids.shape

    # embedding lookup + sum stays in plain JAX (gather); token_type hard-coded to 0
    emb = (jnp.take(params["word_emb"], input_ids, axis=0)
           + params["pos_emb"][None, :S, :]
           + params["type_emb"][0][None, None, :])
    x = emb.reshape(B * S, HIDDEN).astype(jnp.float32)

    vmem = pl.BlockSpec(memory_space=pltpu.MemorySpace.VMEM)
    inputs = (
        x,
        attention_mask.astype(jnp.float32),
        lexicon_feat.astype(jnp.float32),
        params["emb_ln_g"], params["emb_ln_b"],
        params["wq_h"], params["bq_h"], params["wk_h"], params["bk_h"],
        params["wv_h"], params["bv_h"], params["wo_h"], params["bo"],
        params["ln1_g"], params["ln1_b"],
        params["w1"], params["b1"], params["w2"], params["b2"],
        params["ln2_g"], params["ln2_b"],
        params["pool_w"], params["pool_b"],
        params["head_w"], params["head_lex_w"], params["head_b"],
    )

    out = pl.pallas_call(
        _fused_forward_kernel,
        out_shape=jax.ShapeDtypeStruct((B, HEAD_PAD), jnp.float32),
        in_specs=[vmem] * len(inputs),
        out_specs=vmem,
        scratch_shapes=[pltpu.VMEM((B * S, HIDDEN), jnp.float32)],
    )(*inputs)

    logits = out[:, :2]            # classifier
    intensity = out[:, 2]          # regressor (already squeezed)
    return logits, intensity


# --------------------------------- main ----------------------------------------
if __name__ == "__main__":
    key = jax.random.PRNGKey(0)
    pk, ik, lk = jax.random.split(key, 3)
    params = init_params(pk)

    input_ids = jax.random.randint(ik, (BATCH, SEQ), 0, VOCAB, dtype=jnp.int32)
    attention_mask = jnp.ones((BATCH, SEQ), jnp.int32)
    lexicon_feat = jax.random.normal(lk, (BATCH, 1), jnp.float32)

    fwd = jax.jit(multitask_forward)
    logits, intensity = fwd(params, input_ids, attention_mask, lexicon_feat)
    jax.block_until_ready((logits, intensity))
    assert logits.shape == (BATCH, 2), logits.shape
    assert intensity.shape == (BATCH,), intensity.shape
    print("KERNEL_OK")
</pallas_src>

<mosaic_0001>
module attributes {stable_mosaic.version = 11 : i64} {
  func.func @_fused_forward_kernel(%arg0: memref<16x32xf32, #tpu.memory_space<vmem>>, %arg1: memref<2x8xf32, #tpu.memory_space<vmem>>, %arg2: memref<2x1xf32, #tpu.memory_space<vmem>>, %arg3: memref<1x32xf32, #tpu.memory_space<vmem>>, %arg4: memref<1x32xf32, #tpu.memory_space<vmem>>, %arg5: memref<8x32x8xf32, #tpu.memory_space<vmem>>, %arg6: memref<8x1x8xf32, #tpu.memory_space<vmem>>, %arg7: memref<8x32x8xf32, #tpu.memory_space<vmem>>, %arg8: memref<8x1x8xf32, #tpu.memory_space<vmem>>, %arg9: memref<8x32x8xf32, #tpu.memory_space<vmem>>, %arg10: memref<8x1x8xf32, #tpu.memory_space<vmem>>, %arg11: memref<8x8x32xf32, #tpu.memory_space<vmem>>, %arg12: memref<2x1x32xf32, #tpu.memory_space<vmem>>, %arg13: memref<2x1x32xf32, #tpu.memory_space<vmem>>, %arg14: memref<2x1x32xf32, #tpu.memory_space<vmem>>, %arg15: memref<2x32x64xf32, #tpu.memory_space<vmem>>, %arg16: memref<2x1x64xf32, #tpu.memory_space<vmem>>, %arg17: memref<2x64x32xf32, #tpu.memory_space<vmem>>, %arg18: memref<2x1x32xf32, #tpu.memory_space<vmem>>, %arg19: memref<2x1x32xf32, #tpu.memory_space<vmem>>, %arg20: memref<2x1x32xf32, #tpu.memory_space<vmem>>, %arg21: memref<32x32xf32, #tpu.memory_space<vmem>>, %arg22: memref<1x32xf32, #tpu.memory_space<vmem>>, %arg23: memref<32x128xf32, #tpu.memory_space<vmem>>, %arg24: memref<1x128xf32, #tpu.memory_space<vmem>>, %arg25: memref<1x128xf32, #tpu.memory_space<vmem>>, %arg26: memref<2x128xf32, #tpu.memory_space<vmem>>, %arg27: memref<16x32xf32, #tpu.memory_space<vmem>>) attributes {dimension_semantics = [], scalar_prefetch = 0 : i64, scratch_operands = 1 : i64, tpu.core_type = #tpu.core_type<tc>} {
    %c0 = arith.constant 0 : index
    %c0_0 = arith.constant 0 : index
    %0 = vector.load %arg0[%c0, %c0_0] : memref<16x32xf32, #tpu.memory_space<vmem>>, vector<16x32xf32>
    %c0_1 = arith.constant 0 : index
    %c0_2 = arith.constant 0 : index
    %1 = vector.load %arg3[%c0_1, %c0_2] : memref<1x32xf32, #tpu.memory_space<vmem>>, vector<1x32xf32>
    %c0_3 = arith.constant 0 : index
    %c0_4 = arith.constant 0 : index
    %2 = vector.load %arg4[%c0_3, %c0_4] : memref<1x32xf32, #tpu.memory_space<vmem>>, vector<1x32xf32>
    %cst = arith.constant dense<0.000000e+00> : vector<16xf32>
    %3 = vector.multi_reduction <add>, %0, %cst [1] : vector<16x32xf32> to vector<16xf32>
    %4 = vector.shape_cast %3 : vector<16xf32> to vector<16x1xf32>
    %cst_5 = arith.constant 3.200000e+01 : f32
    %5 = vector.broadcast %cst_5 : f32 to vector<16x1xf32>
    %6 = arith.divf %4, %5 : vector<16x1xf32>
    %7 = vector.broadcast %6 : vector<16x1xf32> to vector<16x32xf32>
    %8 = arith.subf %0, %7 : vector<16x32xf32>
    %9 = arith.mulf %8, %8 : vector<16x32xf32>
    %cst_6 = arith.constant dense<0.000000e+00> : vector<16xf32>
    %10 = vector.multi_reduction <add>, %9, %cst_6 [1] : vector<16x32xf32> to vector<16xf32>
    %11 = vector.shape_cast %10 : vector<16xf32> to vector<16x1xf32>
    %cst_7 = arith.constant 3.200000e+01 : f32
    %12 = vector.broadcast %cst_7 : f32 to vector<16x1xf32>
    %13 = arith.divf %11, %12 : vector<16x1xf32>
    %14 = vector.broadcast %6 : vector<16x1xf32> to vector<16x32xf32>
    %15 = arith.subf %0, %14 : vector<16x32xf32>
    %cst_8 = arith.constant 9.99999996E-13 : f32
    %16 = vector.broadcast %cst_8 : f32 to vector<16x1xf32>
    %17 = arith.addf %13, %16 : vector<16x1xf32>
    %18 = math.rsqrt %17 : vector<16x1xf32>
    %19 = vector.broadcast %18 : vector<16x1xf32> to vector<16x32xf32>
    %20 = arith.mulf %15, %19 : vector<16x32xf32>
    %21 = vector.broadcast %1 : vector<1x32xf32> to vector<16x32xf32>
    %22 = arith.mulf %20, %21 : vector<16x32xf32>
    %23 = vector.broadcast %2 : vector<1x32xf32> to vector<16x32xf32>
    %24 = arith.addf %22, %23 : vector<16x32xf32>
    %c0_9 = arith.constant 0 : index
    %c0_10 = arith.constant 0 : index
    %25 = vector.load %arg1[%c0_9, %c0_10] : memref<2x8xf32, #tpu.memory_space<vmem>>, vector<2x8xf32>
    %cst_11 = arith.constant 1.000000e+00 : f32
    %26 = vector.broadcast %cst_11 : f32 to vector<2x8xf32>
    %27 = arith.subf %26, %25 : vector<2x8xf32>
    %cst_12 = arith.constant -1.000000e+09 : f32
    %28 = vector.broadcast %cst_12 : f32 to vector<2x8xf32>
    %29 = arith.mulf %27, %28 : vector<2x8xf32>
    %cst_13 = arith.constant 0.000000e+00 : f32
    %30 = vector.broadcast %cst_13 : f32 to vector<16x32xf32>
    %c0_14 = arith.constant 0 : index
    %c0_15 = arith.constant 0 : index
    %31 = vector.load %arg27[%c0_14, %c0_15] : memref<16x32xf32, #tpu.memory_space<vmem>>, vector<16x32xf32>
    tpu.vector_store %arg27[%c0_14, %c0_15], %30 {strides = array<i32>} : memref<16x32xf32, #tpu.memory_space<vmem>>, vector<16x32xf32>,
    %c0_16 = arith.constant 0 : index
    %c0_17 = arith.constant 0 : index
    %c0_18 = arith.constant 0 : index
    %32 = vector.load %arg5[%c0_16, %c0_17, %c0_18] : memref<8x32x8xf32, #tpu.memory_space<vmem>>, vector<1x32x8xf32>
    %33 = vector.shape_cast %32 : vector<1x32x8xf32> to vector<32x8xf32>
    %cst_19 = arith.constant dense<0.000000e+00> : vector<16x8xf32>
    %34 = tpu.matmul %24, %33, %cst_19 {dimension_numbers = #tpu.dot_dimension_numbers<[1], [0], [0], [1], [0, 0, 1, 1], [], []>} : vector<16x32xf32>, vector<32x8xf32>, vector<16x8xf32> -> vector<16x8xf32>
    %c0_20 = arith.constant 0 : index
    %c0_21 = arith.constant 0 : index
    %c0_22 = arith.constant 0 : index
    %35 = vector.load %arg6[%c0_20, %c0_21, %c0_22] : memref<8x1x8xf32, #tpu.memory_space<vmem>>, vector<1x1x8xf32>
    %36 = vector.shape_cast %35 : vector<1x1x8xf32> to vector<1x8xf32>
    %37 = vector.broadcast %36 : vector<1x8xf32> to vector<16x8xf32>
    %38 = arith.addf %34, %37 : vector<16x8xf32>
    %c0_23 = arith.constant 0 : index
    %c0_24 = arith.constant 0 : index
    %c0_25 = arith.constant 0 : index
    %39 = vector.load %arg7[%c0_23, %c0_24, %c0_25] : memref<8x32x8xf32, #tpu.memory_space<vmem>>, vector<1x32x8xf32>
    %40 = vector.shape_cast %39 : vector<1x32x8xf32> to vector<32x8xf32>
    %cst_26 = arith.constant dense<0.000000e+00> : vector<16x8xf32>
    %41 = tpu.matmul %24, %40, %cst_26 {dimension_numbers = #tpu.dot_dimension_numbers<[1], [0], [0], [1], [0, 0, 1, 1], [], []>} : vector<16x32xf32>, vector<32x8xf32>, vector<16x8xf32> -> vector<16x8xf32>
    %c0_27 = arith.constant 0 : index
    %c0_28 = arith.constant 0 : index
    %c0_29 = arith.constant 0 : index
    %42 = vector.load %arg8[%c0_27, %c0_28, %c0_29] : memref<8x1x8xf32, #tpu.memory_space<vmem>>, vector<1x1x8xf32>
    %43 = vector.shape_cast %42 : vector<1x1x8xf32> to vector<1x8xf32>
    %44 = vector.broadcast %43 : vector<1x8xf32> to vector<16x8xf32>
    %45 = arith.addf %41, %44 : vector<16x8xf32>
    %c0_30 = arith.constant 0 : index
    %c0_31 = arith.constant 0 : index
    %c0_32 = arith.constant 0 : index
    %46 = vector.load %arg9[%c0_30, %c0_31, %c0_32] : memref<8x32x8xf32, #tpu.memory_space<vmem>>, vector<1x32x8xf32>
    %47 = vector.shape_cast %46 : vector<1x32x8xf32> to vector<32x8xf32>
    %cst_33 = arith.constant dense<0.000000e+00> : vector<16x8xf32>
    %48 = tpu.matmul %24, %47, %cst_33 {dimension_numbers = #tpu.dot_dimension_numbers<[1], [0], [0], [1], [0, 0, 1, 1], [], []>} : vector<16x32xf32>, vector<32x8xf32>, vector<16x8xf32> -> vector<16x8xf32>
    %c0_34 = arith.constant 0 : index
    %c0_35 = arith.constant 0 : index
    %c0_36 = arith.constant 0 : index
    %49 = vector.load %arg10[%c0_34, %c0_35, %c0_36] : memref<8x1x8xf32, #tpu.memory_space<vmem>>, vector<1x1x8xf32>
    %50 = vector.shape_cast %49 : vector<1x1x8xf32> to vector<1x8xf32>
    %51 = vector.broadcast %50 : vector<1x8xf32> to vector<16x8xf32>
    %52 = arith.addf %48, %51 : vector<16x8xf32>
    %c0_37 = arith.constant 0 : index
    %c0_38 = arith.constant 0 : index
    %c0_39 = arith.constant 0 : index
    %53 = vector.load %arg11[%c0_37, %c0_38, %c0_39] : memref<8x8x32xf32, #tpu.memory_space<vmem>>, vector<1x8x32xf32>
    %54 = vector.shape_cast %53 : vector<1x8x32xf32> to vector<8x32xf32>
    %55 = vector.extract_strided_slice %38 {offsets = [0, 0], sizes = [8, 8], strides = [1, 1]} : vector<16x8xf32> to vector<8x8xf32>
    %56 = vector.extract_strided_slice %45 {offsets = [0, 0], sizes = [8, 8], strides = [1, 1]} : vector<16x8xf32> to vector<8x8xf32>
    %57 = vector.extract_strided_slice %52 {offsets = [0, 0], sizes = [8, 8], strides = [1, 1]} : vector<16x8xf32> to vector<8x8xf32>
    %cst_40 = arith.constant dense<0.000000e+00> : vector<8x8xf32>
    %58 = tpu.matmul %55, %56, %cst_40 {dimension_numbers = #tpu.dot_dimension_numbers<[1], [1], [0], [0], [0, 0, 1, 0], [], []>} : vector<8x8xf32>, vector<8x8xf32>, vector<8x8xf32> -> vector<8x8xf32>
    %59 = vector.extract_strided_slice %29 {offsets = [0, 0], sizes = [1, 8], strides = [1, 1]} : vector<2x8xf32> to vector<1x8xf32>
    %60 = vector.broadcast %59 : vector<1x8xf32> to vector<8x8xf32>
    %61 = arith.addf %58, %60 : vector<8x8xf32>
    %cst_41 = arith.constant dense<0xFF800000> : vector<8xf32>
    %62 = vector.multi_reduction <maximumf>, %61, %cst_41 [1] : vector<8x8xf32> to vector<8xf32>
    %cst_42 = arith.constant 0xFF800000 : f32
    %63 = vector.broadcast %cst_42 : f32 to vector<8xf32>
    %64 = arith.maximumf %63, %62 : vector<8xf32>
    %65 = vector.shape_cast %64 : vector<8xf32> to vector<8x1xf32>
    %66 = vector.broadcast %65 : vector<8x1xf32> to vector<8x8xf32>
    %67 = arith.subf %61, %66 : vector<8x8xf32>
    %68 = math.exp %67 : vector<8x8xf32>
    %cst_43 = arith.constant dense<0.000000e+00> : vector<8xf32>
    %69 = vector.multi_reduction <add>, %68, %cst_43 [1] : vector<8x8xf32> to vector<8xf32>
    %70 = vector.shape_cast %69 : vector<8xf32> to vector<8x1xf32>
    %71 = vector.broadcast %70 : vector<8x1xf32> to vector<8x8xf32>
    %72 = arith.divf %68, %71 : vector<8x8xf32>
    %cst_44 = arith.constant dense<0.000000e+00> : vector<8x8xf32>
    %73 = tpu.matmul %72, %57, %cst_44 {dimension_numbers = #tpu.dot_dimension_numbers<[1], [0], [0], [1], [0, 0, 1, 1], [], []>} : vector<8x8xf32>, vector<8x8xf32>, vector<8x8xf32> -> vector<8x8xf32>
    %c0_45 = arith.constant 0 : index
    %c0_46 = arith.constant 0 : index
    %74 = vector.load %arg27[%c0_45, %c0_46] : memref<16x32xf32, #tpu.memory_space<vmem>>, vector<8x32xf32>
    %cst_47 = arith.constant dense<0.000000e+00> : vector<8x32xf32>
    %75 = tpu.matmul %73, %54, %cst_47 {dimension_numbers = #tpu.dot_dimension_numbers<[1], [0], [0], [1], [0, 0, 1, 1], [], []>} : vector<8x8xf32>, vector<8x32xf32>, vector<8x32xf32> -> vector<8x32xf32>
    %76 = arith.addf %74, %75 : vector<8x32xf32>
    %c0_48 = arith.constant 0 : index
    %c0_49 = arith.constant 0 : index
    %77 = vector.load %arg27[%c0_48, %c0_49] : memref<16x32xf32, #tpu.memory_space<vmem>>, vector<8x32xf32>
    tpu.vector_store %arg27[%c0_48, %c0_49], %76 {strides = array<i32>} : memref<16x32xf32, #tpu.memory_space<vmem>>, vector<8x32xf32>,
    %78 = vector.extract_strided_slice %38 {offsets = [8, 0], sizes = [8, 8], strides = [1, 1]} : vector<16x8xf32> to vector<8x8xf32>
    %79 = vector.extract_strided_slice %45 {offsets = [8, 0], sizes = [8, 8], strides = [1, 1]} : vector<16x8xf32> to vector<8x8xf32>
    %80 = vector.extract_strided_slice %52 {offsets = [8, 0], sizes = [8, 8], strides = [1, 1]} : vector<16x8xf32> to vector<8x8xf32>
    %cst_50 = arith.constant dense<0.000000e+00> : vector<8x8xf32>
    %81 = tpu.matmul %78, %79, %cst_50 {dimension_numbers = #tpu.dot_dimension_numbers<[1], [1], [0], [0], [0, 0, 1, 0], [], []>} : vector<8x8xf32>, vector<8x8xf32>, vector<8x8xf32> -> vector<8x8xf32>
    %82 = vector.extract_strided_slice %29 {offsets = [1, 0], sizes = [1, 8], strides = [1, 1]} : vector<2x8xf32> to vector<1x8xf32>
    %83 = vector.broadcast %82 : vector<1x8xf32> to vector<8x8xf32>
    %84 = arith.addf %81, %83 : vector<8x8xf32>
    %cst_51 = arith.constant dense<0xFF800000> : vector<8xf32>
    %85 = vector.multi_reduction <maximumf>, %84, %cst_51 [1] : vector<8x8xf32> to vector<8xf32>
    %cst_52 = arith.constant 0xFF800000 : f32
    %86 = vector.broadcast %cst_52 : f32 to vector<8xf32>
    %87 = arith.maximumf %86, %85 : vector<8xf32>
    %88 = vector.shape_cast %87 : vector<8xf32> to vector<8x1xf32>
    %89 = vector.broadcast %88 : vector<8x1xf32> to vector<8x8xf32>
    %90 = arith.subf %84, %89 : vector<8x8xf32>
    %91 = math.exp %90 : vector<8x8xf32>
    %cst_53 = arith.constant dense<0.000000e+00> : vector<8xf32>
    %92 = vector.multi_reduction <add>, %91, %cst_53 [1] : vector<8x8xf32> to vector<8xf32>
    %93 = vector.shape_cast %92 : vector<8xf32> to vector<8x1xf32>
    %94 = vector.broadcast %93 : vector<8x1xf32> to vector<8x8xf32>
    %95 = arith.divf %91, %94 : vector<8x8xf32>
    %cst_54 = arith.constant dense<0.000000e+00> : vector<8x8xf32>
    %96 = tpu.matmul %95, %80, %cst_54 {dimension_numbers = #tpu.dot_dimension_numbers<[1], [0], [0], [1], [0, 0, 1, 1], [], []>} : vector<8x8xf32>, vector<8x8xf32>, vector<8x8xf32> -> vector<8x8xf32>
    %c8 = arith.constant 8 : index
    %c0_55 = arith.constant 0 : index
    %97 = vector.load %arg27[%c8, %c0_55] : memref<16x32xf32, #tpu.memory_space<vmem>>, vector<8x32xf32>
    %cst_56 = arith.constant dense<0.000000e+00> : vector<8x32xf32>
    %98 = tpu.matmul %96, %54, %cst_56 {dimension_numbers = #tpu.dot_dimension_numbers<[1], [0], [0], [1], [0, 0, 1, 1], [], []>} : vector<8x8xf32>, vector<8x32xf32>, vector<8x32xf32> -> vector<8x32xf32>
    %99 = arith.addf %97, %98 : vector<8x32xf32>
    %c8_57 = arith.constant 8 : index
    %c0_58 = arith.constant 0 : index
    %100 = vector.load %arg27[%c8_57, %c0_58] : memref<16x32xf32, #tpu.memory_space<vmem>>, vector<8x32xf32>
    tpu.vector_store %arg27[%c8_57, %c0_58], %99 {strides = array<i32>} : memref<16x32xf32, #tpu.memory_space<vmem>>, vector<8x32xf32>,
    %c1 = arith.constant 1 : index
    %c0_59 = arith.constant 0 : index
    %c0_60 = arith.constant 0 : index
    %101 = vector.load %arg5[%c1, %c0_59, %c0_60] : memref<8x32x8xf32, #tpu.memory_space<vmem>>, vector<1x32x8xf32>
    %102 = vector.shape_cast %101 : vector<1x32x8xf32> to vector<32x8xf32>
    %cst_61 = arith.constant dense<0.000000e+00> : vector<16x8xf32>
    %103 = tpu.matmul %24, %102, %cst_61 {dimension_numbers = #tpu.dot_dimension_numbers<[1], [0], [0], [1], [0, 0, 1, 1], [], []>} : vector<16x32xf32>, vector<32x8xf32>, vector<16x8xf32> -> vector<16x8xf32>
    %c1_62 = arith.constant 1 : index
    %c0_63 = arith.constant 0 : index
    %c0_64 = arith.constant 0 : index
    %104 = vector.load %arg6[%c1_62, %c0_63, %c0_64] : memref<8x1x8xf32, #tpu.memory_space<vmem>>, vector<1x1x8xf32>
    %105 = vector.shape_cast %104 : vector<1x1x8xf32> to vector<1x8xf32>
    %106 = vector.broadcast %105 : vector<1x8xf32> to vector<16x8xf32>
    %107 = arith.addf %103, %106 : vector<16x8xf32>
    %c1_65 = arith.constant 1 : index
    %c0_66 = arith.constant 0 : index
    %c0_67 = arith.constant 0 : index
    %108 = vector.load %arg7[%c1_65, %c0_66, %c0_67] : memref<8x32x8xf32, #tpu.memory_space<vmem>>, vector<1x32x8xf32>
    %109 = vector.shape_cast %108 : vector<1x32x8xf32> to vector<32x8xf32>
    %cst_68 = arith.constant dense<0.000000e+00> : vector<16x8xf32>
    %110 = tpu.matmul %24, %109, %cst_68 {dimension_numbers = #tpu.dot_dimension_numbers<[1], [0], [0], [1], [0, 0, 1, 1], [], []>} : vector<16x32xf32>, vector<32x8xf32>, vector<16x8xf32> -> vector<16x8xf32>
    %c1_69 = arith.constant 1 : index
    %c0_70 = arith.constant 0 : index
    %c0_71 = arith.constant 0 : index
    %111 = vector.load %arg8[%c1_69, %c0_70, %c0_71] : memref<8x1x8xf32, #tpu.memory_space<vmem>>, vector<1x1x8xf32>
    %112 = vector.shape_cast %111 : vector<1x1x8xf32> to vector<1x8xf32>
    %113 = vector.broadcast %112 : vector<1x8xf32> to vector<16x8xf32>
    %114 = arith.addf %110, %113 : vector<16x8xf32>
    %c1_72 = arith.constant 1 : index
    %c0_73 = arith.constant 0 : index
    %c0_74 = arith.constant 0 : index
    %115 = vector.load %arg9[%c1_72, %c0_73, %c0_74] : memref<8x32x8xf32, #tpu.memory_space<vmem>>, vector<1x32x8xf32>
    %116 = vector.shape_cast %115 : vector<1x32x8xf32> to vector<32x8xf32>
    %cst_75 = arith.constant dense<0.000000e+00> : vector<16x8xf32>
    %117 = tpu.matmul %24, %116, %cst_75 {dimension_numbers = #tpu.dot_dimension_numbers<[1], [0], [0], [1], [0, 0, 1, 1], [], []>} : vector<16x32xf32>, vector<32x8xf32>, vector<16x8xf32> -> vector<16x8xf32>
    %c1_76 = arith.constant 1 : index
    %c0_77 = arith.constant 0 : index
    %c0_78 = arith.constant 0 : index
    %118 = vector.load %arg10[%c1_76, %c0_77, %c0_78] : memref<8x1x8xf32, #tpu.memory_space<vmem>>, vector<1x1x8xf32>
    %119 = vector.shape_cast %118 : vector<1x1x8xf32> to vector<1x8xf32>
    %120 = vector.broadcast %119 : vector<1x8xf32> to vector<16x8xf32>
    %121 = arith.addf %117, %120 : vector<16x8xf32>
    %c1_79 = arith.constant 1 : index
    %c0_80 = arith.constant 0 : index
    %c0_81 = arith.constant 0 : index
    %122 = vector.load %arg11[%c1_79, %c0_80, %c0_81] : memref<8x8x32xf32, #tpu.memory_space<vmem>>, vector<1x8x32xf32>
    %123 = vector.shape_cast %122 : vector<1x8x32xf32> to vector<8x32xf32>
    %124 = vector.extract_strided_slice %107 {offsets = [0, 0], sizes = [8, 8], strides = [1, 1]} : vector<16x8xf32> to vector<8x8xf32>
    %125 = vector.extract_strided_slice %114 {offsets = [0, 0], sizes = [8, 8], strides = [1, 1]} : vector<16x8xf32> to vector<8x8xf32>
    %126 = vector.extract_strided_slice %121 {offsets = [0, 0], sizes = [8, 8], strides = [1, 1]} : vector<16x8xf32> to vector<8x8xf32>
    %cst_82 = arith.constant dense<0.000000e+00> : vector<8x8xf32>
    %127 = tpu.matmul %124, %125, %cst_82 {dimension_numbers = #tpu.dot_dimension_numbers<[1], [1], [0], [0], [0, 0, 1, 0], [], []>} : vector<8x8xf32>, vector<8x8xf32>, vector<8x8xf32> -> vector<8x8xf32>
    %128 = vector.extract_strided_slice %29 {offsets = [0, 0], sizes = [1, 8], strides = [1, 1]} : vector<2x8xf32> to vector<1x8xf32>
    %129 = vector.broadcast %128 : vector<1x8xf32> to vector<8x8xf32>
    %130 = arith.addf %127, %129 : vector<8x8xf32>
    %cst_83 = arith.constant dense<0xFF800000> : vector<8xf32>
    %131 = vector.multi_reduction <maximumf>, %130, %cst_83 [1] : vector<8x8xf32> to vector<8xf32>
    %cst_84 = arith.constant 0xFF800000 : f32
    %132 = vector.broadcast %cst_84 : f32 to vector<8xf32>
    %133 = arith.maximumf %132, %131 : vector<8xf32>
    %134 = vector.shape_cast %133 : vector<8xf32> to vector<8x1xf32>
    %135 = vector.broadcast %134 : vector<8x1xf32> to vector<8x8xf32>
    %136 = arith.subf %130, %135 : vector<8x8xf32>
    %137 = math.exp %136 : vector<8x8xf32>
    %cst_85 = arith.constant dense<0.000000e+00> : vector<8xf32>
    %138 = vector.multi_reduction <add>, %137, %cst_85 [1] : vector<8x8xf32> to vector<8xf32>
    %139 = vector.shape_cast %138 : vector<8xf32> to vector<8x1xf32>
    %140 = vector.broadcast %139 : vector<8x1xf32> to vector<8x8xf32>
    %141 = arith.divf %137, %140 : vector<8x8xf32>
    %cst_86 = arith.constant dense<0.000000e+00> : vector<8x8xf32>
    %142 = tpu.matmul %141, %126, %cst_86 {dimension_numbers = #tpu.dot_dimension_numbers<[1], [0], [0], [1], [0, 0, 1, 1], [], []>} : vector<8x8xf32>, vector<8x8xf32>, vector<8x8xf32> -> vector<8x8xf32>
    %c0_87 = arith.constant 0 : index
    %c0_88 = arith.constant 0 : index
    %143 = vector.load %arg27[%c0_87, %c0_88] : memref<16x32xf32, #tpu.memory_space<vmem>>, vector<8x32xf32>
    %cst_89 = arith.constant dense<0.000000e+00> : vector<8x32xf32>
    %144 = tpu.matmul %142, %123, %cst_89 {dimension_numbers = #tpu.dot_dimension_numbers<[1], [0], [0], [1], [0, 0, 1, 1], [], []>} : vector<8x8xf32>, vector<8x32xf32>, vector<8x32xf32> -> vector<8x32xf32>
    %145 = arith.addf %143, %144 : vector<8x32xf32>
    %c0_90 = arith.constant 0 : index
    %c0_91 = arith.constant 0 : index
    %146 = vector.load %arg27[%c0_90, %c0_91] : memref<16x32xf32, #tpu.memory_space<vmem>>, vector<8x32xf32>
    tpu.vector_store %arg27[%c0_90, %c0_91], %145 {strides = array<i32>} : memref<16x32xf32, #tpu.memory_space<vmem>>, vector<8x32xf32>,
    %147 = vector.extract_strided_slice %107 {offsets = [8, 0], sizes = [8, 8], strides = [1, 1]} : vector<16x8xf32> to vector<8x8xf32>
    %148 = vector.extract_strided_slice %114 {offsets = [8, 0], sizes = [8, 8], strides = [1, 1]} : vector<16x8xf32> to vector<8x8xf32>
    %149 = vector.extract_strided_slice %121 {offsets = [8, 0], sizes = [8, 8], strides = [1, 1]} : vector<16x8xf32> to vector<8x8xf32>
    %cst_92 = arith.constant dense<0.000000e+00> : vector<8x8xf32>
    %150 = tpu.matmul %147, %148, %cst_92 {dimension_numbers = #tpu.dot_dimension_numbers<[1], [1], [0], [0], [0, 0, 1, 0], [], []>} : vector<8x8xf32>, vector<8x8xf32>, vector<8x8xf32> -> vector<8x8xf32>
    %151 = vector.extract_strided_slice %29 {offsets = [1, 0], sizes = [1, 8], strides = [1, 1]} : vector<2x8xf32> to vector<1x8xf32>
    %152 = vector.broadcast %151 : vector<1x8xf32> to vector<8x8xf32>
    %153 = arith.addf %150, %152 : vector<8x8xf32>
    %cst_93 = arith.constant dense<0xFF800000> : vector<8xf32>
    %154 = vector.multi_reduction <maximumf>, %153, %cst_93 [1] : vector<8x8xf32> to vector<8xf32>
    %cst_94 = arith.constant 0xFF800000 : f32
    %155 = vector.broadcast %cst_94 : f32 to vector<8xf32>
    %156 = arith.maximumf %155, %154 : vector<8xf32>
    %157 = vector.shape_cast %156 : vector<8xf32> to vector<8x1xf32>
    %158 = vector.broadcast %157 : vector<8x1xf32> to vector<8x8xf32>
    %159 = arith.subf %153, %158 : vector<8x8xf32>
    %160 = math.exp %159 : vector<8x8xf32>
    %cst_95 = arith.constant dense<0.000000e+00> : vector<8xf32>
    %161 = vector.multi_reduction <add>, %160, %cst_95 [1] : vector<8x8xf32> to vector<8xf32>
    %162 = vector.shape_cast %161 : vector<8xf32> to vector<8x1xf32>
    %163 = vector.broadcast %162 : vector<8x1xf32> to vector<8x8xf32>
    %164 = arith.divf %160, %163 : vector<8x8xf32>
    %cst_96 = arith.constant dense<0.000000e+00> : vector<8x8xf32>
    %165 = tpu.matmul %164, %149, %cst_96 {dimension_numbers = #tpu.dot_dimension_numbers<[1], [0], [0], [1], [0, 0, 1, 1], [], []>} : vector<8x8xf32>, vector<8x8xf32>, vector<8x8xf32> -> vector<8x8xf32>
    %c8_97 = arith.constant 8 : index
    %c0_98 = arith.constant 0 : index
    %166 = vector.load %arg27[%c8_97, %c0_98] : memref<16x32xf32, #tpu.memory_space<vmem>>, vector<8x32xf32>
    %cst_99 = arith.constant dense<0.000000e+00> : vector<8x32xf32>
    %167 = tpu.matmul %165, %123, %cst_99 {dimension_numbers = #tpu.dot_dimension_numbers<[1], [0], [0], [1], [0, 0, 1, 1], [], []>} : vector<8x8xf32>, vector<8x32xf32>, vector<8x32xf32> -> vector<8x32xf32>
    %168 = arith.addf %166, %167 : vector<8x32xf32>
    %c8_100 = arith.constant 8 : index
    %c0_101 = arith.constant 0 : index
    %169 = vector.load %arg27[%c8_100, %c0_101] : memref<16x32xf32, #tpu.memory_space<vmem>>, vector<8x32xf32>
    tpu.vector_store %arg27[%c8_100, %c0_101], %168 {strides = array<i32>} : memref<16x32xf32, #tpu.memory_space<vmem>>, vector<8x32xf32>,
    %c2 = arith.constant 2 : index
    %c0_102 = arith.constant 0 : index
    %c0_103 = arith.constant 0 : index
    %170 = vector.load %arg5[%c2, %c0_102, %c0_103] : memref<8x32x8xf32, #tpu.memory_space<vmem>>, vector<1x32x8xf32>
    %171 = vector.shape_cast %170 : vector<1x32x8xf32> to vector<32x8xf32>
    %cst_104 = arith.constant dense<0.000000e+00> : vector<16x8xf32>
    %172 = tpu.matmul %24, %171, %cst_104 {dimension_numbers = #tpu.dot_dimension_numbers<[1], [0], [0], [1], [0, 0, 1, 1], [], []>} : vector<16x32xf32>, vector<32x8xf32>, vector<16x8xf32> -> vector<16x8xf32>
    %c2_105 = arith.constant 2 : index
    %c0_106 = arith.constant 0 : index
    %c0_107 = arith.constant 0 : index
    %173 = vector.load %arg6[%c2_105, %c0_106, %c0_107] : memref<8x1x8xf32, #tpu.memory_space<vmem>>, vector<1x1x8xf32>
    %174 = vector.shape_cast %173 : vector<1x1x8xf32> to vector<1x8xf32>
    %175 = vector.broadcast %174 : vector<1x8xf32> to vector<16x8xf32>
    %176 = arith.addf %172, %175 : vector<16x8xf32>
    %c2_108 = arith.constant 2 : index
    %c0_109 = arith.constant 0 : index
    %c0_110 = arith.constant 0 : index
    %177 = vector.load %arg7[%c2_108, %c0_109, %c0_110] : memref<8x32x8xf32, #tpu.memory_space<vmem>>, vector<1x32x8xf32>
    %178 = vector.shape_cast %177 : vector<1x32x8xf32> to vector<32x8xf32>
    %cst_111 = arith.constant dense<0.000000e+00> : vector<16x8xf32>
    %179 = tpu.matmul %24, %178, %cst_111 {dimension_numbers = #tpu.dot_dimension_numbers<[1], [0], [0], [1], [0, 0, 1, 1], [], []>} : vector<16x32xf32>, vector<32x8xf32>, vector<16x8xf32> -> vector<16x8xf32>
    %c2_112 = arith.constant 2 : index
    %c0_113 = arith.constant 0 : index
    %c0_114 = arith.constant 0 : index
    %180 = vector.load %arg8[%c2_112, %c0_113, %c0_114] : memref<8x1x8xf32, #tpu.memory_space<vmem>>, vector<1x1x8xf32>
    %181 = vector.shape_cast %180 : vector<1x1x8xf32> to vector<1x8xf32>
    %182 = vector.broadcast %181 : vector<1x8xf32> to vector<16x8xf32>
    %183 = arith.addf %179, %182 : vector<16x8xf32>
    %c2_115 = arith.constant 2 : index
    %c0_116 = arith.constant 0 : index
    %c0_117 = arith.constant 0 : index
    %184 = vector.load %arg9[%c2_115, %c0_116, %c0_117] : memref<8x32x8xf32, #tpu.memory_space<vmem>>, vector<1x32x8xf32>
    %185 = vector.shape_cast %184 : vector<1x32x8xf32> to vector<32x8xf32>
    %cst_118 = arith.constant dense<0.000000e+00> : vector<16x8xf32>
    %186 = tpu.matmul %24, %185, %cst_118 {dimension_numbers = #tpu.dot_dimension_numbers<[1], [0], [0], [1], [0, 0, 1, 1], [], []>} : vector<16x32xf32>, vector<32x8xf32>, vector<16x8xf32> -> vector<16x8xf32>
    %c2_119 = arith.constant 2 : index
    %c0_120 = arith.constant 0 : index
    %c0_121 = arith.constant 0 : index
    %187 = vector.load %arg10[%c2_119, %c0_120, %c0_121] : memref<8x1x8xf32, #tpu.memory_space<vmem>>, vector<1x1x8xf32>
    %188 = vector.shape_cast %187 : vector<1x1x8xf32> to vector<1x8xf32>
    %189 = vector.broadcast %188 : vector<1x8xf32> to vector<16x8xf32>
    %190 = arith.addf %186, %189 : vector<16x8xf32>
    %c2_122 = arith.constant 2 : index
    %c0_123 = arith.constant 0 : index
    %c0_124 = arith.constant 0 : index
    %191 = vector.load %arg11[%c2_122, %c0_123, %c0_124] : memref<8x8x32xf32, #tpu.memory_space<vmem>>, vector<1x8x32xf32>
    %192 = vector.shape_cast %191 : vector<1x8x32xf32> to vector<8x32xf32>
    %193 = vector.extract_strided_slice %176 {offsets = [0, 0], sizes = [8, 8], strides = [1, 1]} : vector<16x8xf32> to vector<8x8xf32>
    %194 = vector.extract_strided_slice %183 {offsets = [0, 0], sizes = [8, 8], strides = [1, 1]} : vector<16x8xf32> to vector<8x8xf32>
    %195 = vector.extract_strided_slice %190 {offsets = [0, 0], sizes = [8, 8], strides = [1, 1]} : vector<16x8xf32> to vector<8x8xf32>
    %cst_125 = arith.constant dense<0.000000e+00> : vector<8x8xf32>
    %196 = tpu.matmul %193, %194, %cst_125 {dimension_numbers = #tpu.dot_dimension_numbers<[1], [1], [0], [0], [0, 0, 1, 0], [], []>} : vector<8x8xf32>, vector<8x8xf32>, vector<8x8xf32> -> vector<8x8xf32>
    %197 = vector.extract_strided_slice %29 {offsets = [0, 0], sizes = [1, 8], strides = [1, 1]} : vector<2x8xf32> to vector<1x8xf32>
    %198 = vector.broadcast %197 : vector<1x8xf32> to vector<8x8xf32>
    %199 = arith.addf %196, %198 : vector<8x8xf32>
    %cst_126 = arith.constant dense<0xFF800000> : vector<8xf32>
    %200 = vector.multi_reduction <maximumf>, %199, %cst_126 [1] : vector<8x8xf32> to vector<8xf32>
    %cst_127 = arith.constant 0xFF800000 : f32
    %201 = vector.broadcast %cst_127 : f32 to vector<8xf32>
    %202 = arith.maximumf %201, %200 : vector<8xf32>
    %203 = vector.shape_cast %202 : vector<8xf32> to vector<8x1xf32>
    %204 = vector.broadcast %203 : vector<8x1xf32> to vector<8x8xf32>
    %205 = arith.subf %199, %204 : vector<8x8xf32>
    %206 = math.exp %205 : vector<8x8xf32>
    %cst_128 = arith.constant dense<0.000000e+00> : vector<8xf32>
    %207 = vector.multi_reduction <add>, %206, %cst_128 [1] : vector<8x8xf32> to vector<8xf32>
    %208 = vector.shape_cast %207 : vector<8xf32> to vector<8x1xf32>
    %209 = vector.broadcast %208 : vector<8x1xf32> to vector<8x8xf32>
    %210 = arith.divf %206, %209 : vector<8x8xf32>
    %cst_129 = arith.constant dense<0.000000e+00> : vector<8x8xf32>
    %211 = tpu.matmul %210, %195, %cst_129 {dimension_numbers = #tpu.dot_dimension_numbers<[1], [0], [0], [1], [0, 0, 1, 1], [], []>} : vector<8x8xf32>, vector<8x8xf32>, vector<8x8xf32> -> vector<8x8xf32>
    %c0_130 = arith.constant 0 : index
    %c0_131 = arith.constant 0 : index
    %212 = vector.load %arg27[%c0_130, %c0_131] : memref<16x32xf32, #tpu.memory_space<vmem>>, vector<8x32xf32>
    %cst_132 = arith.constant dense<0.000000e+00> : vector<8x32xf32>
    %213 = tpu.matmul %211, %192, %cst_132 {dimension_numbers = #tpu.dot_dimension_numbers<[1], [0], [0], [1], [0, 0, 1, 1], [], []>} : vector<8x8xf32>, vector<8x32xf32>, vector<8x32xf32> -> vector<8x32xf32>
    %214 = arith.addf %212, %213 : vector<8x32xf32>
    %c0_133 = arith.constant 0 : index
    %c0_134 = arith.constant 0 : index
    %215 = vector.load %arg27[%c0_133, %c0_134] : memref<16x32xf32, #tpu.memory_space<vmem>>, vector<8x32xf32>
    tpu.vector_store %arg27[%c0_133, %c0_134], %214 {strides = array<i32>} : memref<16x32xf32, #tpu.memory_space<vmem>>, vector<8x32xf32>,
    %216 = vector.extract_strided_slice %176 {offsets = [8, 0], sizes = [8, 8], strides = [1, 1]} : vector<16x8xf32> to vector<8x8xf32>
    %217 = vector.extract_strided_slice %183 {offsets = [8, 0], sizes = [8, 8], strides = [1, 1]} : vector<16x8xf32> to vector<8x8xf32>
    %218 = vector.extract_strided_slice %190 {offsets = [8, 0], sizes = [8, 8], strides = [1, 1]} : vector<16x8xf32> to vector<8x8xf32>
    %cst_135 = arith.constant dense<0.000000e+00> : vector<8x8xf32>
    %219 = tpu.matmul %216, %217, %cst_135 {dimension_numbers = #tpu.dot_dimension_numbers<[1], [1], [0], [0], [0, 0, 1, 0], [], []>} : vector<8x8xf32>, vector<8x8xf32>, vector<8x8xf32> -> vector<8x8xf32>
    %220 = vector.extract_strided_slice %29 {offsets = [1, 0], sizes = [1, 8], strides = [1, 1]} : vector<2x8xf32> to vector<1x8xf32>
    %221 = vector.broadcast %220 : vector<1x8xf32> to vector<8x8xf32>
    %222 = arith.addf %219, %221 : vector<8x8xf32>
    %cst_136 = arith.constant dense<0xFF800000> : vector<8xf32>
    %223 = vector.multi_reduction <maximumf>, %222, %cst_136 [1] : vector<8x8xf32> to vector<8xf32>
    %cst_137 = arith.constant 0xFF800000 : f32
    %224 = vector.broadcast %cst_137 : f32 to vector<8xf32>
    %225 = arith.maximumf %224, %223 : vector<8xf32>
    %226 = vector.shape_cast %225 : vector<8xf32> to vector<8x1xf32>
    %227 = vector.broadcast %226 : vector<8x1xf32> to vector<8x8xf32>
    %228 = arith.subf %222, %227 : vector<8x8xf32>
    %229 = math.exp %228 : vector<8x8xf32>
    %cst_138 = arith.constant dense<0.000000e+00> : vector<8xf32>
    %230 = vector.multi_reduction <add>, %229, %cst_138 [1] : vector<8x8xf32> to vector<8xf32>
    %231 = vector.shape_cast %230 : vector<8xf32> to vector<8x1xf32>
    %232 = vector.broadcast %231 : vector<8x1xf32> to vector<8x8xf32>
    %233 = arith.divf %229, %232 : vector<8x8xf32>
    %cst_139 = arith.constant dense<0.000000e+00> : vector<8x8xf32>
    %234 = tpu.matmul %233, %218, %cst_139 {dimension_numbers = #tpu.dot_dimension_numbers<[1], [0], [0], [1], [0, 0, 1, 1], [], []>} : vector<8x8xf32>, vector<8x8xf32>, vector<8x8xf32> -> vector<8x8xf32>
    %c8_140 = arith.constant 8 : index
    %c0_141 = arith.constant 0 : index
    %235 = vector.load %arg27[%c8_140, %c0_141] : memref<16x32xf32, #tpu.memory_space<vmem>>, vector<8x32xf32>
    %cst_142 = arith.constant dense<0.000000e+00> : vector<8x32xf32>
    %236 = tpu.matmul %234, %192, %cst_142 {dimension_numbers = #tpu.dot_dimension_numbers<[1], [0], [0], [1], [0, 0, 1, 1], [], []>} : vector<8x8xf32>, vector<8x32xf32>, vector<8x32xf32> -> vector<8x32xf32>
    %237 = arith.addf %235, %236 : vector<8x32xf32>
    %c8_143 = arith.constant 8 : index
    %c0_144 = arith.constant 0 : index
    %238 = vector.load %arg27[%c8_143, %c0_144] : memref<16x32xf32, #tpu.memory_space<vmem>>, vector<8x32xf32>
    tpu.vector_store %arg27[%c8_143, %c0_144], %237 {strides = array<i32>} : memref<16x32xf32, #tpu.memory_space<vmem>>, vector<8x32xf32>,
    %c3 = arith.constant 3 : index
    %c0_145 = arith.constant 0 : index
    %c0_146 = arith.constant 0 : index
    %239 = vector.load %arg5[%c3, %c0_145, %c0_146] : memref<8x32x8xf32, #tpu.memory_space<vmem>>, vector<1x32x8xf32>
    %240 = vector.shape_cast %239 : vector<1x32x8xf32> to vector<32x8xf32>
    %cst_147 = arith.constant dense<0.000000e+00> : vector<16x8xf32>
    %241 = tpu.matmul %24, %240, %cst_147 {dimension_numbers = #tpu.dot_dimension_numbers<[1], [0], [0], [1], [0, 0, 1, 1], [], []>} : vector<16x32xf32>, vector<32x8xf32>, vector<16x8xf32> -> vector<16x8xf32>
    %c3_148 = arith.constant 3 : index
    %c0_149 = arith.constant 0 : index
    %c0_150 = arith.constant 0 : index
    %242 = vector.load %arg6[%c3_148, %c0_149, %c0_150] : memref<8x1x8xf32, #tpu.memory_space<vmem>>, vector<1x1x8xf32>
    %243 = vector.shape_cast %242 : vector<1x1x8xf32> to vector<1x8xf32>
    %244 = vector.broadcast %243 : vector<1x8xf32> to vector<16x8xf32>
    %245 = arith.addf %241, %244 : vector<16x8xf32>
    %c3_151 = arith.constant 3 : index
    %c0_152 = arith.constant 0 : index
    %c0_153 = arith.constant 0 : index
    %246 = vector.load %arg7[%c3_151, %c0_152, %c0_153] : memref<8x32x8xf32, #tpu.memory_space<vmem>>, vector<1x32x8xf32>
    %247 = vector.shape_cast %246 : vector<1x32x8xf32> to vector<32x8xf32>
    %cst_154 = arith.constant dense<0.000000e+00> : vector<16x8xf32>
    %248 = tpu.matmul %24, %247, %cst_154 {dimension_numbers = #tpu.dot_dimension_numbers<[1], [0], [0], [1], [0, 0, 1, 1], [], []>} : vector<16x32xf32>, vector<32x8xf32>, vector<16x8xf32> -> vector<16x8xf32>
    %c3_155 = arith.constant 3 : index
    %c0_156 = arith.constant 0 : index
    %c0_157 = arith.constant 0 : index
    %249 = vector.load %arg8[%c3_155, %c0_156, %c0_157] : memref<8x1x8xf32, #tpu.memory_space<vmem>>, vector<1x1x8xf32>
    %250 = vector.shape_cast %249 : vector<1x1x8xf32> to vector<1x8xf32>
    %251 = vector.broadcast %250 : vector<1x8xf32> to vector<16x8xf32>
    %252 = arith.addf %248, %251 : vector<16x8xf32>
    %c3_158 = arith.constant 3 : index
    %c0_159 = arith.constant 0 : index
    %c0_160 = arith.constant 0 : index
    %253 = vector.load %arg9[%c3_158, %c0_159, %c0_160] : memref<8x32x8xf32, #tpu.memory_space<vmem>>, vector<1x32x8xf32>
    %254 = vector.shape_cast %253 : vector<1x32x8xf32> to vector<32x8xf32>
    %cst_161 = arith.constant dense<0.000000e+00> : vector<16x8xf32>
    %255 = tpu.matmul %24, %254, %cst_161 {dimension_numbers = #tpu.dot_dimension_numbers<[1], [0], [0], [1], [0, 0, 1, 1], [], []>} : vector<16x32xf32>, vector<32x8xf32>, vector<16x8xf32> -> vector<16x8xf32>
    %c3_162 = arith.constant 3 : index
    %c0_163 = arith.constant 0 : index
    %c0_164 = arith.constant 0 : index
    %256 = vector.load %arg10[%c3_162, %c0_163, %c0_164] : memref<8x1x8xf32, #tpu.memory_space<vmem>>, vector<1x1x8xf32>
    %257 = vector.shape_cast %256 : vector<1x1x8xf32> to vector<1x8xf32>
    %258 = vector.broadcast %257 : vector<1x8xf32> to vector<16x8xf32>
    %259 = arith.addf %255, %258 : vector<16x8xf32>
    %c3_165 = arith.constant 3 : index
    %c0_166 = arith.constant 0 : index
    %c0_167 = arith.constant 0 : index
    %260 = vector.load %arg11[%c3_165, %c0_166, %c0_167] : memref<8x8x32xf32, #tpu.memory_space<vmem>>, vector<1x8x32xf32>
    %261 = vector.shape_cast %260 : vector<1x8x32xf32> to vector<8x32xf32>
    %262 = vector.extract_strided_slice %245 {offsets = [0, 0], sizes = [8, 8], strides = [1, 1]} : vector<16x8xf32> to vector<8x8xf32>
    %263 = vector.extract_strided_slice %252 {offsets = [0, 0], sizes = [8, 8], strides = [1, 1]} : vector<16x8xf32> to vector<8x8xf32>
    %264 = vector.extract_strided_slice %259 {offsets = [0, 0], sizes = [8, 8], strides = [1, 1]} : vector<16x8xf32> to vector<8x8xf32>
    %cst_168 = arith.constant dense<0.000000e+00> : vector<8x8xf32>
    %265 = tpu.matmul %262, %263, %cst_168 {dimension_numbers = #tpu.dot_dimension_numbers<[1], [1], [0], [0], [0, 0, 1, 0], [], []>} : vector<8x8xf32>, vector<8x8xf32>, vector<8x8xf32> -> vector<8x8xf32>
    %266 = vector.extract_strided_slice %29 {offsets = [0, 0], sizes = [1, 8], strides = [1, 1]} : vector<2x8xf32> to vector<1x8xf32>
    %267 = vector.broadcast %266 : vector<1x8xf32> to vector<8x8xf32>
    %268 = arith.addf %265, %267 : vector<8x8xf32>
    %cst_169 = arith.constant dense<0xFF800000> : vector<8xf32>
    %269 = vector.multi_reduction <maximumf>, %268, %cst_169 [1] : vector<8x8xf32> to vector<8xf32>
    %cst_170 = arith.constant 0xFF800000 : f32
    %270 = vector.broadcast %cst_170 : f32 to vector<8xf32>
    %271 = arith.maximumf %270, %269 : vector<8xf32>
    %272 = vector.shape_cast %271 : vector<8xf32> to vector<8x1xf32>
    %273 = vector.broadcast %272 : vector<8x1xf32> to vector<8x8xf32>
    %274 = arith.subf %268, %273 : vector<8x8xf32>
    %275 = math.exp %274 : vector<8x8xf32>
    %cst_171 = arith.constant dense<0.000000e+00> : vector<8xf32>
    %276 = vector.multi_reduction <add>, %275, %cst_171 [1] : vector<8x8xf32> to vector<8xf32>
    %277 = vector.shape_cast %276 : vector<8xf32> to vector<8x1xf32>
    %278 = vector.broadcast %277 : vector<8x1xf32> to vector<8x8xf32>
    %279 = arith.divf %275, %278 : vector<8x8xf32>
    %cst_172 = arith.constant dense<0.000000e+00> : vector<8x8xf32>
    %280 = tpu.matmul %279, %264, %cst_172 {dimension_numbers = #tpu.dot_dimension_numbers<[1], [0], [0], [1], [0, 0, 1, 1], [], []>} : vector<8x8xf32>, vector<8x8xf32>, vector<8x8xf32> -> vector<8x8xf32>
    %c0_173 = arith.constant 0 : index
    %c0_174 = arith.constant 0 : index
    %281 = vector.load %arg27[%c0_173, %c0_174] : memref<16x32xf32, #tpu.memory_space<vmem>>, vector<8x32xf32>
    %cst_175 = arith.constant dense<0.000000e+00> : vector<8x32xf32>
    %282 = tpu.matmul %280, %261, %cst_175 {dimension_numbers = #tpu.dot_dimension_numbers<[1], [0], [0], [1], [0, 0, 1, 1], [], []>} : vector<8x8xf32>, vector<8x32xf32>, vector<8x32xf32> -> vector<8x32xf32>
    %283 = arith.addf %281, %282 : vector<8x32xf32>
    %c0_176 = arith.constant 0 : index
    %c0_177 = arith.constant 0 : index
    %284 = vector.load %arg27[%c0_176, %c0_177] : memref<16x32xf32, #tpu.memory_space<vmem>>, vector<8x32xf32>
    tpu.vector_store %arg27[%c0_176, %c0_177], %283 {strides = array<i32>} : memref<16x32xf32, #tpu.memory_space<vmem>>, vector<8x32xf32>,
    %285 = vector.extract_strided_slice %245 {offsets = [8, 0], sizes = [8, 8], strides = [1, 1]} : vector<16x8xf32> to vector<8x8xf32>
    %286 = vector.extract_strided_slice %252 {offsets = [8, 0], sizes = [8, 8], strides = [1, 1]} : vector<16x8xf32> to vector<8x8xf32>
    %287 = vector.extract_strided_slice %259 {offsets = [8, 0], sizes = [8, 8], strides = [1, 1]} : vector<16x8xf32> to vector<8x8xf32>
    %cst_178 = arith.constant dense<0.000000e+00> : vector<8x8xf32>
    %288 = tpu.matmul %285, %286, %cst_178 {dimension_numbers = #tpu.dot_dimension_numbers<[1], [1], [0], [0], [0, 0, 1, 0], [], []>} : vector<8x8xf32>, vector<8x8xf32>, vector<8x8xf32> -> vector<8x8xf32>
    %289 = vector.extract_strided_slice %29 {offsets = [1, 0], sizes = [1, 8], strides = [1, 1]} : vector<2x8xf32> to vector<1x8xf32>
    %290 = vector.broadcast %289 : vector<1x8xf32> to vector<8x8xf32>
    %291 = arith.addf %288, %290 : vector<8x8xf32>
    %cst_179 = arith.constant dense<0xFF800000> : vector<8xf32>
    %292 = vector.multi_reduction <maximumf>, %291, %cst_179 [1] : vector<8x8xf32> to vector<8xf32>
    %cst_180 = arith.constant 0xFF800000 : f32
    %293 = vector.broadcast %cst_180 : f32 to vector<8xf32>
    %294 = arith.maximumf %293, %292 : vector<8xf32>
    %295 = vector.shape_cast %294 : vector<8xf32> to vector<8x1xf32>
    %296 = vector.broadcast %295 : vector<8x1xf32> to vector<8x8xf32>
    %297 = arith.subf %291, %296 : vector<8x8xf32>
    %298 = math.exp %297 : vector<8x8xf32>
    %cst_181 = arith.constant dense<0.000000e+00> : vector<8xf32>
    %299 = vector.multi_reduction <add>, %298, %cst_181 [1] : vector<8x8xf32> to vector<8xf32>
    %300 = vector.shape_cast %299 : vector<8xf32> to vector<8x1xf32>
    %301 = vector.broadcast %300 : vector<8x1xf32> to vector<8x8xf32>
    %302 = arith.divf %298, %301 : vector<8x8xf32>
    %cst_182 = arith.constant dense<0.000000e+00> : vector<8x8xf32>
    %303 = tpu.matmul %302, %287, %cst_182 {dimension_numbers = #tpu.dot_dimension_numbers<[1], [0], [0], [1], [0, 0, 1, 1], [], []>} : vector<8x8xf32>, vector<8x8xf32>, vector<8x8xf32> -> vector<8x8xf32>
    %c8_183 = arith.constant 8 : index
    %c0_184 = arith.constant 0 : index
    %304 = vector.load %arg27[%c8_183, %c0_184] : memref<16x32xf32, #tpu.memory_space<vmem>>, vector<8x32xf32>
    %cst_185 = arith.constant dense<0.000000e+00> : vector<8x32xf32>
    %305 = tpu.matmul %303, %261, %cst_185 {dimension_numbers = #tpu.dot_dimension_numbers<[1], [0], [0], [1], [0, 0, 1, 1], [], []>} : vector<8x8xf32>, vector<8x32xf32>, vector<8x32xf32> -> vector<8x32xf32>
    %306 = arith.addf %304, %305 : vector<8x32xf32>
    %c8_186 = arith.constant 8 : index
    %c0_187 = arith.constant 0 : index
    %307 = vector.load %arg27[%c8_186, %c0_187] : memref<16x32xf32, #tpu.memory_space<vmem>>, vector<8x32xf32>
    tpu.vector_store %arg27[%c8_186, %c0_187], %306 {strides = array<i32>} : memref<16x32xf32, #tpu.memory_space<vmem>>, vector<8x32xf32>,
    %c0_188 = arith.constant 0 : index
    %c0_189 = arith.constant 0 : index
    %308 = vector.load %arg27[%c0_188, %c0_189] : memref<16x32xf32, #tpu.memory_space<vmem>>, vector<16x32xf32>
    %c0_190 = arith.constant 0 : index
    %c0_191 = arith.constant 0 : index
    %c0_192 = arith.constant 0 : index
    %309 = vector.load %arg12[%c0_190, %c0_191, %c0_192] : memref<2x1x32xf32, #tpu.memory_space<vmem>>, vector<1x1x32xf32>
    %310 = vector.shape_cast %309 : vector<1x1x32xf32> to vector<1x32xf32>
    %311 = vector.broadcast %310 : vector<1x32xf32> to vector<16x32xf32>
    %312 = arith.addf %308, %311 : vector<16x32xf32>
    %313 = arith.addf %312, %24 : vector<16x32xf32>
    %c0_193 = arith.constant 0 : index
    %c0_194 = arith.constant 0 : index
    %c0_195 = arith.constant 0 : index
    %314 = vector.load %arg13[%c0_193, %c0_194, %c0_195] : memref<2x1x32xf32, #tpu.memory_space<vmem>>, vector<1x1x32xf32>
    %315 = vector.shape_cast %314 : vector<1x1x32xf32> to vector<1x32xf32>
    %c0_196 = arith.constant 0 : index
    %c0_197 = arith.constant 0 : index
    %c0_198 = arith.constant 0 : index
    %316 = vector.load %arg14[%c0_196, %c0_197, %c0_198] : memref<2x1x32xf32, #tpu.memory_space<vmem>>, vector<1x1x32xf32>
    %317 = vector.shape_cast %316 : vector<1x1x32xf32> to vector<1x32xf32>
    %cst_199 = arith.constant dense<0.000000e+00> : vector<16xf32>
    %318 = vector.multi_reduction <add>, %313, %cst_199 [1] : vector<16x32xf32> to vector<16xf32>
    %319 = vector.shape_cast %318 : vector<16xf32> to vector<16x1xf32>
    %cst_200 = arith.constant 3.200000e+01 : f32
    %320 = vector.broadcast %cst_200 : f32 to vector<16x1xf32>
    %321 = arith.divf %319, %320 : vector<16x1xf32>
    %322 = vector.broadcast %321 : vector<16x1xf32> to vector<16x32xf32>
    %323 = arith.subf %313, %322 : vector<16x32xf32>
    %324 = arith.mulf %323, %323 : vector<16x32xf32>
    %cst_201 = arith.constant dense<0.000000e+00> : vector<16xf32>
    %325 = vector.multi_reduction <add>, %324, %cst_201 [1] : vector<16x32xf32> to vector<16xf32>
    %326 = vector.shape_cast %325 : vector<16xf32> to vector<16x1xf32>
    %cst_202 = arith.constant 3.200000e+01 : f32
    %327 = vector.broadcast %cst_202 : f32 to vector<16x1xf32>
    %328 = arith.divf %326, %327 : vector<16x1xf32>
    %329 = vector.broadcast %321 : vector<16x1xf32> to vector<16x32xf32>
    %330 = arith.subf %313, %329 : vector<16x32xf32>
    %cst_203 = arith.constant 9.99999996E-13 : f32
    %331 = vector.broadcast %cst_203 : f32 to vector<16x1xf32>
    %332 = arith.addf %328, %331 : vector<16x1xf32>
    %333 = math.rsqrt %332 : vector<16x1xf32>
    %334 = vector.broadcast %333 : vector<16x1xf32> to vector<16x32xf32>
    %335 = arith.mulf %330, %334 : vector<16x32xf32>
    %336 = vector.broadcast %315 : vector<1x32xf32> to vector<16x32xf32>
    %337 = arith.mulf %335, %336 : vector<16x32xf32>
    %338 = vector.broadcast %317 : vector<1x32xf32> to vector<16x32xf32>
    %339 = arith.addf %337, %338 : vector<16x32xf32>
    %c0_204 = arith.constant 0 : index
    %c0_205 = arith.constant 0 : index
    %c0_206 = arith.constant 0 : index
    %340 = vector.load %arg15[%c0_204, %c0_205, %c0_206] : memref<2x32x64xf32, #tpu.memory_space<vmem>>, vector<1x32x64xf32>
    %341 = vector.shape_cast %340 : vector<1x32x64xf32> to vector<32x64xf32>
    %cst_207 = arith.constant dense<0.000000e+00> : vector<16x64xf32>
    %342 = tpu.matmul %339, %341, %cst_207 {dimension_numbers = #tpu.dot_dimension_numbers<[1], [0], [0], [1], [0, 0, 1, 1], [], []>} : vector<16x32xf32>, vector<32x64xf32>, vector<16x64xf32> -> vector<16x64xf32>
    %c0_208 = arith.constant 0 : index
    %c0_209 = arith.constant 0 : index
    %c0_210 = arith.constant 0 : index
    %343 = vector.load %arg16[%c0_208, %c0_209, %c0_210] : memref<2x1x64xf32, #tpu.memory_space<vmem>>, vector<1x1x64xf32>
    %344 = vector.shape_cast %343 : vector<1x1x64xf32> to vector<1x64xf32>
    %345 = vector.broadcast %344 : vector<1x64xf32> to vector<16x64xf32>
    %346 = arith.addf %342, %345 : vector<16x64xf32>
    %347 = arith.mulf %346, %346 : vector<16x64xf32>
    %348 = arith.mulf %346, %347 : vector<16x64xf32>
    %cst_211 = arith.constant 4.471500e-02 : f32
    %349 = vector.broadcast %cst_211 : f32 to vector<16x64xf32>
    %350 = arith.mulf %349, %348 : vector<16x64xf32>
    %351 = arith.addf %346, %350 : vector<16x64xf32>
    %cst_212 = arith.constant 0.797884583 : f32
    %352 = vector.broadcast %cst_212 : f32 to vector<16x64xf32>
    %353 = arith.mulf %352, %351 : vector<16x64xf32>
    %354 = math.tanh %353 : vector<16x64xf32>
    %cst_213 = arith.constant 1.000000e+00 : f32
    %355 = vector.broadcast %cst_213 : f32 to vector<16x64xf32>
    %356 = arith.addf %355, %354 : vector<16x64xf32>
    %cst_214 = arith.constant 5.000000e-01 : f32
    %357 = vector.broadcast %cst_214 : f32 to vector<16x64xf32>
    %358 = arith.mulf %357, %356 : vector<16x64xf32>
    %359 = arith.mulf %346, %358 : vector<16x64xf32>
    %c0_215 = arith.constant 0 : index
    %c0_216 = arith.constant 0 : index
    %c0_217 = arith.constant 0 : index
    %360 = vector.load %arg17[%c0_215, %c0_216, %c0_217] : memref<2x64x32xf32, #tpu.memory_space<vmem>>, vector<1x64x32xf32>
    %361 = vector.shape_cast %360 : vector<1x64x32xf32> to vector<64x32xf32>
    %cst_218 = arith.constant dense<0.000000e+00> : vector<16x32xf32>
    %362 = tpu.matmul %359, %361, %cst_218 {dimension_numbers = #tpu.dot_dimension_numbers<[1], [0], [0], [1], [0, 0, 1, 1], [], []>} : vector<16x64xf32>, vector<64x32xf32>, vector<16x32xf32> -> vector<16x32xf32>
    %c0_219 = arith.constant 0 : index
    %c0_220 = arith.constant 0 : index
    %c0_221 = arith.constant 0 : index
    %363 = vector.load %arg18[%c0_219, %c0_220, %c0_221] : memref<2x1x32xf32, #tpu.memory_space<vmem>>, vector<1x1x32xf32>
    %364 = vector.shape_cast %363 : vector<1x1x32xf32> to vector<1x32xf32>
    %365 = vector.broadcast %364 : vector<1x32xf32> to vector<16x32xf32>
    %366 = arith.addf %362, %365 : vector<16x32xf32>
    %367 = arith.addf %366, %339 : vector<16x32xf32>
    %c0_222 = arith.constant 0 : index
    %c0_223 = arith.constant 0 : index
    %c0_224 = arith.constant 0 : index
    %368 = vector.load %arg19[%c0_222, %c0_223, %c0_224] : memref<2x1x32xf32, #tpu.memory_space<vmem>>, vector<1x1x32xf32>
    %369 = vector.shape_cast %368 : vector<1x1x32xf32> to vector<1x32xf32>
    %c0_225 = arith.constant 0 : index
    %c0_226 = arith.constant 0 : index
    %c0_227 = arith.constant 0 : index
    %370 = vector.load %arg20[%c0_225, %c0_226, %c0_227] : memref<2x1x32xf32, #tpu.memory_space<vmem>>, vector<1x1x32xf32>
    %371 = vector.shape_cast %370 : vector<1x1x32xf32> to vector<1x32xf32>
    %cst_228 = arith.constant dense<0.000000e+00> : vector<16xf32>
    %372 = vector.multi_reduction <add>, %367, %cst_228 [1] : vector<16x32xf32> to vector<16xf32>
    %373 = vector.shape_cast %372 : vector<16xf32> to vector<16x1xf32>
    %cst_229 = arith.constant 3.200000e+01 : f32
    %374 = vector.broadcast %cst_229 : f32 to vector<16x1xf32>
    %375 = arith.divf %373, %374 : vector<16x1xf32>
    %376 = vector.broadcast %375 : vector<16x1xf32> to vector<16x32xf32>
    %377 = arith.subf %367, %376 : vector<16x32xf32>
    %378 = arith.mulf %377, %377 : vector<16x32xf32>
    %cst_230 = arith.constant dense<0.000000e+00> : vector<16xf32>
    %379 = vector.multi_reduction <add>, %378, %cst_230 [1] : vector<16x32xf32> to vector<16xf32>
    %380 = vector.shape_cast %379 : vector<16xf32> to vector<16x1xf32>
    %cst_231 = arith.constant 3.200000e+01 : f32
    %381 = vector.broadcast %cst_231 : f32 to vector<16x1xf32>
    %382 = arith.divf %380, %381 : vector<16x1xf32>
    %383 = vector.broadcast %375 : vector<16x1xf32> to vector<16x32xf32>
    %384 = arith.subf %367, %383 : vector<16x32xf32>
    %cst_232 = arith.constant 9.99999996E-13 : f32
    %385 = vector.broadcast %cst_232 : f32 to vector<16x1xf32>
    %386 = arith.addf %382, %385 : vector<16x1xf32>
    %387 = math.rsqrt %386 : vector<16x1xf32>
    %388 = vector.broadcast %387 : vector<16x1xf32> to vector<16x32xf32>
    %389 = arith.mulf %384, %388 : vector<16x32xf32>
    %390 = vector.broadcast %369 : vector<1x32xf32> to vector<16x32xf32>
    %391 = arith.mulf %389, %390 : vector<16x32xf32>
    %392 = vector.broadcast %371 : vector<1x32xf32> to vector<16x32xf32>
    %393 = arith.addf %391, %392 : vector<16x32xf32>
    %cst_233 = arith.constant 0.000000e+00 : f32
    %394 = vector.broadcast %cst_233 : f32 to vector<16x32xf32>
    %c0_234 = arith.constant 0 : index
    %c0_235 = arith.constant 0 : index
    %395 = vector.load %arg27[%c0_234, %c0_235] : memref<16x32xf32, #tpu.memory_space<vmem>>, vector<16x32xf32>
    tpu.vector_store %arg27[%c0_234, %c0_235], %394 {strides = array<i32>} : memref<16x32xf32, #tpu.memory_space<vmem>>, vector<16x32xf32>,
    %c4 = arith.constant 4 : index
    %c0_236 = arith.constant 0 : index
    %c0_237 = arith.constant 0 : index
    %396 = vector.load %arg5[%c4, %c0_236, %c0_237] : memref<8x32x8xf32, #tpu.memory_space<vmem>>, vector<1x32x8xf32>
    %397 = vector.shape_cast %396 : vector<1x32x8xf32> to vector<32x8xf32>
    %cst_238 = arith.constant dense<0.000000e+00> : vector<16x8xf32>
    %398 = tpu.matmul %393, %397, %cst_238 {dimension_numbers = #tpu.dot_dimension_numbers<[1], [0], [0], [1], [0, 0, 1, 1], [], []>} : vector<16x32xf32>, vector<32x8xf32>, vector<16x8xf32> -> vector<16x8xf32>
    %c4_239 = arith.constant 4 : index
    %c0_240 = arith.constant 0 : index
    %c0_241 = arith.constant 0 : index
    %399 = vector.load %arg6[%c4_239, %c0_240, %c0_241] : memref<8x1x8xf32, #tpu.memory_space<vmem>>, vector<1x1x8xf32>
    %400 = vector.shape_cast %399 : vector<1x1x8xf32> to vector<1x8xf32>
    %401 = vector.broadcast %400 : vector<1x8xf32> to vector<16x8xf32>
    %402 = arith.addf %398, %401 : vector<16x8xf32>
    %c4_242 = arith.constant 4 : index
    %c0_243 = arith.constant 0 : index
    %c0_244 = arith.constant 0 : index
    %403 = vector.load %arg7[%c4_242, %c0_243, %c0_244] : memref<8x32x8xf32, #tpu.memory_space<vmem>>, vector<1x32x8xf32>
    %404 = vector.shape_cast %403 : vector<1x32x8xf32> to vector<32x8xf32>
    %cst_245 = arith.constant dense<0.000000e+00> : vector<16x8xf32>
    %405 = tpu.matmul %393, %404, %cst_245 {dimension_numbers = #tpu.dot_dimension_numbers<[1], [0], [0], [1], [0, 0, 1, 1], [], []>} : vector<16x32xf32>, vector<32x8xf32>, vector<16x8xf32> -> vector<16x8xf32>
    %c4_246 = arith.constant 4 : index
    %c0_247 = arith.constant 0 : index
    %c0_248 = arith.constant 0 : index
    %406 = vector.load %arg8[%c4_246, %c0_247, %c0_248] : memref<8x1x8xf32, #tpu.memory_space<vmem>>, vector<1x1x8xf32>
    %407 = vector.shape_cast %406 : vector<1x1x8xf32> to vector<1x8xf32>
    %408 = vector.broadcast %407 : vector<1x8xf32> to vector<16x8xf32>
    %409 = arith.addf %405, %408 : vector<16x8xf32>
    %c4_249 = arith.constant 4 : index
    %c0_250 = arith.constant 0 : index
    %c0_251 = arith.constant 0 : index
    %410 = vector.load %arg9[%c4_249, %c0_250, %c0_251] : memref<8x32x8xf32, #tpu.memory_space<vmem>>, vector<1x32x8xf32>
    %411 = vector.shape_cast %410 : vector<1x32x8xf32> to vector<32x8xf32>
    %cst_252 = arith.constant dense<0.000000e+00> : vector<16x8xf32>
    %412 = tpu.matmul %393, %411, %cst_252 {dimension_numbers = #tpu.dot_dimension_numbers<[1], [0], [0], [1], [0, 0, 1, 1], [], []>} : vector<16x32xf32>, vector<32x8xf32>, vector<16x8xf32> -> vector<16x8xf32>
    %c4_253 = arith.constant 4 : index
    %c0_254 = arith.constant 0 : index
    %c0_255 = arith.constant 0 : index
    %413 = vector.load %arg10[%c4_253, %c0_254, %c0_255] : memref<8x1x8xf32, #tpu.memory_space<vmem>>, vector<1x1x8xf32>
    %414 = vector.shape_cast %413 : vector<1x1x8xf32> to vector<1x8xf32>
    %415 = vector.broadcast %414 : vector<1x8xf32> to vector<16x8xf32>
    %416 = arith.addf %412, %415 : vector<16x8xf32>
    %c4_256 = arith.constant 4 : index
    %c0_257 = arith.constant 0 : index
    %c0_258 = arith.constant 0 : index
    %417 = vector.load %arg11[%c4_256, %c0_257, %c0_258] : memref<8x8x32xf32, #tpu.memory_space<vmem>>, vector<1x8x32xf32>
    %418 = vector.shape_cast %417 : vector<1x8x32xf32> to vector<8x32xf32>
    %419 = vector.extract_strided_slice %402 {offsets = [0, 0], sizes = [8, 8], strides = [1, 1]} : vector<16x8xf32> to vector<8x8xf32>
    %420 = vector.extract_strided_slice %409 {offsets = [0, 0], sizes = [8, 8], strides = [1, 1]} : vector<16x8xf32> to vector<8x8xf32>
    %421 = vector.extract_strided_slice %416 {offsets = [0, 0], sizes = [8, 8], strides = [1, 1]} : vector<16x8xf32> to vector<8x8xf32>
    %cst_259 = arith.constant dense<0.000000e+00> : vector<8x8xf32>
    %422 = tpu.matmul %419, %420, %cst_259 {dimension_numbers = #tpu.dot_dimension_numbers<[1], [1], [0], [0], [0, 0, 1, 0], [], []>} : vector<8x8xf32>, vector<8x8xf32>, vector<8x8xf32> -> vector<8x8xf32>
    %423 = vector.extract_strided_slice %29 {offsets = [0, 0], sizes = [1, 8], strides = [1, 1]} : vector<2x8xf32> to vector<1x8xf32>
    %424 = vector.broadcast %423 : vector<1x8xf32> to vector<8x8xf32>
    %425 = arith.addf %422, %424 : vector<8x8xf32>
    %cst_260 = arith.constant dense<0xFF800000> : vector<8xf32>
    %426 = vector.multi_reduction <maximumf>, %425, %cst_260 [1] : vector<8x8xf32> to vector<8xf32>
    %cst_261 = arith.constant 0xFF800000 : f32
    %427 = vector.broadcast %cst_261 : f32 to vector<8xf32>
    %428 = arith.maximumf %427, %426 : vector<8xf32>
    %429 = vector.shape_cast %428 : vector<8xf32> to vector<8x1xf32>
    %430 = vector.broadcast %429 : vector<8x1xf32> to vector<8x8xf32>
    %431 = arith.subf %425, %430 : vector<8x8xf32>
    %432 = math.exp %431 : vector<8x8xf32>
    %cst_262 = arith.constant dense<0.000000e+00> : vector<8xf32>
    %433 = vector.multi_reduction <add>, %432, %cst_262 [1] : vector<8x8xf32> to vector<8xf32>
    %434 = vector.shape_cast %433 : vector<8xf32> to vector<8x1xf32>
    %435 = vector.broadcast %434 : vector<8x1xf32> to vector<8x8xf32>
    %436 = arith.divf %432, %435 : vector<8x8xf32>
    %cst_263 = arith.constant dense<0.000000e+00> : vector<8x8xf32>
    %437 = tpu.matmul %436, %421, %cst_263 {dimension_numbers = #tpu.dot_dimension_numbers<[1], [0], [0], [1], [0, 0, 1, 1], [], []>} : vector<8x8xf32>, vector<8x8xf32>, vector<8x8xf32> -> vector<8x8xf32>
    %c0_264 = arith.constant 0 : index
    %c0_265 = arith.constant 0 : index
    %438 = vector.load %arg27[%c0_264, %c0_265] : memref<16x32xf32, #tpu.memory_space<vmem>>, vector<8x32xf32>
    %cst_266 = arith.constant dense<0.000000e+00> : vector<8x32xf32>
    %439 = tpu.matmul %437, %418, %cst_266 {dimension_numbers = #tpu.dot_dimension_numbers<[1], [0], [0], [1], [0, 0, 1, 1], [], []>} : vector<8x8xf32>, vector<8x32xf32>, vector<8x32xf32> -> vector<8x32xf32>
    %440 = arith.addf %438, %439 : vector<8x32xf32>
    %c0_267 = arith.constant 0 : index
    %c0_268 = arith.constant 0 : index
    %441 = vector.load %arg27[%c0_267, %c0_268] : memref<16x32xf32, #tpu.memory_space<vmem>>, vector<8x32xf32>
    tpu.vector_store %arg27[%c0_267, %c0_268], %440 {strides = array<i32>} : memref<16x32xf32, #tpu.memory_space<vmem>>, vector<8x32xf32>,
    %442 = vector.extract_strided_slice %402 {offsets = [8, 0], sizes = [8, 8], strides = [1, 1]} : vector<16x8xf32> to vector<8x8xf32>
    %443 = vector.extract_strided_slice %409 {offsets = [8, 0], sizes = [8, 8], strides = [1, 1]} : vector<16x8xf32> to vector<8x8xf32>
    %444 = vector.extract_strided_slice %416 {offsets = [8, 0], sizes = [8, 8], strides = [1, 1]} : vector<16x8xf32> to vector<8x8xf32>
    %cst_269 = arith.constant dense<0.000000e+00> : vector<8x8xf32>
    %445 = tpu.matmul %442, %443, %cst_269 {dimension_numbers = #tpu.dot_dimension_numbers<[1], [1], [0], [0], [0, 0, 1, 0], [], []>} : vector<8x8xf32>, vector<8x8xf32>, vector<8x8xf32> -> vector<8x8xf32>
    %446 = vector.extract_strided_slice %29 {offsets = [1, 0], sizes = [1, 8], strides = [1, 1]} : vector<2x8xf32> to vector<1x8xf32>
    %447 = vector.broadcast %446 : vector<1x8xf32> to vector<8x8xf32>
    %448 = arith.addf %445, %447 : vector<8x8xf32>
    %cst_270 = arith.constant dense<0xFF800000> : vector<8xf32>
    %449 = vector.multi_reduction <maximumf>, %448, %cst_270 [1] : vector<8x8xf32> to vector<8xf32>
    %cst_271 = arith.constant 0xFF800000 : f32
    %450 = vector.broadcast %cst_271 : f32 to vector<8xf32>
    %451 = arith.maximumf %450, %449 : vector<8xf32>
    %452 = vector.shape_cast %451 : vector<8xf32> to vector<8x1xf32>
    %453 = vector.broadcast %452 : vector<8x1xf32> to vector<8x8xf32>
    %454 = arith.subf %448, %453 : vector<8x8xf32>
    %455 = math.exp %454 : vector<8x8xf32>
    %cst_272 = arith.constant dense<0.000000e+00> : vector<8xf32>
    %456 = vector.multi_reduction <add>, %455, %cst_272 [1] : vector<8x8xf32> to vector<8xf32>
    %457 = vector.shape_cast %456 : vector<8xf32> to vector<8x1xf32>
    %458 = vector.broadcast %457 : vector<8x1xf32> to vector<8x8xf32>
    %459 = arith.divf %455, %458 : vector<8x8xf32>
    %cst_273 = arith.constant dense<0.000000e+00> : vector<8x8xf32>
    %460 = tpu.matmul %459, %444, %cst_273 {dimension_numbers = #tpu.dot_dimension_numbers<[1], [0], [0], [1], [0, 0, 1, 1], [], []>} : vector<8x8xf32>, vector<8x8xf32>, vector<8x8xf32> -> vector<8x8xf32>
    %c8_274 = arith.constant 8 : index
    %c0_275 = arith.constant 0 : index
    %461 = vector.load %arg27[%c8_274, %c0_275] : memref<16x32xf32, #tpu.memory_space<vmem>>, vector<8x32xf32>
    %cst_276 = arith.constant dense<0.000000e+00> : vector<8x32xf32>
    %462 = tpu.matmul %460, %418, %cst_276 {dimension_numbers = #tpu.dot_dimension_numbers<[1], [0], [0], [1], [0, 0, 1, 1], [], []>} : vector<8x8xf32>, vector<8x32xf32>, vector<8x32xf32> -> vector<8x32xf32>
    %463 = arith.addf %461, %462 : vector<8x32xf32>
    %c8_277 = arith.constant 8 : index
    %c0_278 = arith.constant 0 : index
    %464 = vector.load %arg27[%c8_277, %c0_278] : memref<16x32xf32, #tpu.memory_space<vmem>>, vector<8x32xf32>
    tpu.vector_store %arg27[%c8_277, %c0_278], %463 {strides = array<i32>} : memref<16x32xf32, #tpu.memory_space<vmem>>, vector<8x32xf32>,
    %c5 = arith.constant 5 : index
    %c0_279 = arith.constant 0 : index
    %c0_280 = arith.constant 0 : index
    %465 = vector.load %arg5[%c5, %c0_279, %c0_280] : memref<8x32x8xf32, #tpu.memory_space<vmem>>, vector<1x32x8xf32>
    %466 = vector.shape_cast %465 : vector<1x32x8xf32> to vector<32x8xf32>
    %cst_281 = arith.constant dense<0.000000e+00> : vector<16x8xf32>
    %467 = tpu.matmul %393, %466, %cst_281 {dimension_numbers = #tpu.dot_dimension_numbers<[1], [0], [0], [1], [0, 0, 1, 1], [], []>} : vector<16x32xf32>, vector<32x8xf32>, vector<16x8xf32> -> vector<16x8xf32>
    %c5_282 = arith.constant 5 : index
    %c0_283 = arith.constant 0 : index
    %c0_284 = arith.constant 0 : index
    %468 = vector.load %arg6[%c5_282, %c0_283, %c0_284] : memref<8x1x8xf32, #tpu.memory_space<vmem>>, vector<1x1x8xf32>
    %469 = vector.shape_cast %468 : vector<1x1x8xf32> to vector<1x8xf32>
    %470 = vector.broadcast %469 : vector<1x8xf32> to vector<16x8xf32>
    %471 = arith.addf %467, %470 : vector<16x8xf32>
    %c5_285 = arith.constant 5 : index
    %c0_286 = arith.constant 0 : index
    %c0_287 = arith.constant 0 : index
    %472 = vector.load %arg7[%c5_285, %c0_286, %c0_287] : memref<8x32x8xf32, #tpu.memory_space<vmem>>, vector<1x32x8xf32>
    %473 = vector.shape_cast %472 : vector<1x32x8xf32> to vector<32x8xf32>
    %cst_288 = arith.constant dense<0.000000e+00> : vector<16x8xf32>
    %474 = tpu.matmul %393, %473, %cst_288 {dimension_numbers = #tpu.dot_dimension_numbers<[1], [0], [0], [1], [0, 0, 1, 1], [], []>} : vector<16x32xf32>, vector<32x8xf32>, vector<16x8xf32> -> vector<16x8xf32>
    %c5_289 = arith.constant 5 : index
    %c0_290 = arith.constant 0 : index
    %c0_291 = arith.constant 0 : index
    %475 = vector.load %arg8[%c5_289, %c0_290, %c0_291] : memref<8x1x8xf32, #tpu.memory_space<vmem>>, vector<1x1x8xf32>
    %476 = vector.shape_cast %475 : vector<1x1x8xf32> to vector<1x8xf32>
    %477 = vector.broadcast %476 : vector<1x8xf32> to vector<16x8xf32>
    %478 = arith.addf %474, %477 : vector<16x8xf32>
    %c5_292 = arith.constant 5 : index
    %c0_293 = arith.constant 0 : index
    %c0_294 = arith.constant 0 : index
    %479 = vector.load %arg9[%c5_292, %c0_293, %c0_294] : memref<8x32x8xf32, #tpu.memory_space<vmem>>, vector<1x32x8xf32>
    %480 = vector.shape_cast %479 : vector<1x32x8xf32> to vector<32x8xf32>
    %cst_295 = arith.constant dense<0.000000e+00> : vector<16x8xf32>
    %481 = tpu.matmul %393, %480, %cst_295 {dimension_numbers = #tpu.dot_dimension_numbers<[1], [0], [0], [1], [0, 0, 1, 1], [], []>} : vector<16x32xf32>, vector<32x8xf32>, vector<16x8xf32> -> vector<16x8xf32>
    %c5_296 = arith.constant 5 : index
    %c0_297 = arith.constant 0 : index
    %c0_298 = arith.constant 0 : index
    %482 = vector.load %arg10[%c5_296, %c0_297, %c0_298] : memref<8x1x8xf32, #tpu.memory_space<vmem>>, vector<1x1x8xf32>
    %483 = vector.shape_cast %482 : vector<1x1x8xf32> to vector<1x8xf32>
    %484 = vector.broadcast %483 : vector<1x8xf32> to vector<16x8xf32>
    %485 = arith.addf %481, %484 : vector<16x8xf32>
    %c5_299 = arith.constant 5 : index
    %c0_300 = arith.constant 0 : index
    %c0_301 = arith.constant 0 : index
    %486 = vector.load %arg11[%c5_299, %c0_300, %c0_301] : memref<8x8x32xf32, #tpu.memory_space<vmem>>, vector<1x8x32xf32>
    %487 = vector.shape_cast %486 : vector<1x8x32xf32> to vector<8x32xf32>
    %488 = vector.extract_strided_slice %471 {offsets = [0, 0], sizes = [8, 8], strides = [1, 1]} : vector<16x8xf32> to vector<8x8xf32>
    %489 = vector.extract_strided_slice %478 {offsets = [0, 0], sizes = [8, 8], strides = [1, 1]} : vector<16x8xf32> to vector<8x8xf32>
    %490 = vector.extract_strided_slice %485 {offsets = [0, 0], sizes = [8, 8], strides = [1, 1]} : vector<16x8xf32> to vector<8x8xf32>
    %cst_302 = arith.constant dense<0.000000e+00> : vector<8x8xf32>
    %491 = tpu.matmul %488, %489, %cst_302 {dimension_numbers = #tpu.dot_dimension_numbers<[1], [1], [0], [0], [0, 0, 1, 0], [], []>} : vector<8x8xf32>, vector<8x8xf32>, vector<8x8xf32> -> vector<8x8xf32>
    %492 = vector.extract_strided_slice %29 {offsets = [0, 0], sizes = [1, 8], strides = [1, 1]} : vector<2x8xf32> to vector<1x8xf32>
    %493 = vector.broadcast %492 : vector<1x8xf32> to vector<8x8xf32>
    %494 = arith.addf %491, %493 : vector<8x8xf32>
    %cst_303 = arith.constant dense<0xFF800000> : vector<8xf32>
    %495 = vector.multi_reduction <maximumf>, %494, %cst_303 [1] : vector<8x8xf32> to vector<8xf32>
    %cst_304 = arith.constant 0xFF800000 : f32
    %496 = vector.broadcast %cst_304 : f32 to vector<8xf32>
    %497 = arith.maximumf %496, %495 : vector<8xf32>
    %498 = vector.shape_cast %497 : vector<8xf32> to vector<8x1xf32>
    %499 = vector.broadcast %498 : vector<8x1xf32> to vector<8x8xf32>
    %500 = arith.subf %494, %499 : vector<8x8xf32>
    %501 = math.exp %500 : vector<8x8xf32>
    %cst_305 = arith.constant dense<0.000000e+00> : vector<8xf32>
    %502 = vector.multi_reduction <add>, %501, %cst_305 [1] : vector<8x8xf32> to vector<8xf32>
    %503 = vector.shape_cast %502 : vector<8xf32> to vector<8x1xf32>
    %504 = vector.broadcast %503 : vector<8x1xf32> to vector<8x8xf32>
    %505 = arith.divf %501, %504 : vector<8x8xf32>
    %cst_306 = arith.constant dense<0.000000e+00> : vector<8x8xf32>
    %506 = tpu.matmul %505, %490, %cst_306 {dimension_numbers = #tpu.dot_dimension_numbers<[1], [0], [0], [1], [0, 0, 1, 1], [], []>} : vector<8x8xf32>, vector<8x8xf32>, vector<8x8xf32> -> vector<8x8xf32>
    %c0_307 = arith.constant 0 : index
    %c0_308 = arith.constant 0 : index
    %507 = vector.load %arg27[%c0_307, %c0_308] : memref<16x32xf32, #tpu.memory_space<vmem>>, vector<8x32xf32>
    %cst_309 = arith.constant dense<0.000000e+00> : vector<8x32xf32>
    %508 = tpu.matmul %506, %487, %cst_309 {dimension_numbers = #tpu.dot_dimension_numbers<[1], [0], [0], [1], [0, 0, 1, 1], [], []>} : vector<8x8xf32>, vector<8x32xf32>, vector<8x32xf32> -> vector<8x32xf32>
    %509 = arith.addf %507, %508 : vector<8x32xf32>
    %c0_310 = arith.constant 0 : index
    %c0_311 = arith.constant 0 : index
    %510 = vector.load %arg27[%c0_310, %c0_311] : memref<16x32xf32, #tpu.memory_space<vmem>>, vector<8x32xf32>
    tpu.vector_store %arg27[%c0_310, %c0_311], %509 {strides = array<i32>} : memref<16x32xf32, #tpu.memory_space<vmem>>, vector<8x32xf32>,
    %511 = vector.extract_strided_slice %471 {offsets = [8, 0], sizes = [8, 8], strides = [1, 1]} : vector<16x8xf32> to vector<8x8xf32>
    %512 = vector.extract_strided_slice %478 {offsets = [8, 0], sizes = [8, 8], strides = [1, 1]} : vector<16x8xf32> to vector<8x8xf32>
    %513 = vector.extract_strided_slice %485 {offsets = [8, 0], sizes = [8, 8], strides = [1, 1]} : vector<16x8xf32> to vector<8x8xf32>
    %cst_312 = arith.constant dense<0.000000e+00> : vector<8x8xf32>
    %514 = tpu.matmul %511, %512, %cst_312 {dimension_numbers = #tpu.dot_dimension_numbers<[1], [1], [0], [0], [0, 0, 1, 0], [], []>} : vector<8x8xf32>, vector<8x8xf32>, vector<8x8xf32> -> vector<8x8xf32>
    %515 = vector.extract_strided_slice %29 {offsets = [1, 0], sizes = [1, 8], strides = [1, 1]} : vector<2x8xf32> to vector<1x8xf32>
    %516 = vector.broadcast %515 : vector<1x8xf32> to vector<8x8xf32>
    %517 = arith.addf %514, %516 : vector<8x8xf32>
    %cst_313 = arith.constant dense<0xFF800000> : vector<8xf32>
    %518 = vector.multi_reduction <maximumf>, %517, %cst_313 [1] : vector<8x8xf32> to vector<8xf32>
    %cst_314 = arith.constant 0xFF800000 : f32
    %519 = vector.broadcast %cst_314 : f32 to vector<8xf32>
    %520 = arith.maximumf %519, %518 : vector<8xf32>
    %521 = vector.shape_cast %520 : vector<8xf32> to vector<8x1xf32>
    %522 = vector.broadcast %521 : vector<8x1xf32> to vector<8x8xf32>
    %523 = arith.subf %517, %522 : vector<8x8xf32>
    %524 = math.exp %523 : vector<8x8xf32>
    %cst_315 = arith.constant dense<0.000000e+00> : vector<8xf32>
    %525 = vector.multi_reduction <add>, %524, %cst_315 [1] : vector<8x8xf32> to vector<8xf32>
    %526 = vector.shape_cast %525 : vector<8xf32> to vector<8x1xf32>
    %527 = vector.broadcast %526 : vector<8x1xf32> to vector<8x8xf32>
    %528 = arith.divf %524, %527 : vector<8x8xf32>
    %cst_316 = arith.constant dense<0.000000e+00> : vector<8x8xf32>
    %529 = tpu.matmul %528, %513, %cst_316 {dimension_numbers = #tpu.dot_dimension_numbers<[1], [0], [0], [1], [0, 0, 1, 1], [], []>} : vector<8x8xf32>, vector<8x8xf32>, vector<8x8xf32> -> vector<8x8xf32>
    %c8_317 = arith.constant 8 : index
    %c0_318 = arith.constant 0 : index
    %530 = vector.load %arg27[%c8_317, %c0_318] : memref<16x32xf32, #tpu.memory_space<vmem>>, vector<8x32xf32>
    %cst_319 = arith.constant dense<0.000000e+00> : vector<8x32xf32>
    %531 = tpu.matmul %529, %487, %cst_319 {dimension_numbers = #tpu.dot_dimension_numbers<[1], [0], [0], [1], [0, 0, 1, 1], [], []>} : vector<8x8xf32>, vector<8x32xf32>, vector<8x32xf32> -> vector<8x32xf32>
    %532 = arith.addf %530, %531 : vector<8x32xf32>
    %c8_320 = arith.constant 8 : index
    %c0_321 = arith.constant 0 : index
    %533 = vector.load %arg27[%c8_320, %c0_321] : memref<16x32xf32, #tpu.memory_space<vmem>>, vector<8x32xf32>
    tpu.vector_store %arg27[%c8_320, %c0_321], %532 {strides = array<i32>} : memref<16x32xf32, #tpu.memory_space<vmem>>, vector<8x32xf32>,
    %c6 = arith.constant 6 : index
    %c0_322 = arith.constant 0 : index
    %c0_323 = arith.constant 0 : index
    %534 = vector.load %arg5[%c6, %c0_322, %c0_323] : memref<8x32x8xf32, #tpu.memory_space<vmem>>, vector<1x32x8xf32>
    %535 = vector.shape_cast %534 : vector<1x32x8xf32> to vector<32x8xf32>
    %cst_324 = arith.constant dense<0.000000e+00> : vector<16x8xf32>
    %536 = tpu.matmul %393, %535, %cst_324 {dimension_numbers = #tpu.dot_dimension_numbers<[1], [0], [0], [1], [0, 0, 1, 1], [], []>} : vector<16x32xf32>, vector<32x8xf32>, vector<16x8xf32> -> vector<16x8xf32>
    %c6_325 = arith.constant 6 : index
    %c0_326 = arith.constant 0 : index
    %c0_327 = arith.constant 0 : index
    %537 = vector.load %arg6[%c6_325, %c0_326, %c0_327] : memref<8x1x8xf32, #tpu.memory_space<vmem>>, vector<1x1x8xf32>
    %538 = vector.shape_cast %537 : vector<1x1x8xf32> to vector<1x8xf32>
    %539 = vector.broadcast %538 : vector<1x8xf32> to vector<16x8xf32>
    %540 = arith.addf %536, %539 : vector<16x8xf32>
    %c6_328 = arith.constant 6 : index
    %c0_329 = arith.constant 0 : index
    %c0_330 = arith.constant 0 : index
    %541 = vector.load %arg7[%c6_328, %c0_329, %c0_330] : memref<8x32x8xf32, #tpu.memory_space<vmem>>, vector<1x32x8xf32>
    %542 = vector.shape_cast %541 : vector<1x32x8xf32> to vector<32x8xf32>
    %cst_331 = arith.constant dense<0.000000e+00> : vector<16x8xf32>
    %543 = tpu.matmul %393, %542, %cst_331 {dimension_numbers = #tpu.dot_dimension_numbers<[1], [0], [0], [1], [0, 0, 1, 1], [], []>} : vector<16x32xf32>, vector<32x8xf32>, vector<16x8xf32> -> vector<16x8xf32>
    %c6_332 = arith.constant 6 : index
    %c0_333 = arith.constant 0 : index
    %c0_334 = arith.constant 0 : index
    %544 = vector.load %arg8[%c6_332, %c0_333, %c0_334] : memref<8x1x8xf32, #tpu.memory_space<vmem>>, vector<1x1x8xf32>
    %545 = vector.shape_cast %544 : vector<1x1x8xf32> to vector<1x8xf32>
    %546 = vector.broadcast %545 : vector<1x8xf32> to vector<16x8xf32>
    %547 = arith.addf %543, %546 : vector<16x8xf32>
    %c6_335 = arith.constant 6 : index
    %c0_336 = arith.constant 0 : index
    %c0_337 = arith.constant 0 : index
    %548 = vector.load %arg9[%c6_335, %c0_336, %c0_337] : memref<8x32x8xf32, #tpu.memory_space<vmem>>, vector<1x32x8xf32>
    %549 = vector.shape_cast %548 : vector<1x32x8xf32> to vector<32x8xf32>
    %cst_338 = arith.constant dense<0.000000e+00> : vector<16x8xf32>
    %550 = tpu.matmul %393, %549, %cst_338 {dimension_numbers = #tpu.dot_dimension_numbers<[1], [0], [0], [1], [0, 0, 1, 1], [], []>} : vector<16x32xf32>, vector<32x8xf32>, vector<16x8xf32> -> vector<16x8xf32>
    %c6_339 = arith.constant 6 : index
    %c0_340 = arith.constant 0 : index
    %c0_341 = arith.constant 0 : index
    %551 = vector.load %arg10[%c6_339, %c0_340, %c0_341] : memref<8x1x8xf32, #tpu.memory_space<vmem>>, vector<1x1x8xf32>
    %552 = vector.shape_cast %551 : vector<1x1x8xf32> to vector<1x8xf32>
    %553 = vector.broadcast %552 : vector<1x8xf32> to vector<16x8xf32>
    %554 = arith.addf %550, %553 : vector<16x8xf32>
    %c6_342 = arith.constant 6 : index
    %c0_343 = arith.constant 0 : index
    %c0_344 = arith.constant 0 : index
    %555 = vector.load %arg11[%c6_342, %c0_343, %c0_344] : memref<8x8x32xf32, #tpu.memory_space<vmem>>, vector<1x8x32xf32>
    %556 = vector.shape_cast %555 : vector<1x8x32xf32> to vector<8x32xf32>
    %557 = vector.extract_strided_slice %540 {offsets = [0, 0], sizes = [8, 8], strides = [1, 1]} : vector<16x8xf32> to vector<8x8xf32>
    %558 = vector.extract_strided_slice %547 {offsets = [0, 0], sizes = [8, 8], strides = [1, 1]} : vector<16x8xf32> to vector<8x8xf32>
    %559 = vector.extract_strided_slice %554 {offsets = [0, 0], sizes = [8, 8], strides = [1, 1]} : vector<16x8xf32> to vector<8x8xf32>
    %cst_345 = arith.constant dense<0.000000e+00> : vector<8x8xf32>
    %560 = tpu.matmul %557, %558, %cst_345 {dimension_numbers = #tpu.dot_dimension_numbers<[1], [1], [0], [0], [0, 0, 1, 0], [], []>} : vector<8x8xf32>, vector<8x8xf32>, vector<8x8xf32> -> vector<8x8xf32>
    %561 = vector.extract_strided_slice %29 {offsets = [0, 0], sizes = [1, 8], strides = [1, 1]} : vector<2x8xf32> to vector<1x8xf32>
    %562 = vector.broadcast %561 : vector<1x8xf32> to vector<8x8xf32>
    %563 = arith.addf %560, %562 : vector<8x8xf32>
    %cst_346 = arith.constant dense<0xFF800000> : vector<8xf32>
    %564 = vector.multi_reduction <maximumf>, %563, %cst_346 [1] : vector<8x8xf32> to vector<8xf32>
    %cst_347 = arith.constant 0xFF800000 : f32
    %565 = vector.broadcast %cst_347 : f32 to vector<8xf32>
    %566 = arith.maximumf %565, %564 : vector<8xf32>
    %567 = vector.shape_cast %566 : vector<8xf32> to vector<8x1xf32>
    %568 = vector.broadcast %567 : vector<8x1xf32> to vector<8x8xf32>
    %569 = arith.subf %563, %568 : vector<8x8xf32>
    %570 = math.exp %569 : vector<8x8xf32>
    %cst_348 = arith.constant dense<0.000000e+00> : vector<8xf32>
    %571 = vector.multi_reduction <add>, %570, %cst_348 [1] : vector<8x8xf32> to vector<8xf32>
    %572 = vector.shape_cast %571 : vector<8xf32> to vector<8x1xf32>
    %573 = vector.broadcast %572 : vector<8x1xf32> to vector<8x8xf32>
    %574 = arith.divf %570, %573 : vector<8x8xf32>
    %cst_349 = arith.constant dense<0.000000e+00> : vector<8x8xf32>
    %575 = tpu.matmul %574, %559, %cst_349 {dimension_numbers = #tpu.dot_dimension_numbers<[1], [0], [0], [1], [0, 0, 1, 1], [], []>} : vector<8x8xf32>, vector<8x8xf32>, vector<8x8xf32> -> vector<8x8xf32>
    %c0_350 = arith.constant 0 : index
    %c0_351 = arith.constant 0 : index
    %576 = vector.load %arg27[%c0_350, %c0_351] : memref<16x32xf32, #tpu.memory_space<vmem>>, vector<8x32xf32>
    %cst_352 = arith.constant dense<0.000000e+00> : vector<8x32xf32>
    %577 = tpu.matmul %575, %556, %cst_352 {dimension_numbers = #tpu.dot_dimension_numbers<[1], [0], [0], [1], [0, 0, 1, 1], [], []>} : vector<8x8xf32>, vector<8x32xf32>, vector<8x32xf32> -> vector<8x32xf32>
    %578 = arith.addf %576, %577 : vector<8x32xf32>
    %c0_353 = arith.constant 0 : index
    %c0_354 = arith.constant 0 : index
    %579 = vector.load %arg27[%c0_353, %c0_354] : memref<16x32xf32, #tpu.memory_space<vmem>>, vector<8x32xf32>
    tpu.vector_store %arg27[%c0_353, %c0_354], %578 {strides = array<i32>} : memref<16x32xf32, #tpu.memory_space<vmem>>, vector<8x32xf32>,
    %580 = vector.extract_strided_slice %540 {offsets = [8, 0], sizes = [8, 8], strides = [1, 1]} : vector<16x8xf32> to vector<8x8xf32>
    %581 = vector.extract_strided_slice %547 {offsets = [8, 0], sizes = [8, 8], strides = [1, 1]} : vector<16x8xf32> to vector<8x8xf32>
    %582 = vector.extract_strided_slice %554 {offsets = [8, 0], sizes = [8, 8], strides = [1, 1]} : vector<16x8xf32> to vector<8x8xf32>
    %cst_355 = arith.constant dense<0.000000e+00> : vector<8x8xf32>
    %583 = tpu.matmul %580, %581, %cst_355 {dimension_numbers = #tpu.dot_dimension_numbers<[1], [1], [0], [0], [0, 0, 1, 0], [], []>} : vector<8x8xf32>, vector<8x8xf32>, vector<8x8xf32> -> vector<8x8xf32>
    %584 = vector.extract_strided_slice %29 {offsets = [1, 0], sizes = [1, 8], strides = [1, 1]} : vector<2x8xf32> to vector<1x8xf32>
    %585 = vector.broadcast %584 : vector<1x8xf32> to vector<8x8xf32>
    %586 = arith.addf %583, %585 : vector<8x8xf32>
    %cst_356 = arith.constant dense<0xFF800000> : vector<8xf32>
    %587 = vector.multi_reduction <maximumf>, %586, %cst_356 [1] : vector<8x8xf32> to vector<8xf32>
    %cst_357 = arith.constant 0xFF800000 : f32
    %588 = vector.broadcast %cst_357 : f32 to vector<8xf32>
    %589 = arith.maximumf %588, %587 : vector<8xf32>
    %590 = vector.shape_cast %589 : vector<8xf32> to vector<8x1xf32>
    %591 = vector.broadcast %590 : vector<8x1xf32> to vector<8x8xf32>
    %592 = arith.subf %586, %591 : vector<8x8xf32>
    %593 = math.exp %592 : vector<8x8xf32>
    %cst_358 = arith.constant dense<0.000000e+00> : vector<8xf32>
    %594 = vector.multi_reduction <add>, %593, %cst_358 [1] : vector<8x8xf32> to vector<8xf32>
    %595 = vector.shape_cast %594 : vector<8xf32> to vector<8x1xf32>
    %596 = vector.broadcast %595 : vector<8x1xf32> to vector<8x8xf32>
    %597 = arith.divf %593, %596 : vector<8x8xf32>
    %cst_359 = arith.constant dense<0.000000e+00> : vector<8x8xf32>
    %598 = tpu.matmul %597, %582, %cst_359 {dimension_numbers = #tpu.dot_dimension_numbers<[1], [0], [0], [1], [0, 0, 1, 1], [], []>} : vector<8x8xf32>, vector<8x8xf32>, vector<8x8xf32> -> vector<8x8xf32>
    %c8_360 = arith.constant 8 : index
    %c0_361 = arith.constant 0 : index
    %599 = vector.load %arg27[%c8_360, %c0_361] : memref<16x32xf32, #tpu.memory_space<vmem>>, vector<8x32xf32>
    %cst_362 = arith.constant dense<0.000000e+00> : vector<8x32xf32>
    %600 = tpu.matmul %598, %556, %cst_362 {dimension_numbers = #tpu.dot_dimension_numbers<[1], [0], [0], [1], [0, 0, 1, 1], [], []>} : vector<8x8xf32>, vector<8x32xf32>, vector<8x32xf32> -> vector<8x32xf32>
    %601 = arith.addf %599, %600 : vector<8x32xf32>
    %c8_363 = arith.constant 8 : index
    %c0_364 = arith.constant 0 : index
    %602 = vector.load %arg27[%c8_363, %c0_364] : memref<16x32xf32, #tpu.memory_space<vmem>>, vector<8x32xf32>
    tpu.vector_store %arg27[%c8_363, %c0_364], %601 {strides = array<i32>} : memref<16x32xf32, #tpu.memory_space<vmem>>, vector<8x32xf32>,
    %c7 = arith.constant 7 : index
    %c0_365 = arith.constant 0 : index
    %c0_366 = arith.constant 0 : index
    %603 = vector.load %arg5[%c7, %c0_365, %c0_366] : memref<8x32x8xf32, #tpu.memory_space<vmem>>, vector<1x32x8xf32>
    %604 = vector.shape_cast %603 : vector<1x32x8xf32> to vector<32x8xf32>
    %cst_367 = arith.constant dense<0.000000e+00> : vector<16x8xf32>
    %605 = tpu.matmul %393, %604, %cst_367 {dimension_numbers = #tpu.dot_dimension_numbers<[1], [0], [0], [1], [0, 0, 1, 1], [], []>} : vector<16x32xf32>, vector<32x8xf32>, vector<16x8xf32> -> vector<16x8xf32>
    %c7_368 = arith.constant 7 : index
    %c0_369 = arith.constant 0 : index
    %c0_370 = arith.constant 0 : index
    %606 = vector.load %arg6[%c7_368, %c0_369, %c0_370] : memref<8x1x8xf32, #tpu.memory_space<vmem>>, vector<1x1x8xf32>
    %607 = vector.shape_cast %606 : vector<1x1x8xf32> to vector<1x8xf32>
    %608 = vector.broadcast %607 : vector<1x8xf32> to vector<16x8xf32>
    %609 = arith.addf %605, %608 : vector<16x8xf32>
    %c7_371 = arith.constant 7 : index
    %c0_372 = arith.constant 0 : index
    %c0_373 = arith.constant 0 : index
    %610 = vector.load %arg7[%c7_371, %c0_372, %c0_373] : memref<8x32x8xf32, #tpu.memory_space<vmem>>, vector<1x32x8xf32>
    %611 = vector.shape_cast %610 : vector<1x32x8xf32> to vector<32x8xf32>
    %cst_374 = arith.constant dense<0.000000e+00> : vector<16x8xf32>
    %612 = tpu.matmul %393, %611, %cst_374 {dimension_numbers = #tpu.dot_dimension_numbers<[1], [0], [0], [1], [0, 0, 1, 1], [], []>} : vector<16x32xf32>, vector<32x8xf32>, vector<16x8xf32> -> vector<16x8xf32>
    %c7_375 = arith.constant 7 : index
    %c0_376 = arith.constant 0 : index
    %c0_377 = arith.constant 0 : index
    %613 = vector.load %arg8[%c7_375, %c0_376, %c0_377] : memref<8x1x8xf32, #tpu.memory_space<vmem>>, vector<1x1x8xf32>
    %614 = vector.shape_cast %613 : vector<1x1x8xf32> to vector<1x8xf32>
    %615 = vector.broadcast %614 : vector<1x8xf32> to vector<16x8xf32>
    %616 = arith.addf %612, %615 : vector<16x8xf32>
    %c7_378 = arith.constant 7 : index
    %c0_379 = arith.constant 0 : index
    %c0_380 = arith.constant 0 : index
    %617 = vector.load %arg9[%c7_378, %c0_379, %c0_380] : memref<8x32x8xf32, #tpu.memory_space<vmem>>, vector<1x32x8xf32>
    %618 = vector.shape_cast %617 : vector<1x32x8xf32> to vector<32x8xf32>
    %cst_381 = arith.constant dense<0.000000e+00> : vector<16x8xf32>
    %619 = tpu.matmul %393, %618, %cst_381 {dimension_numbers = #tpu.dot_dimension_numbers<[1], [0], [0], [1], [0, 0, 1, 1], [], []>} : vector<16x32xf32>, vector<32x8xf32>, vector<16x8xf32> -> vector<16x8xf32>
    %c7_382 = arith.constant 7 : index
    %c0_383 = arith.constant 0 : index
    %c0_384 = arith.constant 0 : index
    %620 = vector.load %arg10[%c7_382, %c0_383, %c0_384] : memref<8x1x8xf32, #tpu.memory_space<vmem>>, vector<1x1x8xf32>
    %621 = vector.shape_cast %620 : vector<1x1x8xf32> to vector<1x8xf32>
    %622 = vector.broadcast %621 : vector<1x8xf32> to vector<16x8xf32>
    %623 = arith.addf %619, %622 : vector<16x8xf32>
    %c7_385 = arith.constant 7 : index
    %c0_386 = arith.constant 0 : index
    %c0_387 = arith.constant 0 : index
    %624 = vector.load %arg11[%c7_385, %c0_386, %c0_387] : memref<8x8x32xf32, #tpu.memory_space<vmem>>, vector<1x8x32xf32>
    %625 = vector.shape_cast %624 : vector<1x8x32xf32> to vector<8x32xf32>
    %626 = vector.extract_strided_slice %609 {offsets = [0, 0], sizes = [8, 8], strides = [1, 1]} : vector<16x8xf32> to vector<8x8xf32>
    %627 = vector.extract_strided_slice %616 {offsets = [0, 0], sizes = [8, 8], strides = [1, 1]} : vector<16x8xf32> to vector<8x8xf32>
    %628 = vector.extract_strided_slice %623 {offsets = [0, 0], sizes = [8, 8], strides = [1, 1]} : vector<16x8xf32> to vector<8x8xf32>
    %cst_388 = arith.constant dense<0.000000e+00> : vector<8x8xf32>
    %629 = tpu.matmul %626, %627, %cst_388 {dimension_numbers = #tpu.dot_dimension_numbers<[1], [1], [0], [0], [0, 0, 1, 0], [], []>} : vector<8x8xf32>, vector<8x8xf32>, vector<8x8xf32> -> vector<8x8xf32>
    %630 = vector.extract_strided_slice %29 {offsets = [0, 0], sizes = [1, 8], strides = [1, 1]} : vector<2x8xf32> to vector<1x8xf32>
    %631 = vector.broadcast %630 : vector<1x8xf32> to vector<8x8xf32>
    %632 = arith.addf %629, %631 : vector<8x8xf32>
    %cst_389 = arith.constant dense<0xFF800000> : vector<8xf32>
    %633 = vector.multi_reduction <maximumf>, %632, %cst_389 [1] : vector<8x8xf32> to vector<8xf32>
    %cst_390 = arith.constant 0xFF800000 : f32
    %634 = vector.broadcast %cst_390 : f32 to vector<8xf32>
    %635 = arith.maximumf %634, %633 : vector<8xf32>
    %636 = vector.shape_cast %635 : vector<8xf32> to vector<8x1xf32>
    %637 = vector.broadcast %636 : vector<8x1xf32> to vector<8x8xf32>
    %638 = arith.subf %632, %637 : vector<8x8xf32>
    %639 = math.exp %638 : vector<8x8xf32>
    %cst_391 = arith.constant dense<0.000000e+00> : vector<8xf32>
    %640 = vector.multi_reduction <add>, %639, %cst_391 [1] : vector<8x8xf32> to vector<8xf32>
    %641 = vector.shape_cast %640 : vector<8xf32> to vector<8x1xf32>
    %642 = vector.broadcast %641 : vector<8x1xf32> to vector<8x8xf32>
    %643 = arith.divf %639, %642 : vector<8x8xf32>
    %cst_392 = arith.constant dense<0.000000e+00> : vector<8x8xf32>
    %644 = tpu.matmul %643, %628, %cst_392 {dimension_numbers = #tpu.dot_dimension_numbers<[1], [0], [0], [1], [0, 0, 1, 1], [], []>} : vector<8x8xf32>, vector<8x8xf32>, vector<8x8xf32> -> vector<8x8xf32>
    %c0_393 = arith.constant 0 : index
    %c0_394 = arith.constant 0 : index
    %645 = vector.load %arg27[%c0_393, %c0_394] : memref<16x32xf32, #tpu.memory_space<vmem>>, vector<8x32xf32>
    %cst_395 = arith.constant dense<0.000000e+00> : vector<8x32xf32>
    %646 = tpu.matmul %644, %625, %cst_395 {dimension_numbers = #tpu.dot_dimension_numbers<[1], [0], [0], [1], [0, 0, 1, 1], [], []>} : vector<8x8xf32>, vector<8x32xf32>, vector<8x32xf32> -> vector<8x32xf32>
    %647 = arith.addf %645, %646 : vector<8x32xf32>
    %c0_396 = arith.constant 0 : index
    %c0_397 = arith.constant 0 : index
    %648 = vector.load %arg27[%c0_396, %c0_397] : memref<16x32xf32, #tpu.memory_space<vmem>>, vector<8x32xf32>
    tpu.vector_store %arg27[%c0_396, %c0_397], %647 {strides = array<i32>} : memref<16x32xf32, #tpu.memory_space<vmem>>, vector<8x32xf32>,
    %649 = vector.extract_strided_slice %609 {offsets = [8, 0], sizes = [8, 8], strides = [1, 1]} : vector<16x8xf32> to vector<8x8xf32>
    %650 = vector.extract_strided_slice %616 {offsets = [8, 0], sizes = [8, 8], strides = [1, 1]} : vector<16x8xf32> to vector<8x8xf32>
    %651 = vector.extract_strided_slice %623 {offsets = [8, 0], sizes = [8, 8], strides = [1, 1]} : vector<16x8xf32> to vector<8x8xf32>
    %cst_398 = arith.constant dense<0.000000e+00> : vector<8x8xf32>
    %652 = tpu.matmul %649, %650, %cst_398 {dimension_numbers = #tpu.dot_dimension_numbers<[1], [1], [0], [0], [0, 0, 1, 0], [], []>} : vector<8x8xf32>, vector<8x8xf32>, vector<8x8xf32> -> vector<8x8xf32>
    %653 = vector.extract_strided_slice %29 {offsets = [1, 0], sizes = [1, 8], strides = [1, 1]} : vector<2x8xf32> to vector<1x8xf32>
    %654 = vector.broadcast %653 : vector<1x8xf32> to vector<8x8xf32>
    %655 = arith.addf %652, %654 : vector<8x8xf32>
    %cst_399 = arith.constant dense<0xFF800000> : vector<8xf32>
    %656 = vector.multi_reduction <maximumf>, %655, %cst_399 [1] : vector<8x8xf32> to vector<8xf32>
    %cst_400 = arith.constant 0xFF800000 : f32
    %657 = vector.broadcast %cst_400 : f32 to vector<8xf32>
    %658 = arith.maximumf %657, %656 : vector<8xf32>
    %659 = vector.shape_cast %658 : vector<8xf32> to vector<8x1xf32>
    %660 = vector.broadcast %659 : vector<8x1xf32> to vector<8x8xf32>
    %661 = arith.subf %655, %660 : vector<8x8xf32>
    %662 = math.exp %661 : vector<8x8xf32>
    %cst_401 = arith.constant dense<0.000000e+00> : vector<8xf32>
    %663 = vector.multi_reduction <add>, %662, %cst_401 [1] : vector<8x8xf32> to vector<8xf32>
    %664 = vector.shape_cast %663 : vector<8xf32> to vector<8x1xf32>
    %665 = vector.broadcast %664 : vector<8x1xf32> to vector<8x8xf32>
    %666 = arith.divf %662, %665 : vector<8x8xf32>
    %cst_402 = arith.constant dense<0.000000e+00> : vector<8x8xf32>
    %667 = tpu.matmul %666, %651, %cst_402 {dimension_numbers = #tpu.dot_dimension_numbers<[1], [0], [0], [1], [0, 0, 1, 1], [], []>} : vector<8x8xf32>, vector<8x8xf32>, vector<8x8xf32> -> vector<8x8xf32>
    %c8_403 = arith.constant 8 : index
    %c0_404 = arith.constant 0 : index
    %668 = vector.load %arg27[%c8_403, %c0_404] : memref<16x32xf32, #tpu.memory_space<vmem>>, vector<8x32xf32>
    %cst_405 = arith.constant dense<0.000000e+00> : vector<8x32xf32>
    %669 = tpu.matmul %667, %625, %cst_405 {dimension_numbers = #tpu.dot_dimension_numbers<[1], [0], [0], [1], [0, 0, 1, 1], [], []>} : vector<8x8xf32>, vector<8x32xf32>, vector<8x32xf32> -> vector<8x32xf32>
    %670 = arith.addf %668, %669 : vector<8x32xf32>
    %c8_406 = arith.constant 8 : index
    %c0_407 = arith.constant 0 : index
    %671 = vector.load %arg27[%c8_406, %c0_407] : memref<16x32xf32, #tpu.memory_space<vmem>>, vector<8x32xf32>
    tpu.vector_store %arg27[%c8_406, %c0_407], %670 {strides = array<i32>} : memref<16x32xf32, #tpu.memory_space<vmem>>, vector<8x32xf32>,
    %c0_408 = arith.constant 0 : index
    %c0_409 = arith.constant 0 : index
    %672 = vector.load %arg27[%c0_408, %c0_409] : memref<16x32xf32, #tpu.memory_space<vmem>>, vector<16x32xf32>
    %c1_410 = arith.constant 1 : index
    %c0_411 = arith.constant 0 : index
    %c0_412 = arith.constant 0 : index
    %673 = vector.load %arg12[%c1_410, %c0_411, %c0_412] : memref<2x1x32xf32, #tpu.memory_space<vmem>>, vector<1x1x32xf32>
    %674 = vector.shape_cast %673 : vector<1x1x32xf32> to vector<1x32xf32>
    %675 = vector.broadcast %674 : vector<1x32xf32> to vector<16x32xf32>
    %676 = arith.addf %672, %675 : vector<16x32xf32>
    %677 = arith.addf %676, %393 : vector<16x32xf32>
    %c1_413 = arith.constant 1 : index
    %c0_414 = arith.constant 0 : index
    %c0_415 = arith.constant 0 : index
    %678 = vector.load %arg13[%c1_413, %c0_414, %c0_415] : memref<2x1x32xf32, #tpu.memory_space<vmem>>, vector<1x1x32xf32>
    %679 = vector.shape_cast %678 : vector<1x1x32xf32> to vector<1x32xf32>
    %c1_416 = arith.constant 1 : index
    %c0_417 = arith.constant 0 : index
    %c0_418 = arith.constant 0 : index
    %680 = vector.load %arg14[%c1_416, %c0_417, %c0_418] : memref<2x1x32xf32, #tpu.memory_space<vmem>>, vector<1x1x32xf32>
    %681 = vector.shape_cast %680 : vector<1x1x32xf32> to vector<1x32xf32>
    %cst_419 = arith.constant dense<0.000000e+00> : vector<16xf32>
    %682 = vector.multi_reduction <add>, %677, %cst_419 [1] : vector<16x32xf32> to vector<16xf32>
    %683 = vector.shape_cast %682 : vector<16xf32> to vector<16x1xf32>
    %cst_420 = arith.constant 3.200000e+01 : f32
    %684 = vector.broadcast %cst_420 : f32 to vector<16x1xf32>
    %685 = arith.divf %683, %684 : vector<16x1xf32>
    %686 = vector.broadcast %685 : vector<16x1xf32> to vector<16x32xf32>
    %687 = arith.subf %677, %686 : vector<16x32xf32>
    %688 = arith.mulf %687, %687 : vector<16x32xf32>
    %cst_421 = arith.constant dense<0.000000e+00> : vector<16xf32>
    %689 = vector.multi_reduction <add>, %688, %cst_421 [1] : vector<16x32xf32> to vector<16xf32>
    %690 = vector.shape_cast %689 : vector<16xf32> to vector<16x1xf32>
    %cst_422 = arith.constant 3.200000e+01 : f32
    %691 = vector.broadcast %cst_422 : f32 to vector<16x1xf32>
    %692 = arith.divf %690, %691 : vector<16x1xf32>
    %693 = vector.broadcast %685 : vector<16x1xf32> to vector<16x32xf32>
    %694 = arith.subf %677, %693 : vector<16x32xf32>
    %cst_423 = arith.constant 9.99999996E-13 : f32
    %695 = vector.broadcast %cst_423 : f32 to vector<16x1xf32>
    %696 = arith.addf %692, %695 : vector<16x1xf32>
    %697 = math.rsqrt %696 : vector<16x1xf32>
    %698 = vector.broadcast %697 : vector<16x1xf32> to vector<16x32xf32>
    %699 = arith.mulf %694, %698 : vector<16x32xf32>
    %700 = vector.broadcast %679 : vector<1x32xf32> to vector<16x32xf32>
    %701 = arith.mulf %699, %700 : vector<16x32xf32>
    %702 = vector.broadcast %681 : vector<1x32xf32> to vector<16x32xf32>
    %703 = arith.addf %701, %702 : vector<16x32xf32>
    %c1_424 = arith.constant 1 : index
    %c0_425 = arith.constant 0 : index
    %c0_426 = arith.constant 0 : index
    %704 = vector.load %arg15[%c1_424, %c0_425, %c0_426] : memref<2x32x64xf32, #tpu.memory_space<vmem>>, vector<1x32x64xf32>
    %705 = vector.shape_cast %704 : vector<1x32x64xf32> to vector<32x64xf32>
    %cst_427 = arith.constant dense<0.000000e+00> : vector<16x64xf32>
    %706 = tpu.matmul %703, %705, %cst_427 {dimension_numbers = #tpu.dot_dimension_numbers<[1], [0], [0], [1], [0, 0, 1, 1], [], []>} : vector<16x32xf32>, vector<32x64xf32>, vector<16x64xf32> -> vector<16x64xf32>
    %c1_428 = arith.constant 1 : index
    %c0_429 = arith.constant 0 : index
    %c0_430 = arith.constant 0 : index
    %707 = vector.load %arg16[%c1_428, %c0_429, %c0_430] : memref<2x1x64xf32, #tpu.memory_space<vmem>>, vector<1x1x64xf32>
    %708 = vector.shape_cast %707 : vector<1x1x64xf32> to vector<1x64xf32>
    %709 = vector.broadcast %708 : vector<1x64xf32> to vector<16x64xf32>
    %710 = arith.addf %706, %709 : vector<16x64xf32>
    %711 = arith.mulf %710, %710 : vector<16x64xf32>
    %712 = arith.mulf %710, %711 : vector<16x64xf32>
    %cst_431 = arith.constant 4.471500e-02 : f32
    %713 = vector.broadcast %cst_431 : f32 to vector<16x64xf32>
    %714 = arith.mulf %713, %712 : vector<16x64xf32>
    %715 = arith.addf %710, %714 : vector<16x64xf32>
    %cst_432 = arith.constant 0.797884583 : f32
    %716 = vector.broadcast %cst_432 : f32 to vector<16x64xf32>
    %717 = arith.mulf %716, %715 : vector<16x64xf32>
    %718 = math.tanh %717 : vector<16x64xf32>
    %cst_433 = arith.constant 1.000000e+00 : f32
    %719 = vector.broadcast %cst_433 : f32 to vector<16x64xf32>
    %720 = arith.addf %719, %718 : vector<16x64xf32>
    %cst_434 = arith.constant 5.000000e-01 : f32
    %721 = vector.broadcast %cst_434 : f32 to vector<16x64xf32>
    %722 = arith.mulf %721, %720 : vector<16x64xf32>
    %723 = arith.mulf %710, %722 : vector<16x64xf32>
    %c1_435 = arith.constant 1 : index
    %c0_436 = arith.constant 0 : index
    %c0_437 = arith.constant 0 : index
    %724 = vector.load %arg17[%c1_435, %c0_436, %c0_437] : memref<2x64x32xf32, #tpu.memory_space<vmem>>, vector<1x64x32xf32>
    %725 = vector.shape_cast %724 : vector<1x64x32xf32> to vector<64x32xf32>
    %cst_438 = arith.constant dense<0.000000e+00> : vector<16x32xf32>
    %726 = tpu.matmul %723, %725, %cst_438 {dimension_numbers = #tpu.dot_dimension_numbers<[1], [0], [0], [1], [0, 0, 1, 1], [], []>} : vector<16x64xf32>, vector<64x32xf32>, vector<16x32xf32> -> vector<16x32xf32>
    %c1_439 = arith.constant 1 : index
    %c0_440 = arith.constant 0 : index
    %c0_441 = arith.constant 0 : index
    %727 = vector.load %arg18[%c1_439, %c0_440, %c0_441] : memref<2x1x32xf32, #tpu.memory_space<vmem>>, vector<1x1x32xf32>
    %728 = vector.shape_cast %727 : vector<1x1x32xf32> to vector<1x32xf32>
    %729 = vector.broadcast %728 : vector<1x32xf32> to vector<16x32xf32>
    %730 = arith.addf %726, %729 : vector<16x32xf32>
    %731 = arith.addf %730, %703 : vector<16x32xf32>
    %c1_442 = arith.constant 1 : index
    %c0_443 = arith.constant 0 : index
    %c0_444 = arith.constant 0 : index
    %732 = vector.load %arg19[%c1_442, %c0_443, %c0_444] : memref<2x1x32xf32, #tpu.memory_space<vmem>>, vector<1x1x32xf32>
    %733 = vector.shape_cast %732 : vector<1x1x32xf32> to vector<1x32xf32>
    %c1_445 = arith.constant 1 : index
    %c0_446 = arith.constant 0 : index
    %c0_447 = arith.constant 0 : index
    %734 = vector.load %arg20[%c1_445, %c0_446, %c0_447] : memref<2x1x32xf32, #tpu.memory_space<vmem>>, vector<1x1x32xf32>
    %735 = vector.shape_cast %734 : vector<1x1x32xf32> to vector<1x32xf32>
    %cst_448 = arith.constant dense<0.000000e+00> : vector<16xf32>
    %736 = vector.multi_reduction <add>, %731, %cst_448 [1] : vector<16x32xf32> to vector<16xf32>
    %737 = vector.shape_cast %736 : vector<16xf32> to vector<16x1xf32>
    %cst_449 = arith.constant 3.200000e+01 : f32
    %738 = vector.broadcast %cst_449 : f32 to vector<16x1xf32>
    %739 = arith.divf %737, %738 : vector<16x1xf32>
    %740 = vector.broadcast %739 : vector<16x1xf32> to vector<16x32xf32>
    %741 = arith.subf %731, %740 : vector<16x32xf32>
    %742 = arith.mulf %741, %741 : vector<16x32xf32>
    %cst_450 = arith.constant dense<0.000000e+00> : vector<16xf32>
    %743 = vector.multi_reduction <add>, %742, %cst_450 [1] : vector<16x32xf32> to vector<16xf32>
    %744 = vector.shape_cast %743 : vector<16xf32> to vector<16x1xf32>
    %cst_451 = arith.constant 3.200000e+01 : f32
    %745 = vector.broadcast %cst_451 : f32 to vector<16x1xf32>
    %746 = arith.divf %744, %745 : vector<16x1xf32>
    %747 = vector.broadcast %739 : vector<16x1xf32> to vector<16x32xf32>
    %748 = arith.subf %731, %747 : vector<16x32xf32>
    %cst_452 = arith.constant 9.99999996E-13 : f32
    %749 = vector.broadcast %cst_452 : f32 to vector<16x1xf32>
    %750 = arith.addf %746, %749 : vector<16x1xf32>
    %751 = math.rsqrt %750 : vector<16x1xf32>
    %752 = vector.broadcast %751 : vector<16x1xf32> to vector<16x32xf32>
    %753 = arith.mulf %748, %752 : vector<16x32xf32>
    %754 = vector.broadcast %733 : vector<1x32xf32> to vector<16x32xf32>
    %755 = arith.mulf %753, %754 : vector<16x32xf32>
    %756 = vector.broadcast %735 : vector<1x32xf32> to vector<16x32xf32>
    %757 = arith.addf %755, %756 : vector<16x32xf32>
    %758 = vector.extract_strided_slice %757 {offsets = [0, 0], sizes = [1, 32], strides = [1, 1]} : vector<16x32xf32> to vector<1x32xf32>
    %c0_453 = arith.constant 0 : index
    %c0_454 = arith.constant 0 : index
    %759 = vector.load %arg21[%c0_453, %c0_454] : memref<32x32xf32, #tpu.memory_space<vmem>>, vector<32x32xf32>
    %cst_455 = arith.constant dense<0.000000e+00> : vector<1x32xf32>
    %760 = tpu.matmul %758, %759, %cst_455 {dimension_numbers = #tpu.dot_dimension_numbers<[1], [0], [0], [1], [0, 0, 1, 1], [], []>} : vector<1x32xf32>, vector<32x32xf32>, vector<1x32xf32> -> vector<1x32xf32>
    %c0_456 = arith.constant 0 : index
    %c0_457 = arith.constant 0 : index
    %761 = vector.load %arg22[%c0_456, %c0_457] : memref<1x32xf32, #tpu.memory_space<vmem>>, vector<1x32xf32>
    %762 = arith.addf %760, %761 : vector<1x32xf32>
    %763 = math.tanh %762 : vector<1x32xf32>
    %c0_458 = arith.constant 0 : index
    %c0_459 = arith.constant 0 : index
    %764 = vector.load %arg2[%c0_458, %c0_459] : memref<2x1xf32, #tpu.memory_space<vmem>>, vector<1x1xf32>
    %c0_460 = arith.constant 0 : index
    %c0_461 = arith.constant 0 : index
    %765 = vector.load %arg23[%c0_460, %c0_461] : memref<32x128xf32, #tpu.memory_space<vmem>>, vector<32x128xf32>
    %cst_462 = arith.constant dense<0.000000e+00> : vector<1x128xf32>
    %766 = tpu.matmul %763, %765, %cst_462 {dimension_numbers = #tpu.dot_dimension_numbers<[1], [0], [0], [1], [0, 0, 1, 1], [], []>} : vector<1x32xf32>, vector<32x128xf32>, vector<1x128xf32> -> vector<1x128xf32>
    %c0_463 = arith.constant 0 : index
    %c0_464 = arith.constant 0 : index
    %767 = vector.load %arg24[%c0_463, %c0_464] : memref<1x128xf32, #tpu.memory_space<vmem>>, vector<1x128xf32>
    %768 = vector.broadcast %764 : vector<1x1xf32> to vector<1x128xf32>
    %769 = arith.mulf %768, %767 : vector<1x128xf32>
    %770 = arith.addf %766, %769 : vector<1x128xf32>
    %c0_465 = arith.constant 0 : index
    %c0_466 = arith.constant 0 : index
    %771 = vector.load %arg25[%c0_465, %c0_466] : memref<1x128xf32, #tpu.memory_space<vmem>>, vector<1x128xf32>
    %772 = arith.addf %770, %771 : vector<1x128xf32>
    %c0_467 = arith.constant 0 : index
    %c0_468 = arith.constant 0 : index
    %773 = vector.load %arg26[%c0_467, %c0_468] : memref<2x128xf32, #tpu.memory_space<vmem>>, vector<1x128xf32>
    tpu.vector_store %arg26[%c0_467, %c0_468], %772 {strides = array<i32>} : memref<2x128xf32, #tpu.memory_space<vmem>>, vector<1x128xf32>,
    %774 = vector.extract_strided_slice %757 {offsets = [8, 0], sizes = [1, 32], strides = [1, 1]} : vector<16x32xf32> to vector<1x32xf32>
    %c0_469 = arith.constant 0 : index
    %c0_470 = arith.constant 0 : index
    %775 = vector.load %arg21[%c0_469, %c0_470] : memref<32x32xf32, #tpu.memory_space<vmem>>, vector<32x32xf32>
    %cst_471 = arith.constant dense<0.000000e+00> : vector<1x32xf32>
    %776 = tpu.matmul %774, %775, %cst_471 {dimension_numbers = #tpu.dot_dimension_numbers<[1], [0], [0], [1], [0, 0, 1, 1], [], []>} : vector<1x32xf32>, vector<32x32xf32>, vector<1x32xf32> -> vector<1x32xf32>
    %c0_472 = arith.constant 0 : index
    %c0_473 = arith.constant 0 : index
    %777 = vector.load %arg22[%c0_472, %c0_473] : memref<1x32xf32, #tpu.memory_space<vmem>>, vector<1x32xf32>
    %778 = arith.addf %776, %777 : vector<1x32xf32>
    %779 = math.tanh %778 : vector<1x32xf32>
    %c1_474 = arith.constant 1 : index
    %c0_475 = arith.constant 0 : index
    %780 = vector.load %arg2[%c1_474, %c0_475] : memref<2x1xf32, #tpu.memory_space<vmem>>, vector<1x1xf32>
    %c0_476 = arith.constant 0 : index
    %c0_477 = arith.constant 0 : index
    %781 = vector.load %arg23[%c0_476, %c0_477] : memref<32x128xf32, #tpu.memory_space<vmem>>, vector<32x128xf32>
    %cst_478 = arith.constant dense<0.000000e+00> : vector<1x128xf32>
    %782 = tpu.matmul %779, %781, %cst_478 {dimension_numbers = #tpu.dot_dimension_numbers<[1], [0], [0], [1], [0, 0, 1, 1], [], []>} : vector<1x32xf32>, vector<32x128xf32>, vector<1x128xf32> -> vector<1x128xf32>
    %c0_479 = arith.constant 0 : index
    %c0_480 = arith.constant 0 : index
    %783 = vector.load %arg24[%c0_479, %c0_480] : memref<1x128xf32, #tpu.memory_space<vmem>>, vector<1x128xf32>
    %784 = vector.broadcast %780 : vector<1x1xf32> to vector<1x128xf32>
    %785 = arith.mulf %784, %783 : vector<1x128xf32>
    %786 = arith.addf %782, %785 : vector<1x128xf32>
    %c0_481 = arith.constant 0 : index
    %c0_482 = arith.constant 0 : index
    %787 = vector.load %arg25[%c0_481, %c0_482] : memref<1x128xf32, #tpu.memory_space<vmem>>, vector<1x128xf32>
    %788 = arith.addf %786, %787 : vector<1x128xf32>
    %c1_483 = arith.constant 1 : index
    %c0_484 = arith.constant 0 : index
    %789 = vector.load %arg26[%c1_483, %c0_484] : memref<2x128xf32, #tpu.memory_space<vmem>>, vector<1x128xf32>
    tpu.vector_store %arg26[%c1_483, %c0_484], %788 {strides = array<i32>} : memref<2x128xf32, #tpu.memory_space<vmem>>, vector<1x128xf32>,
    return
  }
}

</mosaic_0001>

<bundles_post_ra>
// kernel: multitask_forward.1
= control target key start
LH: loop header
LB: loop body
LE: loop exit
PB: predicated region body
PF: predicated region fallthrough
CT: control target
= control target key end

     0   :  { %vm87_vm0 = vcmask 261120   ;;  %v3543_v4 = vmov 32.0   ;;  %vm255_vm8 = vcmask 64512   ;;  %s4577_s0 = inlined_call_operand.vmem [shape: f32[16,32], index: 0, kind: input, shape index: {}]   ;;  %s4578_s3 = inlined_call_operand.vmem [shape: f32[1,32], index: 3, kind: input, shape index: {}]   ;;  %s4579_s4 = inlined_call_operand.vmem [shape: f32[1,32], index: 4, kind: input, shape index: {}]   ;;  %s4580_s6 = inlined_call_operand.vmem [shape: f32[8,1,8], index: 6, kind: input, shape index: {}]   ;;  %s4581_s5 = inlined_call_operand.vmem [shape: f32[8,32,8], index: 5, kind: input, shape index: {}]   ;;  %s4582_s7 = inlined_call_operand.vmem [shape: f32[8,32,8], index: 7, kind: input, shape index: {}]   ;;  %s4583_s9 = inlined_call_operand.vmem [shape: f32[8,32,8], index: 9, kind: input, shape index: {}]   ;;  %s4584_s8 = inlined_call_operand.vmem [shape: f32[8,1,8], index: 8, kind: input, shape index: {}]   ;;  %s4585_s10 = inlined_call_operand.vmem [shape: f32[8,1,8], index: 10, kind: input, shape index: {}]   ;;  %s4586_s11 = inlined_call_operand.vmem [shape: f32[8,8,32], index: 11, kind: input, shape index: {}]   ;;  %s4587_s1 = inlined_call_operand.vmem [shape: f32[2,8], index: 1, kind: input, shape index: {}]   ;;  %s4588_s12 = inlined_call_operand.vmem [shape: f32[2,1,32], index: 12, kind: input, shape index: {}]   ;;  %s4589_s13 = inlined_call_operand.vmem [shape: f32[2,1,32], index: 13, kind: input, shape index: {}]   ;;  %s4590_s14 = inlined_call_operand.vmem [shape: f32[2,1,32], index: 14, kind: input, shape index: {}]   ;;  %s4591_s16 = inlined_call_operand.vmem [shape: f32[2,1,64], index: 16, kind: input, shape index: {}]   ;;  %s4592_s15 = inlined_call_operand.vmem [shape: f32[2,32,64], index: 15, kind: input, shape index: {}]   ;;  %s4593_s18 = inlined_call_operand.vmem [shape: f32[2,1,32], index: 18, kind: input, shape index: {}]   ;;  %s4594_s17 = inlined_call_operand.vmem [shape: f32[2,64,32], index: 17, kind: input, shape index: {}]   ;;  %s4595_s19 = inlined_call_operand.vmem [shape: f32[2,1,32], index: 19, kind: input, shape index: {}]   ;;  %s4596_s20 = inlined_call_operand.vmem [shape: f32[2,1,32], index: 20, kind: input, shape index: {}]   ;;  %s4597_s21 = inlined_call_operand.vmem [shape: f32[32,32], index: 21, kind: input, shape index: {}]   ;;  %s4598_s23 = inlined_call_operand.vmem [shape: f32[32,128], index: 23, kind: input, shape index: {}]   ;;  %s4599_s2 = inlined_call_operand.vmem [shape: f32[2,1], index: 2, kind: input, shape index: {}]   ;;  %s4600_s22 = inlined_call_operand.vmem [shape: f32[1,32], index: 22, kind: input, shape index: {}]   ;;  %s4601_s24 = inlined_call_operand.vmem [shape: f32[1,128], index: 24, kind: input, shape index: {}]   ;;  %s4602_s25 = inlined_call_operand.vmem [shape: f32[1,128], index: 25, kind: input, shape index: {}]   ;;  %s4603_s26 = inlined_call_operand.vmem [shape: f32[2,128], index: 26, kind: output, shape index: {}]  }
   0x1   :  { %4614 = sst [smem:[#allocation3_spill]] %s4577_s0  ;;  %3445 = vrcp.f32 %v3543_v4 }
   0x2   :  { %4615 = sst [smem:[#allocation4_spill]] %s4578_s3 }
   0x3   :  { %4616 = sst [smem:[#allocation5_spill]] %s4579_s4 }
   0x4   :  { %4617 = sst [smem:[#allocation6_spill]] %s4580_s6 }
   0x5   :  { %4618 = sst [smem:[#allocation7_spill]] %s4581_s5 }
   0x6   :  { %4619 = sst [smem:[#allocation8_spill]] %s4582_s7 }
   0x7   :  { %4620 = sst [smem:[#allocation9_spill]] %s4583_s9  ;;  %v3446_v5 = vpop.eup %3445 }
   0x8   :  { %4621 = sst [smem:[#allocation10_spill]] %s4584_s8  ;;  %v95_v6 = vmul.f32 32.0, %v3446_v5  ;;  %vm99_vm1 = vweird.f32 %v3446_v5 }
   0x9   :  { %4622 = sst [smem:[#allocation11_spill]] %s4585_s10 }
   0xa   :  { %4623 = sst [smem:[#allocation12_spill]] %s4586_s11  ;;  %v96_v7 = vsub.f32 1.0, %v95_v6 }
   0xb   :  { %4624 = sst [smem:[#allocation13_spill]] %s4587_s1 }
   0xc   :  { %4625 = sst [smem:[#allocation14_spill]] %s4602_s25  ;;  %v97_v8 = vmul.f32 %v3446_v5, %v96_v7 }
   0xd   :  { %4626 = sst [smem:[#allocation15_spill]] %s4603_s26 }
   0xe   :  { %s4627_s8 = sld [smem:[#allocation3_spill]]  ;;  %v98_v9 = vadd.f32 %v3446_v5, %v97_v8 }
   0xf   :  { %s4628_s0 = sld [smem:[#allocation7_spill]] }
  0x10   :  { %v3689_v10 = vsel %vm99_vm1, %v3446_v5, %v98_v9  ;;  %s4629_s1 = sld [smem:[#allocation8_spill]] }
  0x11   :  { %s4630_s9 = sld [smem:[#allocation9_spill]] }
  0x12   :  { %s4631_s11 = sld [smem:[#allocation4_spill]] }
  0x13   :  { %s4632_s4 = sld [smem:[#allocation5_spill]] }
  0x14   :  { %v83_v0 = vld [vmem:[%s4627_s8] sm:$0xff]  ;;  %v84_v1 = vld [vmem:[%s4627_s8 + $0x8] sm:$0xff]  ;;  %s4633_s6 = sld [smem:[#allocation10_spill]] }
  0x15   :  { %v88_v2 = vsel %vm87_vm0, %v83_v0, 0.0  ;;  %v91_v3 = vsel %vm87_vm0, %v84_v1, 0.0  ;;  %v157_v21 = vld [vmem:[%s4628_s0 + $0x18] sm:$0xff]  ;;  %v156_v24 = vld [vmem:[%s4628_s0 + $0x10] sm:$0xff]  ;;  %v155_v27 = vld [vmem:[%s4628_s0 + $0x8] sm:$0xff]  ;;  %s4634_s10 = sld [smem:[#allocation6_spill]] }
  0x16   :  { %89 = vadd.xlane.f32.xlu0 %v88_v2  ;;  %92 = vadd.xlane.f32.xlu1 %v91_v3  ;;  %v194_v22 = vld [vmem:[%s4629_s1 + $0x18] sm:$0xff]  ;;  %v193_v25 = vld [vmem:[%s4629_s1 + $0x10] sm:$0xff]  ;;  %v192_v28 = vld [vmem:[%s4629_s1 + $0x8] sm:$0xff]  ;;  %s4636_s7 = sld [smem:[#allocation12_spill]] }
  0x17   :  { %v225_v23 = vld [vmem:[%s4630_s9 + $0x18] sm:$0xff]  ;;  %180 = vmatpush.msra.mxu0 %v157_v21  ;;  %211 = vmatpush.msra.mxu1 %v194_v22  ;;  %v224_v26 = vld [vmem:[%s4630_s9 + $0x10] sm:$0xff]  ;;  %v223_v29 = vld [vmem:[%s4630_s9 + $0x8] sm:$0xff]  ;;  %s4637_s27 = sld [smem:[#allocation13_spill]] }
  0x18   :  { %242 = vmatpush.msra.mxu2 %v225_v23  ;;  %v154_v30 = vld [vmem:[%s4628_s0] sm:$0xff]  ;;  %v3168_v9 = vld [vmem:[%s4629_s1 + $0x38] sm:$0xff]  ;;  %s4638_s26 = sld [smem:[#allocation14_spill]] }
  0x19   :  { %181 = vmatpush.msra.mxu0 %v156_v24  ;;  %212 = vmatpush.msra.mxu1 %v193_v25  ;;  %v191_v31 = vld [vmem:[%s4629_s1] sm:$0xff] }
  0x1a   :  { %243 = vmatpush.msra.mxu2 %v224_v26  ;;  %v222_v32 = vld [vmem:[%s4630_s9] sm:$0xff] }
  0x1b   :  { %182 = vmatpush.msra.mxu0 %v155_v27  ;;  %213 = vmatpush.msra.mxu1 %v192_v28  ;;  %v3405_v50 = vld [vmem:[%s4631_s11] ss:$0 sm:$0xff]  ;;  %s4635_s11 = sld [smem:[#allocation11_spill]] }
  0x1c   :  { %244 = vmatpush.msra.mxu2 %v223_v29  ;;  %v3406_v53 = vld [vmem:[%s4632_s4] ss:$0 sm:$0xff]  ;;  %v3410_v29 = vld [vmem:[%s4633_s6 + $0x1] ss:$0 sm:$0xff] }
  0x1d   :  { %183 = vmatpush.msra.mxu0 %v154_v30  ;;  %214 = vmatpush.msra.mxu1 %v191_v31  ;;  %v3408_v61 = vld [vmem:[%s4633_s6] ss:$0 sm:$0xff] }
  0x1e   :  { %245 = vmatpush.msra.mxu2 %v222_v32  ;;  %v3407_v62 = vld [vmem:[%s4634_s10] ss:$0 sm:$0xff] }
  0x21   :  { %v3409_v3 = vld [vmem:[%s4635_s11] ss:$0 sm:$0xff] }
  0x89   :  { %v90_v11 = vpop.xlane.xlu0 %89  ;;  %v93_v12 = vpop.xlane.xlu1 %92 }
  0x8a   :  { %v101_v13 = vmul.f32 %v3689_v10, %v90_v11  ;;  %v102_v14 = vmul.f32 %v3689_v10, %v93_v12  ;;  %v3167_v12 = vld [vmem:[%s4629_s1 + $0x30] sm:$0xff] }
  0x8c   :  { %v3693_v15 = vsub.f32 %v83_v0, %v101_v13  ;;  %v3695_v16 = vsub.f32 %v84_v1, %v102_v14  ;;  %v3166_v13 = vld [vmem:[%s4629_s1 + $0x28] sm:$0xff] }
  0x8e   :  { %v105_v17 = vmul.f32 %v3693_v15, %v3693_v15  ;;  %v106_v18 = vmul.f32 %v3695_v16, %v3695_v16 }
  0x90   :  { %v107_v19 = vsel %vm87_vm0, %v105_v17, 0.0  ;;  %v110_v20 = vsel %vm87_vm0, %v106_v18, 0.0  ;;  %v253_v17 = vld [vmem:[%s4636_s7] sm:$0xff] }
  0x91   :  { %108 = vadd.xlane.f32.xlu0 %v107_v19  ;;  %111 = vadd.xlane.f32.xlu1 %v110_v20  ;;  %v149_v18 = vld [vmem:[%s4637_s27] sm:$0x3] }
  0x92   :  { %448 = vmatpush.msrb.mxu2 %v253_v17  ;;  %v150_v19 = vsub.f32 1.0, %v149_v18  ;;  %v3411_v18 = vld [vmem:[%s4635_s11 + $0x1] ss:$0 sm:$0xff] }
  0x94   :  { %v151_v20 = vmul.f32 -1e+09, %v150_v19 }
  0x96   :  { %v3800_v21 = vperm.slane %v151_v20, 0  ;;  %v3802_v22 = vperm.slane %v151_v20, 1 }
 0x104   :  { %v109_v33 = vpop.xlane.xlu0 %108  ;;  %v112_v34 = vpop.xlane.xlu1 %111 }
 0x105   :  { %v113_v35 = vmul.f32 %v109_v33, %v3689_v10  ;;  %v114_v36 = vmul.f32 %v112_v34, %v3689_v10 }
 0x107   :  { %v115_v37 = vadd.f32 1e-12, %v113_v35  ;;  %v116_v38 = vadd.f32 1e-12, %v114_v36 }
 0x109   :  { %3447 = vrsqrt.f32 %v115_v37  ;;  %vm133_vm3 = vweird.f32 %v116_v38  ;;  %vm123_vm5 = vweird.f32 %v115_v37 }
 0x10a   :  { %3449 = vrsqrt.f32 %v116_v38 }
 0x10f   :  { %v3448_v39 = vpop.eup %3447 }
 0x110   :  { %v3450_v40 = vpop.eup %3449  ;;  %v118_v41 = vmul.f32 %v3448_v39, %v115_v37  ;;  %vm124_vm2 = vweird.f32 %v3448_v39 }
 0x111   :  { %v128_v42 = vmul.f32 %v3450_v40, %v116_v38  ;;  %vm134_vm4 = vweird.f32 %v3450_v40  ;;  %vm125_vm6 = vmor %vm123_vm5, %vm124_vm2 }
 0x112   :  { %v119_v43 = vmul.f32 %v3448_v39, %v118_v41  ;;  %vm135_vm7 = vmor %vm133_vm3, %vm134_vm4 }
 0x113   :  { %v129_v44 = vmul.f32 %v3450_v40, %v128_v42 }
 0x114   :  { %v120_v45 = vmul.f32 0.5, %v119_v43 }
 0x115   :  { %v130_v46 = vmul.f32 0.5, %v129_v44  ;;  %v3175_v44 = vld [vmem:[%s4630_s9 + $0x38] sm:$0xff] }
 0x116   :  { %v121_v47 = vsub.f32 1.5, %v120_v45  ;;  %v3174_v45 = vld [vmem:[%s4630_s9 + $0x30] sm:$0xff] }
 0x117   :  { %v131_v48 = vsub.f32 1.5, %v130_v46  ;;  %v3173_v46 = vld [vmem:[%s4630_s9 + $0x28] sm:$0xff] }
 0x118   :  { %v122_v49 = vmul.f32 %v3448_v39, %v121_v47  ;;  %v3172_v47 = vld [vmem:[%s4630_s9 + $0x20] sm:$0xff] }
 0x119   :  { %v132_v51 = vmul.f32 %v3450_v40, %v131_v48 }
 0x11a   :  { %v126_v52 = vsel %vm125_vm6, %v3448_v39, %v122_v49 }
 0x11b   :  { %v137_v54 = vmul.f32 %v126_v52, %v3693_v15  ;;  %v136_v55 = vsel %vm135_vm7, %v3450_v40, %v132_v51 }
 0x11c   :  { %v138_v58 = vmul.f32 %v136_v55, %v3695_v16  ;;  %v3165_v16 = vld [vmem:[%s4629_s1 + $0x20] sm:$0xff] }
 0x11d   :  { %v142_v56 = vmul.f32 %v3405_v50, %v137_v54 }
 0x11e   :  { %v143_v59 = vmul.f32 %v3405_v50, %v138_v58 }
 0x11f   :  { %v3748_v57 = vadd.f32 %v3406_v53, %v142_v56 }
 0x120   :  { %v3757_v60 = vadd.f32 %v3406_v53, %v143_v59 }
 0x121   :  { %3144 = vmatmul.msk.f32.vlgmr.msra.gmra.mxu0 %vm87_vm0, %v3748_v57  ;;  %3146 = vmatmul.msk.f32.vlgmr.msra.gmra.mxu1 %vm87_vm0, %v3748_v57 }
 0x122   :  { %3148 = vmatmul.msk.f32.vlgmr.msra.gmra.mxu2 %vm87_vm0, %v3748_v57 }
 0x129   :  { %3145 = vmatmul.msk.f32.gmra.mxu0 %vm87_vm0, %v3757_v60  ;;  %3147 = vmatmul.msk.f32.gmra.mxu1 %vm87_vm0, %v3757_v60 }
 0x12a   :  { %3149 = vmatmul.msk.f32.gmra.mxu2 %vm87_vm0, %v3757_v60 }
 0x19e   :  { %v185_v63 = vpop.f32.mrf.mxu0  ;;  %v216_v0 = vpop.f32.mrf.mxu1 }
 0x19f   :  { %v217_v1 = vadd.f32 %v3408_v61, %v216_v0  ;;  %v186_v2 = vadd.f32 %v3407_v62, %v185_v63 }
 0x1a1   :  { %3150 = vmatpush.xpose.msk.msra.mxu3 %vm255_vm8, %v217_v1 }
 0x1a4   :  { %3151 = vmatmul.msk.f32.vlgmr.msra.gmra.mxu3 %vm255_vm8, %v186_v2 }
 0x1a5   :  { %v247_v4 = vpop.f32.mrf.mxu2 }
 0x1a6   :  { %v219_v5 = vpop.f32.mrf.mxu1  ;;  %v248_v6 = vadd.f32 %v3409_v3, %v247_v4  ;;  %v188_v7 = vpop.f32.mrf.mxu0 }
 0x1a7   :  { %v220_v8 = vadd.f32 %v3408_v61, %v219_v5  ;;  %v189_v11 = vadd.f32 %v3407_v62, %v188_v7 }
 0x1a8   :  { %324 = vmatpush.msrb.mxu3 %v248_v6 }
 0x1a9   :  { %3154 = vmatpush.xpose.msk.msrb.mxu0 %vm255_vm8, %v220_v8 }
 0x1aa   :  { %348 = vmatpush.msra.mxu3 %v253_v17 }
 0x1ac   :  { %3155 = vmatmul.msk.f32.vlgmr.msrb.gmra.mxu0 %vm255_vm8, %v189_v11  ;;  %v3161_v11 = vld [vmem:[%s4628_s0 + $0x38] sm:$0xff] }
 0x1ad   :  { %510 = vmatpush.msra.mxu0 %v3168_v9  ;;  %v250_v14 = vpop.f32.mrf.mxu2 }
 0x1ae   :  { %v251_v15 = vadd.f32 %v3409_v3, %v250_v14  ;;  %v3158_v14 = vld [vmem:[%s4628_s0 + $0x20] sm:$0xff] }
 0x1af   :  { %511 = vmatpush.msra.mxu0 %v3167_v12  ;;  %v3160_v12 = vld [vmem:[%s4628_s0 + $0x30] sm:$0xff] }
 0x1b0   :  { %424 = vmatpush.msrb.mxu1 %v251_v15  ;;  %v3544_v15 = vmov 0.0  }
 0x1b1   :  { %512 = vmatpush.msra.mxu0 %v3166_v13  ;;  %v3159_v13 = vld [vmem:[%s4628_s0 + $0x28] sm:$0xff]  ;;  %153 = vst.msk [vmem:[#allocation2 + $0x8] sm:$0xff] %vm87_vm0, %v3544_v15 }
 0x1b2   :  { %543 = vmatpush.msra.mxu1 %v3175_v44  ;;  %152 = vst.msk [vmem:[#allocation2] sm:$0xff] %vm87_vm0, %v3544_v15 }
 0x1b3   :  { %513 = vmatpush.msra.mxu0 %v3165_v16 }
 0x1b4   :  { %3170 = vmatmul.msk.f32.vlgmr.msra.gmra.mxu0 %vm87_vm0, %v3748_v57  ;;  %544 = vmatpush.msra.mxu1 %v3174_v45 }
 0x1b6   :  { %545 = vmatpush.msra.mxu1 %v3173_v46  ;;  %v3413_v46 = vld [vmem:[%s4633_s6 + $0x2] ss:$0 sm:$0xff] }
 0x1b8   :  { %546 = vmatpush.msra.mxu1 %v3172_v47 }
 0x1bc   :  { %3171 = vmatmul.msk.f32.gmra.mxu0 %vm87_vm0, %v3757_v60 }
 0x227   :  { %v279_v23 = vpop.f32.mrf.mxu3 }
 0x228   :  { %v280_v24 = vadd.f32 %v279_v23, %v3800_v21 }
 0x229   :  { %v379_v25 = vpop.f32.mrf.mxu0 }
 0x22a   :  { %v380_v26 = vadd.f32 %v379_v25, %v3802_v22  ;;  %v282_v27 = vsel %vm255_vm8, %v280_v24, -inf  ;;  %v3198_v25 = vld [vmem:[%s4629_s1 + $0x58] sm:$0xff] }
 0x22b   :  { %283 = vmax.xlane.f32.xlu2 %v282_v27  ;;  %v3196_v27 = vld [vmem:[%s4629_s1 + $0x48] sm:$0xff] }
 0x22c   :  { %v382_v28 = vsel %vm255_vm8, %v380_v26, -inf }
 0x22d   :  { %383 = vmax.xlane.f32.xlu0 %v382_v28  ;;  %v3195_v28 = vld [vmem:[%s4629_s1 + $0x40] sm:$0xff] }
 0x231   :  { %v515_v30 = vpop.f32.mrf.mxu0 }
 0x232   :  { %v516_v31 = vadd.f32 %v3410_v29, %v515_v30 }
 0x234   :  { %3180 = vmatpush.xpose.msk.msra.mxu2 %vm255_vm8, %v516_v31 }
 0x239   :  { %v518_v32 = vpop.f32.mrf.mxu0 }
 0x23a   :  { %v519_v33 = vadd.f32 %v3410_v29, %v518_v32  ;;  %v429_v29 = vld [vmem:[#allocation2 + $0x8] sm:$0xff]  ;;  %v329_v32 = vld [vmem:[#allocation2] sm:$0xff] }
 0x23c   :  { %3184 = vmatpush.xpose.msk.msrb.mxu0 %vm255_vm8, %v519_v33 }
 0x240   :  { %809 = vmatpush.msra.mxu0 %v3198_v25 }
 0x29e   :  { %v284_v34 = vpop.xlane.xlu2 %283 }
 0x29f   :  { %v285_v35 = vsub.f32 %v280_v24, %v284_v34 }
 0x2a0   :  { %v384_v36 = vpop.xlane.xlu0 %383 }
 0x2a1   :  { %v286_v37 = vmul.f32 1.442695, %v285_v35  ;;  %v385_v38 = vsub.f32 %v380_v26, %v384_v36  ;;  %v3197_v26 = vld [vmem:[%s4629_s1 + $0x50] sm:$0xff]  ;;  %v3412_v35 = vld [vmem:[%s4634_s10 + $0x1] ss:$0 sm:$0xff] }
 0x2a2   :  { %810 = vmatpush.msra.mxu0 %v3197_v26 }
 0x2a3   :  { %3451 = vpow2.f32 %v286_v37  ;;  %v386_v39 = vmul.f32 1.442695, %v385_v38 }
 0x2a4   :  { %811 = vmatpush.msra.mxu0 %v3196_v27 }
 0x2a5   :  { %3453 = vpow2.f32 %v386_v39 }
 0x2a6   :  { %812 = vmatpush.msra.mxu0 %v3195_v28 }
 0x2a9   :  { %v3452_v40 = vpop.eup %3451 }
 0x2aa   :  { %v288_v41 = vsel %vm255_vm8, %v3452_v40, 0.0 }
 0x2ab   :  { %v3454_v42 = vpop.eup %3453  ;;  %289 = vadd.xlane.f32.xlu2 %v288_v41 }
 0x2ac   :  { %v388_v43 = vsel %vm255_vm8, %v3454_v42, 0.0 }
 0x2ad   :  { %389 = vadd.xlane.f32.xlu1 %v388_v43 }
 0x31e   :  { %v290_v48 = vpop.xlane.xlu2 %289 }
 0x31f   :  { %3455 = vrcp.f32 %v290_v48  ;;  %v302_v55 = vand.u32 2147483648, %v290_v48  ;;  %v300_v58 = vand.u32 2147483647, %v290_v48  ;;  %vm296_vm10 = vweird.f32 %v290_v48 }
 0x320   :  { %v390_v49 = vpop.xlane.xlu1 %389 }
 0x321   :  { %3457 = vrcp.f32 %v390_v49  ;;  %v402_v61 = vand.u32 2147483648, %v390_v49  ;;  %v400_v0 = vand.u32 2147483647, %v390_v49  ;;  %v303_v1 = vor.u32 1.1754944e-38, %v302_v55 }
 0x322   :  { %vm301_vm13 = vcmp.eq.f32.partialorder %v300_v58, 8.507059e+37  ;;  %vm396_vm14 = vweird.f32 %v390_v49 }
 0x323   :  { %v403_v4 = vor.u32 1.1754944e-38, %v402_v61  ;;  %vm401_vm1 = vcmp.eq.f32.partialorder %v400_v0, 8.507059e+37  ;;  %v3205_v0 = vld [vmem:[%s4630_s9 + $0x58] sm:$0xff] }
 0x325   :  { %v3456_v50 = vpop.eup %3455 }
 0x326   :  { %v292_v51 = vmul.f32 %v3456_v50, %v290_v48  ;;  %vm297_vm9 = vweird.f32 %v3456_v50 }
 0x327   :  { %v3458_v52 = vpop.eup %3457  ;;  %vm298_vm12 = vmor %vm296_vm10, %vm297_vm9 }
 0x328   :  { %v293_v53 = vsub.f32 1.0, %v292_v51  ;;  %v392_v54 = vmul.f32 %v3458_v52, %v390_v49  ;;  %vm397_vm11 = vweird.f32 %v3458_v52 }
 0x329   :  { %vm398_vm15 = vmor %vm396_vm14, %vm397_vm11 }
 0x32a   :  { %v294_v56 = vmul.f32 %v3456_v50, %v293_v53  ;;  %v393_v59 = vsub.f32 1.0, %v392_v54 }
 0x32c   :  { %v295_v62 = vadd.f32 %v3456_v50, %v294_v56  ;;  %v394_v63 = vmul.f32 %v3458_v52, %v393_v59 }
 0x32e   :  { %v395_v2 = vadd.f32 %v3458_v52, %v394_v63  ;;  %v299_v3 = vsel %vm298_vm12, %v3456_v50, %v295_v62  ;;  %v3179_v63 = vld [vmem:[%s4636_s7 + $0x8] sm:$0xff] }
 0x32f   :  { %v304_v5 = vsel %vm301_vm13, %v303_v1, %v299_v3  ;;  %v3204_v1 = vld [vmem:[%s4630_s9 + $0x50] sm:$0xff]  ;;  %v3202_v3 = vld [vmem:[%s4630_s9 + $0x40] sm:$0xff] }
 0x330   :  { %v305_v6 = vmul.f32 %v3452_v40, %v304_v5  ;;  %v399_v7 = vsel %vm398_vm15, %v3458_v52, %v395_v2  ;;  %v3203_v2 = vld [vmem:[%s4630_s9 + $0x48] sm:$0xff] }
 0x331   :  { %v404_v8 = vsel %vm401_vm1, %v403_v4, %v399_v7 }
 0x332   :  { %3152 = vmatmul.msk.f32.vlgmr.msrb.gmra.mxu3 %vm255_vm8, %v305_v6  ;;  %v405_v9 = vmul.f32 %v3454_v42, %v404_v8 }
 0x333   :  { %477 = vmatpush.msrb.mxu3 %v3161_v11 }
 0x334   :  { %3156 = vmatmul.msk.f32.vlgmr.msrb.gmra.mxu1 %vm255_vm8, %v405_v9 }
 0x335   :  { %478 = vmatpush.msrb.mxu3 %v3160_v12 }
 0x337   :  { %479 = vmatpush.msrb.mxu3 %v3159_v13 }
 0x339   :  { %480 = vmatpush.msrb.mxu3 %v3158_v14 }
 0x33c   :  { %3177 = vmatmul.msk.f32.vlgmr.msra.gmra.mxu1 %vm87_vm0, %v3748_v57 }
 0x344   :  { %3178 = vmatmul.msk.f32.gmra.mxu1 %vm87_vm0, %v3757_v60 }
 0x3b1   :  { %v426_v16 = vpop.f32.mrf.mxu1 }
 0x3b2   :  { %3157 = vmatmul.msk.f32.vlgmr.msrb.gmra.mxu2 %vm255_vm8, %v426_v16 }
 0x3b5   :  { %v326_v17 = vpop.f32.mrf.mxu3 }
 0x3b6   :  { %3153 = vmatmul.msk.f32.vlgmr.msra.gmra.mxu3 %vm255_vm8, %v326_v17 }
 0x3b7   :  { %648 = vmatpush.msra.mxu3 %v3179_v63 }
 0x3b9   :  { %v548_v19 = vpop.f32.mrf.mxu1 }
 0x3ba   :  { %v549_v20 = vadd.f32 %v3411_v18, %v548_v19 }
 0x3bc   :  { %624 = vmatpush.msrb.mxu2 %v549_v20 }
 0x3be   :  { %3163 = vmatmul.msk.f32.vlgmr.msrb.gmra.mxu3 %vm87_vm0, %v3748_v57 }
 0x3c1   :  { %v551_v23 = vpop.f32.mrf.mxu1 }
 0x3c2   :  { %v552_v24 = vadd.f32 %v3411_v18, %v551_v23 }
 0x3c4   :  { %723 = vmatpush.msrb.mxu1 %v552_v24 }
 0x3c6   :  { %3164 = vmatmul.msk.f32.gmra.mxu3 %vm87_vm0, %v3757_v60  ;;  %842 = vmatpush.msra.mxu1 %v3205_v0 }
 0x3c8   :  { %843 = vmatpush.msra.mxu1 %v3204_v1 }
 0x3ca   :  { %844 = vmatpush.msra.mxu1 %v3203_v2  ;;  %v3416_v2 = vld [vmem:[%s4633_s6 + $0x3] ss:$0 sm:$0xff] }
 0x3cc   :  { %845 = vmatpush.msra.mxu1 %v3202_v3 }
 0x435   :  { %v450_v30 = vpop.f32.mrf.mxu2 }
 0x436   :  { %v453_v31 = vadd.f32 %v450_v30, %v429_v29 }
 0x438   :  { %454 = vst.msk [vmem:[#allocation2 + $0x8] sm:$0xff] %vm87_vm0, %v453_v31 }
 0x439   :  { %v350_v33 = vpop.f32.mrf.mxu3 }
 0x43a   :  { %v353_v34 = vadd.f32 %v350_v33, %v329_v32  ;;  %v3191_v32 = vld [vmem:[%s4628_s0 + $0x58] sm:$0xff]  ;;  %v3190_v33 = vld [vmem:[%s4628_s0 + $0x50] sm:$0xff] }
 0x43b   :  { %776 = vmatpush.msrb.mxu3 %v3191_v32 }
 0x43c   :  { %354 = vst.msk [vmem:[#allocation2] sm:$0xff] %vm87_vm0, %v353_v34  ;;  %v3189_v34 = vld [vmem:[%s4628_s0 + $0x48] sm:$0xff] }
 0x43d   :  { %777 = vmatpush.msrb.mxu3 %v3190_v33 }
 0x43f   :  { %778 = vmatpush.msrb.mxu3 %v3189_v34 }
 0x441   :  { %v482_v36 = vpop.f32.mrf.mxu3 }
 0x442   :  { %v483_v37 = vadd.f32 %v3412_v35, %v482_v36 }
 0x444   :  { %3181 = vmatmul.msk.f32.vlgmr.msra.gmra.mxu2 %vm255_vm8, %v483_v37 }
 0x445   :  { %747 = vmatpush.msra.mxu2 %v3179_v63 }
 0x449   :  { %v485_v38 = vpop.f32.mrf.mxu3 }
 0x44a   :  { %v486_v39 = vadd.f32 %v3412_v35, %v485_v38  ;;  %v3188_v35 = vld [vmem:[%s4628_s0 + $0x40] sm:$0xff] }
 0x44b   :  { %779 = vmatpush.msrb.mxu3 %v3188_v35  ;;  %v3414_v38 = vld [vmem:[%s4635_s11 + $0x2] ss:$0 sm:$0xff] }
 0x44c   :  { %3185 = vmatmul.msk.f32.vlgmr.msrb.gmra.mxu0 %vm255_vm8, %v486_v39 }
 0x454   :  { %3200 = vmatmul.msk.f32.vlgmr.msra.gmra.mxu0 %vm87_vm0, %v3748_v57 }
 0x45c   :  { %3201 = vmatmul.msk.f32.gmra.mxu0 %vm87_vm0, %v3757_v60 }
 0x4c7   :  { %v579_v40 = vpop.f32.mrf.mxu2 }
 0x4c8   :  { %v580_v41 = vadd.f32 %v579_v40, %v3800_v21 }
 0x4c9   :  { %v678_v42 = vpop.f32.mrf.mxu0 }
 0x4ca   :  { %v679_v43 = vadd.f32 %v678_v42, %v3802_v22  ;;  %v582_v44 = vsel %vm255_vm8, %v580_v41, -inf }
 0x4cb   :  { %583 = vmax.xlane.f32.xlu2 %v582_v44  ;;  %v3227_v44 = vld [vmem:[%s4629_s1 + $0x70] sm:$0xff] }
 0x4cc   :  { %v681_v45 = vsel %vm255_vm8, %v679_v43, -inf }
 0x4cd   :  { %682 = vmax.xlane.f32.xlu1 %v681_v45  ;;  %v3226_v45 = vld [vmem:[%s4629_s1 + $0x68] sm:$0xff] }
 0x4d1   :  { %v814_v47 = vpop.f32.mrf.mxu0 }
 0x4d2   :  { %v3888_v48 = vadd.f32 %v3413_v46, %v814_v47  ;;  %v728_v47 = vld [vmem:[#allocation2 + $0x8] sm:$0xff] }
 0x4d9   :  { %v817_v49 = vpop.f32.mrf.mxu0 }
 0x4da   :  { %v818_v50 = vadd.f32 %v3413_v46, %v817_v49  ;;  %v3225_v46 = vld [vmem:[%s4629_s1 + $0x60] sm:$0xff] }
 0x4dc   :  { %3214 = vmatpush.xpose.msk.msrb.mxu0 %vm255_vm8, %v818_v50  ;;  %v629_v50 = vld [vmem:[#allocation2] sm:$0xff] }
 0x53e   :  { %v584_v51 = vpop.xlane.xlu2 %583 }
 0x53f   :  { %v585_v52 = vsub.f32 %v580_v41, %v584_v51 }
 0x540   :  { %v683_v53 = vpop.xlane.xlu1 %682 }
 0x541   :  { %v586_v54 = vmul.f32 1.442695, %v585_v52  ;;  %v684_v55 = vsub.f32 %v679_v43, %v683_v53  ;;  %v3228_v43 = vld [vmem:[%s4629_s1 + $0x78] sm:$0xff]  ;;  %v3415_v53 = vld [vmem:[%s4634_s10 + $0x2] ss:$0 sm:$0xff] }
 0x542   :  { %1108 = vmatpush.msra.mxu0 %v3228_v43 }
 0x543   :  { %3459 = vpow2.f32 %v586_v54  ;;  %v685_v56 = vmul.f32 1.442695, %v684_v55 }
 0x544   :  { %1109 = vmatpush.msra.mxu0 %v3227_v44 }
 0x545   :  { %3461 = vpow2.f32 %v685_v56 }
 0x546   :  { %1110 = vmatpush.msra.mxu0 %v3226_v45 }
 0x548   :  { %1111 = vmatpush.msra.mxu0 %v3225_v46 }
 0x549   :  { %v3460_v58 = vpop.eup %3459 }
 0x54a   :  { %v588_v59 = vsel %vm255_vm8, %v3460_v58, 0.0 }
 0x54b   :  { %v3462_v61 = vpop.eup %3461  ;;  %589 = vadd.xlane.f32.xlu0 %v588_v59 }
 0x54c   :  { %v687_v62 = vsel %vm255_vm8, %v3462_v61, 0.0 }
 0x54d   :  { %688 = vadd.xlane.f32.xlu2 %v687_v62 }
 0x5be   :  { %v590_v4 = vpop.xlane.xlu0 %589 }
 0x5bf   :  { %3463 = vrcp.f32 %v590_v4  ;;  %v602_v12 = vand.u32 2147483648, %v590_v4  ;;  %v600_v14 = vand.u32 2147483647, %v590_v4  ;;  %vm596_vm3 = vweird.f32 %v590_v4 }
 0x5c0   :  { %v689_v5 = vpop.xlane.xlu2 %688 }
 0x5c1   :  { %3465 = vrcp.f32 %v689_v5  ;;  %v701_v17 = vand.u32 2147483648, %v689_v5  ;;  %v699_v20 = vand.u32 2147483647, %v689_v5  ;;  %v603_v23 = vor.u32 1.1754944e-38, %v602_v12 }
 0x5c2   :  { %vm601_vm6 = vcmp.eq.f32.partialorder %v600_v14, 8.507059e+37  ;;  %vm695_vm7 = vweird.f32 %v689_v5 }
 0x5c3   :  { %v702_v27 = vor.u32 1.1754944e-38, %v701_v17  ;;  %vm700_vm10 = vcmp.eq.f32.partialorder %v699_v20, 8.507059e+37  ;;  %v3235_v20 = vld [vmem:[%s4630_s9 + $0x78] sm:$0xff] }
 0x5c5   :  { %v3464_v6 = vpop.eup %3463 }
 0x5c6   :  { %v592_v7 = vmul.f32 %v3464_v6, %v590_v4  ;;  %vm597_vm2 = vweird.f32 %v3464_v6 }
 0x5c7   :  { %v3466_v8 = vpop.eup %3465  ;;  %vm598_vm5 = vmor %vm596_vm3, %vm597_vm2 }
 0x5c8   :  { %v593_v9 = vsub.f32 1.0, %v592_v7  ;;  %v691_v11 = vmul.f32 %v3466_v8, %v689_v5  ;;  %vm696_vm4 = vweird.f32 %v3466_v8 }
 0x5c9   :  { %vm697_vm9 = vmor %vm695_vm7, %vm696_vm4 }
 0x5ca   :  { %v594_v13 = vmul.f32 %v3464_v6, %v593_v9  ;;  %v692_v16 = vsub.f32 1.0, %v691_v11 }
 0x5cc   :  { %v595_v18 = vadd.f32 %v3464_v6, %v594_v13  ;;  %v693_v19 = vmul.f32 %v3466_v8, %v692_v16 }
 0x5ce   :  { %v599_v24 = vsel %vm598_vm5, %v3464_v6, %v595_v18  ;;  %v694_v25 = vadd.f32 %v3466_v8, %v693_v19  ;;  %v3209_v19 = vld [vmem:[%s4636_s7 + $0x10] sm:$0xff] }
 0x5cf   :  { %v604_v26 = vsel %vm601_vm6, %v603_v23, %v599_v24  ;;  %v3234_v23 = vld [vmem:[%s4630_s9 + $0x70] sm:$0xff]  ;;  %v3233_v24 = vld [vmem:[%s4630_s9 + $0x68] sm:$0xff] }
 0x5d0   :  { %v698_v28 = vsel %vm697_vm9, %v3466_v8, %v694_v25  ;;  %v605_v29 = vmul.f32 %v3460_v58, %v604_v26  ;;  %v3232_v25 = vld [vmem:[%s4630_s9 + $0x60] sm:$0xff] }
 0x5d1   :  { %v703_v30 = vsel %vm700_vm10, %v702_v27, %v698_v28 }
 0x5d2   :  { %3182 = vmatmul.msk.f32.vlgmr.msrb.gmra.mxu2 %vm255_vm8, %v605_v29  ;;  %v704_v31 = vmul.f32 %v3462_v61, %v703_v30 }
 0x5d3   :  { %3210 = vmatpush.xpose.msk.msrb.mxu2 %vm255_vm8, %v3888_v48 }
 0x5d4   :  { %3186 = vmatmul.msk.f32.vlgmr.msrb.gmra.mxu1 %vm255_vm8, %v704_v31 }
 0x5dc   :  { %3207 = vmatmul.msk.f32.vlgmr.msra.gmra.mxu1 %vm87_vm0, %v3748_v57 }
 0x5e4   :  { %3208 = vmatmul.msk.f32.gmra.mxu1 %vm87_vm0, %v3757_v60 }
 0x651   :  { %v725_v36 = vpop.f32.mrf.mxu1 }
 0x652   :  { %3187 = vmatmul.msk.f32.vlgmr.msra.gmra.mxu2 %vm255_vm8, %v725_v36 }
 0x655   :  { %v626_v37 = vpop.f32.mrf.mxu2 }
 0x656   :  { %3183 = vmatmul.msk.f32.vlgmr.msra.gmra.mxu3 %vm255_vm8, %v626_v37 }
 0x657   :  { %947 = vmatpush.msra.mxu3 %v3209_v19 }
 0x659   :  { %v847_v39 = vpop.f32.mrf.mxu1 }
 0x65a   :  { %v848_v40 = vadd.f32 %v3414_v38, %v847_v39 }
 0x65c   :  { %923 = vmatpush.msra.mxu2 %v848_v40 }
 0x65e   :  { %3193 = vmatmul.msk.f32.vlgmr.msrb.gmra.mxu3 %vm87_vm0, %v3748_v57 }
 0x661   :  { %v850_v41 = vpop.f32.mrf.mxu1 }
 0x662   :  { %v851_v42 = vadd.f32 %v3414_v38, %v850_v41 }
 0x664   :  { %1022 = vmatpush.msrb.mxu1 %v851_v42 }
 0x666   :  { %3194 = vmatmul.msk.f32.gmra.mxu3 %vm87_vm0, %v3757_v60  ;;  %1141 = vmatpush.msra.mxu1 %v3235_v20 }
 0x668   :  { %1142 = vmatpush.msra.mxu1 %v3234_v23 }
 0x66a   :  { %1143 = vmatpush.msra.mxu1 %v3233_v24 }
 0x66c   :  { %1144 = vmatpush.msra.mxu1 %v3232_v25 }
 0x6d5   :  { %v749_v48 = vpop.f32.mrf.mxu2 }
 0x6d6   :  { %v752_v49 = vadd.f32 %v749_v48, %v728_v47 }
 0x6d8   :  { %753 = vst.msk [vmem:[#allocation2 + $0x8] sm:$0xff] %vm87_vm0, %v752_v49 }
 0x6d9   :  { %v650_v51 = vpop.f32.mrf.mxu3 }
 0x6da   :  { %v653_v52 = vadd.f32 %v650_v51, %v629_v50  ;;  %v3221_v50 = vld [vmem:[%s4628_s0 + $0x78] sm:$0xff]  ;;  %v3220_v51 = vld [vmem:[%s4628_s0 + $0x70] sm:$0xff] }
 0x6db   :  { %1075 = vmatpush.msrb.mxu3 %v3221_v50 }
 0x6dc   :  { %654 = vst.msk [vmem:[#allocation2] sm:$0xff] %vm87_vm0, %v653_v52  ;;  %v3219_v52 = vld [vmem:[%s4628_s0 + $0x68] sm:$0xff] }
 0x6dd   :  { %1076 = vmatpush.msrb.mxu3 %v3220_v51 }
 0x6df   :  { %1077 = vmatpush.msrb.mxu3 %v3219_v52 }
 0x6e1   :  { %v781_v54 = vpop.f32.mrf.mxu3 }
 0x6e2   :  { %v782_v55 = vadd.f32 %v3415_v53, %v781_v54 }
 0x6e4   :  { %3211 = vmatmul.msk.f32.vlgmr.msrb.gmra.mxu2 %vm255_vm8, %v782_v55 }
 0x6e5   :  { %1046 = vmatpush.msrb.mxu2 %v3209_v19 }
 0x6e9   :  { %v784_v56 = vpop.f32.mrf.mxu3 }
 0x6ea   :  { %v785_v58 = vadd.f32 %v3415_v53, %v784_v56  ;;  %v3218_v53 = vld [vmem:[%s4628_s0 + $0x60] sm:$0xff] }
 0x6eb   :  { %1078 = vmatpush.msrb.mxu3 %v3218_v53  ;;  %v3417_v56 = vld [vmem:[%s4635_s11 + $0x3] ss:$0 sm:$0xff] }
 0x6ec   :  { %3215 = vmatmul.msk.f32.vlgmr.msrb.gmra.mxu0 %vm255_vm8, %v785_v58 }
 0x6f4   :  { %3230 = vmatmul.msk.f32.vlgmr.msra.gmra.mxu0 %vm87_vm0, %v3748_v57 }
 0x6fc   :  { %3231 = vmatmul.msk.f32.gmra.mxu0 %vm87_vm0, %v3757_v60 }
 0x767   :  { %v878_v59 = vpop.f32.mrf.mxu2 }
 0x768   :  { %v879_v61 = vadd.f32 %v878_v59, %v3800_v21 }
 0x769   :  { %v977_v62 = vpop.f32.mrf.mxu0 }
 0x76a   :  { %v978_v63 = vadd.f32 %v977_v62, %v3802_v22  ;;  %v881_v0 = vsel %vm255_vm8, %v879_v61, -inf }
 0x76b   :  { %882 = vmax.xlane.f32.xlu0 %v881_v0 }
 0x76c   :  { %v980_v1 = vsel %vm255_vm8, %v978_v63, -inf }
 0x76d   :  { %981 = vmax.xlane.f32.xlu2 %v980_v1 }
 0x771   :  { %v1113_v3 = vpop.f32.mrf.mxu0 }
 0x772   :  { %v3967_v4 = vadd.f32 %v3416_v2, %v1113_v3 }
 0x779   :  { %v1116_v5 = vpop.f32.mrf.mxu0 }
 0x77a   :  { %v1117_v6 = vadd.f32 %v3416_v2, %v1116_v5  ;;  %v928_v2 = vld [vmem:[#allocation2] sm:$0xff] }
 0x77b   :  { %v3418_v5 = vld [vmem:[%s4634_s10 + $0x3] ss:$0 sm:$0xff] }
 0x77c   :  { %3244 = vmatpush.xpose.msk.msrb.mxu0 %vm255_vm8, %v1117_v6 }
 0x7de   :  { %v883_v7 = vpop.xlane.xlu0 %882 }
 0x7df   :  { %v884_v8 = vsub.f32 %v879_v61, %v883_v7 }
 0x7e0   :  { %v982_v9 = vpop.xlane.xlu2 %981 }
 0x7e1   :  { %v885_v11 = vmul.f32 1.442695, %v884_v8  ;;  %v983_v12 = vsub.f32 %v978_v63, %v982_v9  ;;  %v1027_v63 = vld [vmem:[#allocation2 + $0x8] sm:$0xff] }
 0x7e3   :  { %3467 = vpow2.f32 %v885_v11  ;;  %v984_v13 = vmul.f32 1.442695, %v983_v12 }
 0x7e5   :  { %3469 = vpow2.f32 %v984_v13 }
 0x7e9   :  { %v3468_v14 = vpop.eup %3467 }
 0x7ea   :  { %v887_v16 = vsel %vm255_vm8, %v3468_v14, 0.0 }
 0x7eb   :  { %v3470_v17 = vpop.eup %3469  ;;  %888 = vadd.xlane.f32.xlu1 %v887_v16 }
 0x7ec   :  { %v986_v18 = vsel %vm255_vm8, %v3470_v17, 0.0 }
 0x7ed   :  { %987 = vadd.xlane.f32.xlu0 %v986_v18 }
 0x85e   :  { %v889_v26 = vpop.xlane.xlu1 %888 }
 0x85f   :  { %3471 = vrcp.f32 %v889_v26  ;;  %v901_v33 = vand.u32 2147483648, %v889_v26  ;;  %v899_v35 = vand.u32 2147483647, %v889_v26  ;;  %vm895_vm12 = vweird.f32 %v889_v26 }
 0x860   :  { %v988_v27 = vpop.xlane.xlu0 %987 }
 0x861   :  { %3473 = vrcp.f32 %v988_v27  ;;  %v1000_v37 = vand.u32 2147483648, %v988_v27  ;;  %v998_v40 = vand.u32 2147483647, %v988_v27  ;;  %v902_v41 = vor.u32 1.1754944e-38, %v901_v33 }
 0x862   :  { %vm900_vm15 = vcmp.eq.f32.partialorder %v899_v35, 8.507059e+37  ;;  %vm994_vm1 = vweird.f32 %v988_v27 }
 0x863   :  { %v1001_v45 = vor.u32 1.1754944e-38, %v1000_v37  ;;  %vm999_vm3 = vcmp.eq.f32.partialorder %v998_v40, 8.507059e+37 }
 0x865   :  { %v3472_v28 = vpop.eup %3471 }
 0x866   :  { %v891_v29 = vmul.f32 %v3472_v28, %v889_v26  ;;  %vm896_vm11 = vweird.f32 %v3472_v28 }
 0x867   :  { %v3474_v30 = vpop.eup %3473  ;;  %vm897_vm14 = vmor %vm895_vm12, %vm896_vm11 }
 0x868   :  { %v892_v31 = vsub.f32 1.0, %v891_v29  ;;  %v990_v32 = vmul.f32 %v3474_v30, %v988_v27  ;;  %vm995_vm13 = vweird.f32 %v3474_v30 }
 0x869   :  { %vm996_vm2 = vmor %vm994_vm1, %vm995_vm13 }
 0x86a   :  { %v893_v34 = vmul.f32 %v3472_v28, %v892_v31  ;;  %v991_v36 = vsub.f32 1.0, %v990_v32 }
 0x86c   :  { %v894_v38 = vadd.f32 %v3472_v28, %v893_v34  ;;  %v992_v39 = vmul.f32 %v3474_v30, %v991_v36 }
 0x86e   :  { %v898_v42 = vsel %vm897_vm14, %v3472_v28, %v894_v38  ;;  %v993_v43 = vadd.f32 %v3474_v30, %v992_v39 }
 0x86f   :  { %v903_v44 = vsel %vm900_vm15, %v902_v41, %v898_v42 }
 0x870   :  { %v997_v46 = vsel %vm996_vm2, %v3474_v30, %v993_v43  ;;  %v904_v47 = vmul.f32 %v3468_v14, %v903_v44 }
 0x871   :  { %v1002_v48 = vsel %vm999_vm3, %v1001_v45, %v997_v46 }
 0x872   :  { %3212 = vmatmul.msk.f32.vlgmr.msra.gmra.mxu2 %vm255_vm8, %v904_v47  ;;  %v1003_v49 = vmul.f32 %v3470_v17, %v1002_v48 }
 0x873   :  { %3240 = vmatpush.xpose.msk.msra.mxu2 %vm255_vm8, %v3967_v4 }
 0x874   :  { %3216 = vmatmul.msk.f32.vlgmr.msrb.gmra.mxu1 %vm255_vm8, %v1003_v49 }
 0x87c   :  { %3237 = vmatmul.msk.f32.vlgmr.msra.gmra.mxu1 %vm87_vm0, %v3748_v57 }
 0x884   :  { %3238 = vmatmul.msk.f32.gmra.mxu1 %vm87_vm0, %v3757_v60 }
 0x8f1   :  { %v1024_v54 = vpop.f32.mrf.mxu1 }
 0x8f2   :  { %3217 = vmatmul.msk.f32.vlgmr.msrb.gmra.mxu2 %vm255_vm8, %v1024_v54  ;;  %v3239_v54 = vld [vmem:[%s4636_s7 + $0x18] sm:$0xff] }
 0x8f5   :  { %v925_v55 = vpop.f32.mrf.mxu2 }
 0x8f6   :  { %3213 = vmatmul.msk.f32.vlgmr.msra.gmra.mxu3 %vm255_vm8, %v925_v55 }
 0x8f7   :  { %1246 = vmatpush.msra.mxu3 %v3239_v54 }
 0x8f9   :  { %v1146_v58 = vpop.f32.mrf.mxu1 }
 0x8fa   :  { %v1147_v59 = vadd.f32 %v3417_v56, %v1146_v58 }
 0x8fc   :  { %1222 = vmatpush.msrb.mxu2 %v1147_v59 }
 0x8fe   :  { %3223 = vmatmul.msk.f32.vlgmr.msrb.gmra.mxu3 %vm87_vm0, %v3748_v57 }
 0x901   :  { %v1149_v61 = vpop.f32.mrf.mxu1 }
 0x902   :  { %v1150_v62 = vadd.f32 %v3417_v56, %v1149_v61 }
 0x904   :  { %1321 = vmatpush.msrb.mxu1 %v1150_v62 }
 0x906   :  { %3224 = vmatmul.msk.f32.gmra.mxu3 %vm87_vm0, %v3757_v60 }
 0x975   :  { %v1048_v0 = vpop.f32.mrf.mxu2 }
 0x976   :  { %v1051_v1 = vadd.f32 %v1048_v0, %v1027_v63 }
 0x978   :  { %1052 = vst.msk [vmem:[#allocation2 + $0x8] sm:$0xff] %vm87_vm0, %v1051_v1  ;;  %v3419_v1 = vld [vmem:[%s4588_s12] ss:$0 sm:$0xff] }
 0x979   :  { %v949_v3 = vpop.f32.mrf.mxu3 }
 0x97a   :  { %v952_v4 = vadd.f32 %v949_v3, %v928_v2 }
 0x97c   :  { %953 = vst.msk [vmem:[#allocation2] sm:$0xff] %vm87_vm0, %v952_v4 }
 0x97f   :  { %v1326_v58 = vld [vmem:[#allocation2 + $0x8] sm:$0xff] }
 0x981   :  { %v1080_v6 = vpop.f32.mrf.mxu3 }
 0x982   :  { %v1081_v7 = vadd.f32 %v3418_v5, %v1080_v6 }
 0x983   :  { %v1227_v62 = vld [vmem:[#allocation2] sm:$0xff] }
 0x984   :  { %3241 = vmatmul.msk.f32.vlgmr.msra.gmra.mxu2 %vm255_vm8, %v1081_v7 }
 0x985   :  { %1345 = vmatpush.msra.mxu2 %v3239_v54  ;;  %v1479_v54 = vld [vmem:[%s4594_s17 + $0x30] sm:$0xff] }
 0x989   :  { %v1083_v8 = vpop.f32.mrf.mxu3 }
 0x98a   :  { %v1084_v9 = vadd.f32 %v3418_v5, %v1083_v8 }
 0x98c   :  { %3245 = vmatmul.msk.f32.vlgmr.msrb.gmra.mxu0 %vm255_vm8, %v1084_v9 }
 0xa07   :  { %v1177_v11 = vpop.f32.mrf.mxu2 }
 0xa08   :  { %v1178_v12 = vadd.f32 %v1177_v11, %v3800_v21 }
 0xa09   :  { %v1276_v13 = vpop.f32.mrf.mxu0 }
 0xa0a   :  { %v1277_v14 = vadd.f32 %v1276_v13, %v3802_v22  ;;  %v1180_v16 = vsel %vm255_vm8, %v1178_v12, -inf }
 0xa0b   :  { %1181 = vmax.xlane.f32.xlu1 %v1180_v16 }
 0xa0c   :  { %v1279_v17 = vsel %vm255_vm8, %v1277_v14, -inf }
 0xa0d   :  { %1280 = vmax.xlane.f32.xlu0 %v1279_v17 }
 0xa7e   :  { %v1182_v18 = vpop.xlane.xlu1 %1181 }
 0xa7f   :  { %v1183_v19 = vsub.f32 %v1178_v12, %v1182_v18 }
 0xa80   :  { %v1281_v20 = vpop.xlane.xlu0 %1280 }
 0xa81   :  { %v1184_v23 = vmul.f32 1.442695, %v1183_v19  ;;  %v1282_v24 = vsub.f32 %v1277_v14, %v1281_v20  ;;  %v1420_v20 = vld [vmem:[%s4592_s15 + $0x10] sm:$0xff] }
 0xa83   :  { %3475 = vpow2.f32 %v1184_v23  ;;  %v1283_v25 = vmul.f32 1.442695, %v1282_v24  ;;  %v1419_v23 = vld [vmem:[%s4592_s15 + $0x8] sm:$0xff]  ;;  %v1418_v24 = vld [vmem:[%s4592_s15] sm:$0xff] }
 0xa85   :  { %3477 = vpow2.f32 %v1283_v25 }
 0xa89   :  { %v3476_v26 = vpop.eup %3475 }
 0xa8a   :  { %v1186_v27 = vsel %vm255_vm8, %v3476_v26, 0.0 }
 0xa8b   :  { %v3478_v28 = vpop.eup %3477  ;;  %1187 = vadd.xlane.f32.xlu2 %v1186_v27 }
 0xa8c   :  { %v1285_v29 = vsel %vm255_vm8, %v3478_v28, 0.0 }
 0xa8d   :  { %1286 = vadd.xlane.f32.xlu1 %v1285_v29 }
 0xafe   :  { %v1188_v30 = vpop.xlane.xlu2 %1187 }
 0xaff   :  { %3479 = vrcp.f32 %v1188_v30  ;;  %v1200_v37 = vand.u32 2147483648, %v1188_v30  ;;  %v1198_v39 = vand.u32 2147483647, %v1188_v30  ;;  %vm1194_vm5 = vweird.f32 %v1188_v30 }
 0xb00   :  { %v1287_v31 = vpop.xlane.xlu1 %1286 }
 0xb01   :  { %3481 = vrcp.f32 %v1287_v31  ;;  %v1299_v41 = vand.u32 2147483648, %v1287_v31  ;;  %v1297_v44 = vand.u32 2147483647, %v1287_v31  ;;  %v1201_v45 = vor.u32 1.1754944e-38, %v1200_v37 }
 0xb02   :  { %vm1199_vm9 = vcmp.eq.f32.partialorder %v1198_v39, 8.507059e+37  ;;  %vm1293_vm10 = vweird.f32 %v1287_v31 }
 0xb03   :  { %v1300_v49 = vor.u32 1.1754944e-38, %v1299_v41  ;;  %vm1298_vm12 = vcmp.eq.f32.partialorder %v1297_v44, 8.507059e+37  ;;  %v3420_v44 = vld [vmem:[%s4589_s13] ss:$0 sm:$0xff] }
 0xb05   :  { %v3480_v32 = vpop.eup %3479 }
 0xb06   :  { %v1190_v33 = vmul.f32 %v3480_v32, %v1188_v30  ;;  %vm1195_vm4 = vweird.f32 %v3480_v32 }
 0xb07   :  { %v3482_v34 = vpop.eup %3481  ;;  %vm1196_vm7 = vmor %vm1194_vm5, %vm1195_vm4  ;;  %vm1485_vm4 = vcmask 523264  }
 0xb08   :  { %v1191_v35 = vsub.f32 1.0, %v1190_v33  ;;  %v1289_v36 = vmul.f32 %v3482_v34, %v1287_v31  ;;  %vm1294_vm6 = vweird.f32 %v3482_v34 }
 0xb09   :  { %vm1295_vm11 = vmor %vm1293_vm10, %vm1294_vm6 }
 0xb0a   :  { %v1192_v38 = vmul.f32 %v3480_v32, %v1191_v35  ;;  %v1290_v40 = vsub.f32 1.0, %v1289_v36 }
 0xb0c   :  { %v1193_v42 = vadd.f32 %v3480_v32, %v1192_v38  ;;  %v1291_v43 = vmul.f32 %v3482_v34, %v1290_v40 }
 0xb0e   :  { %v1197_v46 = vsel %vm1196_vm7, %v3480_v32, %v1193_v42  ;;  %v1292_v47 = vadd.f32 %v3482_v34, %v1291_v43 }
 0xb0f   :  { %v1202_v48 = vsel %vm1199_vm9, %v1201_v45, %v1197_v46 }
 0xb10   :  { %v1296_v50 = vsel %vm1295_vm11, %v3482_v34, %v1292_v47  ;;  %v1203_v51 = vmul.f32 %v3476_v26, %v1202_v48  ;;  %v3421_v48 = vld [vmem:[%s4590_s14] ss:$0 sm:$0xff] }
 0xb11   :  { %v1301_v52 = vsel %vm1298_vm12, %v1300_v49, %v1296_v50 }
 0xb12   :  { %3242 = vmatmul.msk.f32.vlgmr.msrb.gmra.mxu2 %vm255_vm8, %v1203_v51  ;;  %v1302_v53 = vmul.f32 %v3478_v28, %v1301_v52 }
 0xb14   :  { %3246 = vmatmul.msk.f32.vlgmr.msrb.gmra.mxu1 %vm255_vm8, %v1302_v53  ;;  %v1480_v53 = vld [vmem:[%s4594_s17 + $0x38] sm:$0xff] }
 0xb15   :  { %1500 = vmatpush.msra.mxu0 %v1480_v53  ;;  %v3266_v53 = vld [vmem:[%s4630_s9 + $0x80] sm:$0xff] }
 0xb17   :  { %1501 = vmatpush.msra.mxu0 %v1479_v54 }
 0xb91   :  { %v1323_v55 = vpop.f32.mrf.mxu1 }
 0xb92   :  { %3247 = vmatmul.msk.f32.vlgmr.msra.gmra.mxu2 %vm255_vm8, %v1323_v55  ;;  %v1478_v55 = vld [vmem:[%s4594_s17 + $0x28] sm:$0xff] }
 0xb93   :  { %1502 = vmatpush.msra.mxu0 %v1478_v55 }
 0xb95   :  { %v1224_v56 = vpop.f32.mrf.mxu2 }
 0xb96   :  { %3243 = vmatmul.msk.f32.vlgmr.msra.gmra.mxu3 %vm255_vm8, %v1224_v56  ;;  %v1477_v56 = vld [vmem:[%s4594_s17 + $0x20] sm:$0xff] }
 0xb97   :  { %1503 = vmatpush.msra.mxu0 %v1477_v56 }
 0xc15   :  { %v1347_v59 = vpop.f32.mrf.mxu2 }
 0xc16   :  { %v1350_v61 = vadd.f32 %v1347_v59, %v1326_v58  ;;  %v1476_v58 = vld [vmem:[%s4594_s17 + $0x18] sm:$0xff]  ;;  %v1475_v59 = vld [vmem:[%s4594_s17 + $0x10] sm:$0xff] }
 0xc17   :  { %1504 = vmatpush.msra.mxu0 %v1476_v58 }
 0xc18   :  { %1351 = vst.msk [vmem:[#allocation2 + $0x8] sm:$0xff] %vm87_vm0, %v1350_v61  ;;  %v1474_v61 = vld [vmem:[%s4594_s17 + $0x8] sm:$0xff] }
 0xc19   :  { %v1248_v63 = vpop.f32.mrf.mxu3  ;;  %1505 = vmatpush.msra.mxu0 %v1475_v59 }
 0xc1a   :  { %v1251_v0 = vadd.f32 %v1248_v63, %v1227_v62  ;;  %v1473_v62 = vld [vmem:[%s4594_s17] sm:$0xff] }
 0xc1b   :  { %1506 = vmatpush.msra.mxu0 %v1474_v61  ;;  %v3422_v63 = vld [vmem:[%s4591_s16] ss:$0 sm:$0xff] }
 0xc1c   :  { %1252 = vst.msk [vmem:[#allocation2] sm:$0xff] %vm87_vm0, %v1251_v0 }
 0xc1d   :  { %1507 = vmatpush.msra.mxu0 %v1473_v62 }
 0xc1f   :  { %v1353_v2 = vld [vmem:[#allocation2 + $0x8] sm:$0xff] }
 0xc20   :  { %v1359_v3 = vadd.f32 %v3419_v1, %v1353_v2  ;;  %1574 = vst.msk [vmem:[#allocation2 + $0x8] sm:$0xff] %vm87_vm0, %v3544_v15 }
 0xc22   :  { %v1361_v4 = vadd.f32 %v1359_v3, %v3757_v60 }
 0xc23   :  { %v1352_v5 = vld [vmem:[#allocation2] sm:$0xff] }
 0xc24   :  { %v1367_v6 = vsel %vm87_vm0, %v1361_v4, 0.0  ;;  %v1358_v7 = vadd.f32 %v3419_v1, %v1352_v5  ;;  %1573 = vst.msk [vmem:[#allocation2] sm:$0xff] %vm87_vm0, %v3544_v15 }
 0xc25   :  { %1368 = vadd.xlane.f32.xlu1 %v1367_v6 }
 0xc26   :  { %v1360_v8 = vadd.f32 %v1358_v7, %v3748_v57  ;;  %v1421_v57 = vld [vmem:[%s4592_s15 + $0x18] sm:$0xff] }
 0xc27   :  { %1444 = vmatpush.msrb.mxu3 %v1421_v57 }
 0xc28   :  { %v1364_v9 = vsel %vm87_vm0, %v1360_v8, 0.0 }
 0xc29   :  { %1365 = vadd.xlane.f32.xlu2 %v1364_v9  ;;  %1445 = vmatpush.msrb.mxu3 %v1420_v20 }
 0xc2b   :  { %1446 = vmatpush.msrb.mxu3 %v1419_v23  ;;  %v3423_v23 = vld [vmem:[%s4593_s18] ss:$0 sm:$0xff] }
 0xc2d   :  { %1447 = vmatpush.msrb.mxu3 %v1418_v24 }
 0xc98   :  { %v1369_v11 = vpop.xlane.xlu1 %1368 }
 0xc99   :  { %v1371_v12 = vmul.f32 %v1369_v11, %v3689_v10 }
 0xc9b   :  { %v1373_v13 = vsub.f32 %v1361_v4, %v1371_v12 }
 0xc9c   :  { %v1366_v14 = vpop.xlane.xlu2 %1365 }
 0xc9d   :  { %v1370_v60 = vmul.f32 %v1366_v14, %v3689_v10  ;;  %v1375_v16 = vmul.f32 %v1373_v13, %v1373_v13 }
 0xc9f   :  { %v1372_v17 = vsub.f32 %v1360_v8, %v1370_v60  ;;  %v1379_v18 = vsel %vm87_vm0, %v1375_v16, 0.0 }
 0xca0   :  { %1380 = vadd.xlane.f32.xlu2 %v1379_v18 }
 0xca1   :  { %v1374_v19 = vmul.f32 %v1372_v17, %v1372_v17 }
 0xca3   :  { %v1376_v15 = vsel %vm87_vm0, %v1374_v19, 0.0 }
 0xca4   :  { %1377 = vadd.xlane.f32.xlu0 %v1376_v15 }
 0xd13   :  { %v1381_v25 = vpop.xlane.xlu2 %1380 }
 0xd14   :  { %v1383_v26 = vmul.f32 %v1381_v25, %v3689_v10 }
 0xd16   :  { %v1385_v27 = vadd.f32 1e-12, %v1383_v26 }
 0xd17   :  { %v1378_v28 = vpop.xlane.xlu0 %1377 }
 0xd18   :  { %3483 = vrsqrt.f32 %v1385_v27  ;;  %v1382_v29 = vmul.f32 %v1378_v28, %v3689_v10  ;;  %vm1402_vm2 = vweird.f32 %v1385_v27 }
 0xd1a   :  { %v1384_v30 = vadd.f32 1e-12, %v1382_v29 }
 0xd1c   :  { %3485 = vrsqrt.f32 %v1384_v30  ;;  %vm1392_vm15 = vweird.f32 %v1384_v30 }
 0xd1e   :  { %v3484_v31 = vpop.eup %3483 }
 0xd1f   :  { %v1397_v32 = vmul.f32 %v3484_v31, %v1385_v27  ;;  %vm1403_vm14 = vweird.f32 %v3484_v31 }
 0xd20   :  { %vm1404_vm3 = vmor %vm1402_vm2, %vm1403_vm14 }
 0xd21   :  { %v1398_v33 = vmul.f32 %v3484_v31, %v1397_v32 }
 0xd22   :  { %v3486_v34 = vpop.eup %3485 }
 0xd23   :  { %v1399_v35 = vmul.f32 0.5, %v1398_v33  ;;  %v1387_v36 = vmul.f32 %v3486_v34, %v1384_v30  ;;  %vm1393_vm13 = vweird.f32 %v3486_v34 }
 0xd24   :  { %vm1394_vm1 = vmor %vm1392_vm15, %vm1393_vm13 }
 0xd25   :  { %v1388_v37 = vmul.f32 %v3486_v34, %v1387_v36  ;;  %v1400_v38 = vsub.f32 1.5, %v1399_v35 }
 0xd27   :  { %v1389_v39 = vmul.f32 0.5, %v1388_v37  ;;  %v1401_v41 = vmul.f32 %v3484_v31, %v1400_v38 }
 0xd29   :  { %v1390_v40 = vsub.f32 1.5, %v1389_v39  ;;  %v1405_v46 = vsel %vm1404_vm3, %v3484_v31, %v1401_v41 }
 0xd2a   :  { %v1407_v50 = vmul.f32 %v1405_v46, %v1373_v13  ;;  %v3261_v46 = vld [vmem:[%s4629_s1 + $0x90] sm:$0xff] }
 0xd2b   :  { %v1391_v42 = vmul.f32 %v3486_v34, %v1390_v40 }
 0xd2c   :  { %v1412_v51 = vmul.f32 %v3420_v44, %v1407_v50  ;;  %v3267_v50 = vld [vmem:[%s4630_s9 + $0x88] sm:$0xff] }
 0xd2d   :  { %v1395_v43 = vsel %vm1394_vm1, %v3486_v34, %v1391_v42  ;;  %v3255_v42 = vld [vmem:[%s4628_s0 + $0x98] sm:$0xff] }
 0xd2e   :  { %v1406_v45 = vmul.f32 %v1395_v43, %v1372_v17  ;;  %v1417_v52 = vadd.f32 %v3421_v48, %v1412_v51  ;;  %v3262_v43 = vld [vmem:[%s4629_s1 + $0x98] sm:$0xff]  ;;  %1603 = vmatpush.msra.mxu1 %v3255_v42  ;;  %v3252_v51 = vld [vmem:[%s4628_s0 + $0x80] sm:$0xff] }
 0xd2f   :  { %1636 = vmatpush.msrb.mxu2 %v3262_v43 }
 0xd30   :  { %v1411_v47 = vmul.f32 %v3420_v44, %v1406_v45  ;;  %v3269_v44 = vld [vmem:[%s4630_s9 + $0x98] sm:$0xff]  ;;  %v3254_v45 = vld [vmem:[%s4628_s0 + $0x90] sm:$0xff] }
 0xd31   :  { %1669 = vmatpush.msra.mxu3 %v3269_v44  ;;  %1604 = vmatpush.msra.mxu1 %v3254_v45 }
 0xd32   :  { %v1416_v49 = vadd.f32 %v3421_v48, %v1411_v47  ;;  %v3268_v47 = vld [vmem:[%s4630_s9 + $0x90] sm:$0xff]  ;;  %1637 = vmatpush.msrb.mxu2 %v3261_v46  ;;  %v3253_v48 = vld [vmem:[%s4628_s0 + $0x88] sm:$0xff] }
 0xd33   :  { %1670 = vmatpush.msra.mxu3 %v3268_v47  ;;  %1605 = vmatpush.msra.mxu1 %v3253_v48  ;;  %v3429_v47 = vld [vmem:[%s4633_s6 + $0x5] ss:$0 sm:$0xff] }
 0xd34   :  { %3248 = vmatmul.msk.f32.vlgmr.msrb.gmra.mxu3 %vm87_vm0, %v1416_v49 }
 0xd35   :  { %1671 = vmatpush.msra.mxu3 %v3267_v50  ;;  %1606 = vmatpush.msra.mxu1 %v3252_v51 }
 0xd37   :  { %1672 = vmatpush.msra.mxu3 %v3266_v53 }
 0xd3c   :  { %3249 = vmatmul.msk.f32.gmra.mxu3 %vm87_vm0, %v1417_v52 }
 0xdb7   :  { %v1449_v0 = vpop.f32.mrf.mxu3 }
 0xdb8   :  { %v1450_v1 = vadd.f32 %v3422_v63, %v1449_v0 }
 0xdba   :  { %v1455_v2 = vmul.f32 %v1450_v1, %v1450_v1 }
 0xdbc   :  { %v1457_v3 = vmul.f32 %v1455_v2, %v1450_v1 }
 0xdbe   :  { %v1459_v4 = vmul.f32 0.044715, %v1457_v3 }
 0xdbf   :  { %v1452_v5 = vpop.f32.mrf.mxu3 }
 0xdc0   :  { %v1461_v6 = vadd.f32 %v1459_v4, %v1450_v1  ;;  %v1453_v7 = vadd.f32 %v3422_v63, %v1452_v5 }
 0xdc2   :  { %v1463_v8 = vmul.f32 0.7978846, %v1461_v6  ;;  %v1456_v9 = vmul.f32 %v1453_v7, %v1453_v7  ;;  %v3424_v6 = vld [vmem:[%s4595_s19] ss:$0 sm:$0xff] }
 0xdc4   :  { %3487 = vtanh.f32 %v1463_v8  ;;  %v1458_v11 = vmul.f32 %v1456_v9, %v1453_v7  ;;  %v3425_v9 = vld [vmem:[%s4596_s20] ss:$0 sm:$0xff] }
 0xdc6   :  { %v1460_v12 = vmul.f32 0.044715, %v1458_v11 }
 0xdc8   :  { %v1462_v13 = vadd.f32 %v1460_v12, %v1453_v7 }
 0xdca   :  { %v3488_v14 = vpop.eup %3487  ;;  %v1464_v60 = vmul.f32 0.7978846, %v1462_v13 }
 0xdcb   :  { %v1467_v16 = vadd.f32 1.0, %v3488_v14 }
 0xdcc   :  { %3489 = vtanh.f32 %v1464_v60 }
 0xdcd   :  { %v1469_v17 = vmul.f32 0.5, %v1467_v16 }
 0xdcf   :  { %v1471_v18 = vmul.f32 %v1469_v17, %v1450_v1 }
 0xdd1   :  { %3250 = vmatmul.msk.f32.vlgmr.msra.gmra.mxu0 %vm1485_vm4, %v1471_v18 }
 0xdd2   :  { %v3490_v19 = vpop.eup %3489 }
 0xdd3   :  { %v1468_v15 = vadd.f32 1.0, %v3490_v19 }
 0xdd5   :  { %v1470_v57 = vmul.f32 0.5, %v1468_v15 }
 0xdd7   :  { %v1472_v20 = vmul.f32 %v1470_v57, %v1453_v7  ;;  %v3427_v57 = vld [vmem:[%s4633_s6 + $0x4] ss:$0 sm:$0xff] }
 0xdd9   :  { %3251 = vmatmul.msk.f32.gmra.mxu0 %vm1485_vm4, %v1472_v20  ;;  %v3428_v20 = vld [vmem:[%s4635_s11 + $0x4] ss:$0 sm:$0xff] }
 0xe4e   :  { %v1509_v24 = vpop.f32.mrf.mxu0 }
 0xe4f   :  { %v1510_v25 = vadd.f32 %v3423_v23, %v1509_v24  ;;  %v3426_v24 = vld [vmem:[%s4634_s10 + $0x4] ss:$0 sm:$0xff] }
 0xe51   :  { %v1515_v26 = vadd.f32 %v1510_v25, %v1416_v49  ;;  %v3260_v49 = vld [vmem:[%s4629_s1 + $0x88] sm:$0xff] }
 0xe52   :  { %1638 = vmatpush.msrb.mxu2 %v3260_v49 }
 0xe53   :  { %v1519_v27 = vsel %vm87_vm0, %v1515_v26, 0.0 }
 0xe54   :  { %1520 = vadd.xlane.f32.xlu0 %v1519_v27 }
 0xe56   :  { %v1512_v28 = vpop.f32.mrf.mxu0 }
 0xe57   :  { %v1513_v29 = vadd.f32 %v3423_v23, %v1512_v28 }
 0xe59   :  { %v1516_v30 = vadd.f32 %v1513_v29, %v1417_v52  ;;  %v3259_v52 = vld [vmem:[%s4629_s1 + $0x80] sm:$0xff] }
 0xe5a   :  { %1639 = vmatpush.msrb.mxu2 %v3259_v52 }
 0xe5b   :  { %v1522_v31 = vsel %vm87_vm0, %v1516_v30, 0.0 }
 0xe5c   :  { %1523 = vadd.xlane.f32.xlu2 %v1522_v31 }
 0xec7   :  { %v1521_v32 = vpop.xlane.xlu0 %1520 }
 0xec8   :  { %v1525_v33 = vmul.f32 %v1521_v32, %v3689_v10 }
 0xeca   :  { %v1527_v34 = vsub.f32 %v1515_v26, %v1525_v33 }
 0xecc   :  { %v1529_v35 = vmul.f32 %v1527_v34, %v1527_v34 }
 0xece   :  { %v1531_v36 = vsel %vm87_vm0, %v1529_v35, 0.0 }
 0xecf   :  { %1532 = vadd.xlane.f32.xlu1 %v1531_v36  ;;  %v1524_v37 = vpop.xlane.xlu2 %1523 }
 0xed0   :  { %v1526_v38 = vmul.f32 %v1524_v37, %v3689_v10  ;;  %v3291_v37 = vld [vmem:[%s4629_s1 + $0xb0] sm:$0xff] }
 0xed2   :  { %v4112_v39 = vsub.f32 %v1516_v30, %v1526_v38  ;;  %v3290_v38 = vld [vmem:[%s4629_s1 + $0xa8] sm:$0xff] }
 0xed4   :  { %v1530_v40 = vmul.f32 %v4112_v39, %v4112_v39 }
 0xed6   :  { %v1534_v41 = vsel %vm87_vm0, %v1530_v40, 0.0  ;;  %v3273_v40 = vld [vmem:[%s4636_s7 + $0x20] sm:$0xff] }
 0xed7   :  { %1535 = vadd.xlane.f32.xlu0 %v1534_v41  ;;  %1873 = vmatpush.msrb.mxu3 %v3273_v40 }
 0xed8   :  { %1774 = vmatpush.msrb.mxu0 %v3273_v40 }
 0xf42   :  { %v1533_v54 = vpop.xlane.xlu1 %1532 }
 0xf43   :  { %v1537_v55 = vmul.f32 %v1533_v54, %v3689_v10 }
 0xf45   :  { %v1539_v56 = vadd.f32 1e-12, %v1537_v55 }
 0xf47   :  { %3491 = vrsqrt.f32 %v1539_v56  ;;  %vm1547_vm6 = vweird.f32 %v1539_v56 }
 0xf4a   :  { %v1536_v58 = vpop.xlane.xlu0 %1535 }
 0xf4b   :  { %v1538_v59 = vmul.f32 %v1536_v58, %v3689_v10 }
 0xf4d   :  { %v3492_v61 = vpop.eup %3491  ;;  %v1540_v62 = vadd.f32 1e-12, %v1538_v59 }
 0xf4e   :  { %v1542_v63 = vmul.f32 %v3492_v61, %v1539_v56  ;;  %vm1548_vm5 = vweird.f32 %v3492_v61 }
 0xf4f   :  { %3493 = vrsqrt.f32 %v1540_v62  ;;  %vm1549_vm7 = vmor %vm1547_vm6, %vm1548_vm5  ;;  %vm1557_vm10 = vweird.f32 %v1540_v62 }
 0xf50   :  { %v1543_v0 = vmul.f32 %v3492_v61, %v1542_v63 }
 0xf52   :  { %v1544_v1 = vmul.f32 0.5, %v1543_v0 }
 0xf54   :  { %v1545_v2 = vsub.f32 1.5, %v1544_v1 }
 0xf55   :  { %v3494_v3 = vpop.eup %3493 }
 0xf56   :  { %v1546_v4 = vmul.f32 %v3492_v61, %v1545_v2  ;;  %v1552_v5 = vmul.f32 %v3494_v3, %v1540_v62  ;;  %vm1558_vm9 = vweird.f32 %v3494_v3 }
 0xf57   :  { %vm1559_vm11 = vmor %vm1557_vm10, %vm1558_vm9 }
 0xf58   :  { %v1550_v7 = vsel %vm1549_vm7, %v3492_v61, %v1546_v4  ;;  %v1553_v8 = vmul.f32 %v3494_v3, %v1552_v5 }
 0xf59   :  { %v1561_v11 = vmul.f32 %v1550_v7, %v1527_v34  ;;  %v3292_v34 = vld [vmem:[%s4629_s1 + $0xb8] sm:$0xff] }
 0xf5a   :  { %v1554_v12 = vmul.f32 0.5, %v1553_v8 }
 0xf5b   :  { %v1566_v13 = vmul.f32 %v3424_v6, %v1561_v11 }
 0xf5c   :  { %v1555_v14 = vsub.f32 1.5, %v1554_v12 }
 0xf5d   :  { %v4161_v60 = vadd.f32 %v3425_v9, %v1566_v13 }
 0xf5e   :  { %v1556_v16 = vmul.f32 %v3494_v3, %v1555_v14 }
 0xf5f   :  { %3257 = vmatmul.msk.f32.vlgmr.msra.gmra.mxu1 %vm87_vm0, %v4161_v60  ;;  %3264 = vmatmul.msk.f32.vlgmr.msrb.gmra.mxu2 %vm87_vm0, %v4161_v60 }
 0xf60   :  { %v1560_v17 = vsel %vm1559_vm11, %v3494_v3, %v1556_v16  ;;  %3271 = vmatmul.msk.f32.vlgmr.msra.gmra.mxu3 %vm87_vm0, %v4161_v60 }
 0xf61   :  { %v1562_v18 = vmul.f32 %v1560_v17, %v4112_v39  ;;  %v3289_v39 = vld [vmem:[%s4629_s1 + $0xa0] sm:$0xff] }
 0xf63   :  { %v1567_v19 = vmul.f32 %v3424_v6, %v1562_v18  ;;  %v3299_v18 = vld [vmem:[%s4630_s9 + $0xb8] sm:$0xff] }
 0xf65   :  { %v4170_v15 = vadd.f32 %v3425_v9, %v1567_v19 }
 0xf67   :  { %3258 = vmatmul.msk.f32.gmra.mxu1 %vm87_vm0, %v4170_v15  ;;  %3265 = vmatmul.msk.f32.gmra.mxu2 %vm87_vm0, %v4170_v15 }
 0xf68   :  { %3272 = vmatmul.msk.f32.gmra.mxu3 %vm87_vm0, %v4170_v15 }
 0xfdc   :  { %v1608_v23 = vpop.f32.mrf.mxu1 }
 0xfdd   :  { %v1609_v29 = vadd.f32 %v3426_v24, %v1608_v23  ;;  %v3298_v23 = vld [vmem:[%s4630_s9 + $0xb0] sm:$0xff] }
 0xfe2   :  { %v1641_v25 = vpop.f32.mrf.mxu2 }
 0xfe3   :  { %v1642_v26 = vadd.f32 %v3427_v57, %v1641_v25  ;;  %v1674_v27 = vpop.f32.mrf.mxu3  ;;  %v3297_v25 = vld [vmem:[%s4630_s9 + $0xa8] sm:$0xff] }
 0xfe4   :  { %v1675_v28 = vadd.f32 %v3428_v20, %v1674_v27  ;;  %v1611_v31 = vpop.f32.mrf.mxu1 }
 0xfe5   :  { %3274 = vmatpush.xpose.msk.msrb.mxu1 %vm255_vm8, %v1642_v26  ;;  %v1612_v36 = vadd.f32 %v3426_v24, %v1611_v31  ;;  %v3285_v31 = vld [vmem:[%s4628_s0 + $0xb8] sm:$0xff] }
 0xfe6   :  { %1750 = vmatpush.msra.mxu2 %v1675_v28  ;;  %v3296_v28 = vld [vmem:[%s4630_s9 + $0xa0] sm:$0xff]  ;;  %1902 = vmatpush.msra.mxu0 %v3285_v31 }
 0xfe8   :  { %3275 = vmatmul.msk.f32.vlgmr.msrb.gmra.mxu1 %vm255_vm8, %v1609_v29 }
 0xfea   :  { %v1644_v30 = vpop.f32.mrf.mxu2 }
 0xfeb   :  { %v1645_v32 = vadd.f32 %v3427_v57, %v1644_v30  ;;  %v1677_v33 = vpop.f32.mrf.mxu3 }
 0xfec   :  { %v1678_v35 = vadd.f32 %v3428_v20, %v1677_v33  ;;  %v3283_v33 = vld [vmem:[%s4628_s0 + $0xa8] sm:$0xff] }
 0xfed   :  { %3278 = vmatpush.xpose.msk.msra.mxu1 %vm255_vm8, %v1645_v32  ;;  %v3284_v32 = vld [vmem:[%s4628_s0 + $0xb0] sm:$0xff] }
 0xfee   :  { %1849 = vmatpush.msrb.mxu2 %v1678_v35  ;;  %1903 = vmatpush.msra.mxu0 %v3284_v32 }
 0xff0   :  { %3279 = vmatmul.msk.f32.vlgmr.msra.gmra.mxu1 %vm255_vm8, %v1612_v36  ;;  %1904 = vmatpush.msra.mxu0 %v3283_v33 }
 0xff1   :  { %1935 = vmatpush.msrb.mxu1 %v3292_v34  ;;  %v3282_v34 = vld [vmem:[%s4628_s0 + $0xa0] sm:$0xff] }
 0xff2   :  { %1905 = vmatpush.msra.mxu0 %v3282_v34 }
 0xff3   :  { %1936 = vmatpush.msrb.mxu1 %v3291_v37  ;;  %v3430_v37 = vld [vmem:[%s4635_s11 + $0x5] ss:$0 sm:$0xff] }
 0xff5   :  { %1937 = vmatpush.msrb.mxu1 %v3290_v38 }
 0xff7   :  { %1938 = vmatpush.msrb.mxu1 %v3289_v39 }
 0xff8   :  { %3294 = vmatmul.msk.f32.vlgmr.msrb.gmra.mxu1 %vm87_vm0, %v4161_v60 }
0x1000   :  { %3295 = vmatmul.msk.f32.gmra.mxu1 %vm87_vm0, %v4170_v15 }
0x1065   :  { %v1705_v41 = vpop.f32.mrf.mxu1 }
0x1066   :  { %v1706_v42 = vadd.f32 %v1705_v41, %v3800_v21 }
0x1068   :  { %v1708_v43 = vsel %vm255_vm8, %v1706_v42, -inf }
0x1069   :  { %1709 = vmax.xlane.f32.xlu1 %v1708_v43  ;;  %v3321_v43 = vld [vmem:[%s4629_s1 + $0xd0] sm:$0xff] }
0x106d   :  { %v1804_v44 = vpop.f32.mrf.mxu1 }
0x106e   :  { %v1805_v45 = vadd.f32 %v1804_v44, %v3802_v22  ;;  %v3320_v44 = vld [vmem:[%s4629_s1 + $0xc8] sm:$0xff] }
0x1070   :  { %v1807_v46 = vsel %vm255_vm8, %v1805_v45, -inf }
0x1071   :  { %1808 = vmax.xlane.f32.xlu0 %v1807_v46  ;;  %v1755_v46 = vld [vmem:[#allocation2] sm:$0xff] }
0x1075   :  { %v1940_v48 = vpop.f32.mrf.mxu1 }
0x1076   :  { %v1941_v49 = vadd.f32 %v3429_v47, %v1940_v48 }
0x1078   :  { %3304 = vmatpush.xpose.msk.msra.mxu3 %vm255_vm8, %v1941_v49  ;;  %v3431_v49 = vld [vmem:[%s4634_s10 + $0x5] ss:$0 sm:$0xff] }
0x107d   :  { %v1943_v50 = vpop.f32.mrf.mxu1 }
0x107e   :  { %v1944_v51 = vadd.f32 %v3429_v47, %v1943_v50 }
0x1080   :  { %3308 = vmatpush.xpose.msk.msra.mxu1 %vm255_vm8, %v1944_v51 }
0x10dc   :  { %v1710_v52 = vpop.xlane.xlu1 %1709 }
0x10dd   :  { %v1711_v53 = vsub.f32 %v1706_v42, %v1710_v52  ;;  %v3322_v42 = vld [vmem:[%s4629_s1 + $0xd8] sm:$0xff]  ;;  %v1854_v52 = vld [vmem:[#allocation2 + $0x8] sm:$0xff] }
0x10de   :  { %2234 = vmatpush.msrb.mxu1 %v3322_v42 }
0x10df   :  { %v1712_v54 = vmul.f32 1.442695, %v1711_v53 }
0x10e0   :  { %2235 = vmatpush.msrb.mxu1 %v3321_v43 }
0x10e1   :  { %3495 = vpow2.f32 %v1712_v54 }
0x10e2   :  { %2236 = vmatpush.msrb.mxu1 %v3320_v44 }
0x10e4   :  { %v1809_v55 = vpop.xlane.xlu0 %1808 }
0x10e5   :  { %v1810_v56 = vsub.f32 %v1805_v45, %v1809_v55  ;;  %v3319_v45 = vld [vmem:[%s4629_s1 + $0xc0] sm:$0xff] }
0x10e6   :  { %2237 = vmatpush.msrb.mxu1 %v3319_v45 }
0x10e7   :  { %v3496_v58 = vpop.eup %3495  ;;  %v1811_v59 = vmul.f32 1.442695, %v1810_v56 }
0x10e8   :  { %v1714_v61 = vsel %vm255_vm8, %v3496_v58, 0.0 }
0x10e9   :  { %3497 = vpow2.f32 %v1811_v59  ;;  %1715 = vadd.xlane.f32.xlu2 %v1714_v61 }
0x10ef   :  { %v3498_v62 = vpop.eup %3497 }
0x10f0   :  { %v1813_v63 = vsel %vm255_vm8, %v3498_v62, 0.0 }
0x10f1   :  { %1814 = vadd.xlane.f32.xlu1 %v1813_v63 }
0x115c   :  { %v1716_v0 = vpop.xlane.xlu2 %1715 }
0x115d   :  { %3499 = vrcp.f32 %v1716_v0  ;;  %v1728_v5 = vand.u32 2147483648, %v1716_v0  ;;  %v1726_v7 = vand.u32 2147483647, %v1716_v0  ;;  %vm1722_vm13 = vweird.f32 %v1716_v0 }
0x115f   :  { %v1729_v11 = vor.u32 1.1754944e-38, %v1728_v5  ;;  %vm1727_vm15 = vcmp.eq.f32.partialorder %v1726_v7, 8.507059e+37 }
0x1163   :  { %v3500_v1 = vpop.eup %3499 }
0x1164   :  { %v1718_v2 = vmul.f32 %v3500_v1, %v1716_v0  ;;  %v1815_v3 = vpop.xlane.xlu1 %1814  ;;  %vm1723_vm12 = vweird.f32 %v3500_v1 }
0x1165   :  { %3501 = vrcp.f32 %v1815_v3  ;;  %vm1724_vm14 = vmor %vm1722_vm13, %vm1723_vm12  ;;  %v1827_v19 = vand.u32 2147483648, %v1815_v3  ;;  %v1825_v20 = vand.u32 2147483647, %v1815_v3  ;;  %vm1821_vm2 = vweird.f32 %v1815_v3 }
0x1166   :  { %v1719_v4 = vsub.f32 1.0, %v1718_v2 }
0x1167   :  { %v1828_v26 = vor.u32 1.1754944e-38, %v1827_v19  ;;  %vm1826_vm5 = vcmp.eq.f32.partialorder %v1825_v20, 8.507059e+37  ;;  %v3329_v19 = vld [vmem:[%s4630_s9 + $0xd8] sm:$0xff]  ;;  %v3327_v20 = vld [vmem:[%s4630_s9 + $0xc8] sm:$0xff] }
0x1168   :  { %v1720_v6 = vmul.f32 %v3500_v1, %v1719_v4 }
0x116a   :  { %v1721_v8 = vadd.f32 %v3500_v1, %v1720_v6 }
0x116b   :  { %v3502_v9 = vpop.eup %3501 }
0x116c   :  { %v1725_v12 = vsel %vm1724_vm14, %v3500_v1, %v1721_v8  ;;  %v1817_v13 = vmul.f32 %v3502_v9, %v1815_v3  ;;  %vm1822_vm1 = vweird.f32 %v3502_v9  ;;  %v3432_v1 = vld [vmem:[%s4633_s6 + $0x6] ss:$0 sm:$0xff] }
0x116d   :  { %v1730_v14 = vsel %vm1727_vm15, %v1729_v11, %v1725_v12  ;;  %vm1823_vm3 = vmor %vm1821_vm2, %vm1822_vm1 }
0x116e   :  { %v1818_v16 = vsub.f32 1.0, %v1817_v13  ;;  %v1731_v17 = vmul.f32 %v3496_v58, %v1730_v14 }
0x1170   :  { %v1819_v57 = vmul.f32 %v3502_v9, %v1818_v16  ;;  %3276 = vmatmul.msk.f32.vlgmr.msra.gmra.mxu2 %vm255_vm8, %v1731_v17 }
0x1171   :  { %1968 = vmatpush.msra.mxu2 %v3299_v18  ;;  %v3303_v18 = vld [vmem:[%s4636_s7 + $0x28] sm:$0xff] }
0x1172   :  { %v1820_v24 = vadd.f32 %v3502_v9, %v1819_v57  ;;  %v3328_v57 = vld [vmem:[%s4630_s9 + $0xd0] sm:$0xff] }
0x1173   :  { %1969 = vmatpush.msra.mxu2 %v3298_v23  ;;  %v3326_v23 = vld [vmem:[%s4630_s9 + $0xc0] sm:$0xff] }
0x1174   :  { %v1824_v27 = vsel %vm1823_vm3, %v3502_v9, %v1820_v24 }
0x1175   :  { %v1829_v29 = vsel %vm1826_vm5, %v1828_v26, %v1824_v27  ;;  %1970 = vmatpush.msra.mxu2 %v3297_v25 }
0x1176   :  { %v1830_v30 = vmul.f32 %v3498_v62, %v1829_v29 }
0x1177   :  { %1971 = vmatpush.msra.mxu2 %v3296_v28 }
0x1178   :  { %3280 = vmatmul.msk.f32.vlgmr.msrb.gmra.mxu2 %vm255_vm8, %v1830_v30 }
0x1180   :  { %3301 = vmatmul.msk.f32.vlgmr.msra.gmra.mxu2 %vm87_vm0, %v4161_v60 }
0x1188   :  { %3302 = vmatmul.msk.f32.gmra.mxu2 %vm87_vm0, %v4170_v15 }
0x11f3   :  { %v1752_v35 = vpop.f32.mrf.mxu2 }
0x11f4   :  { %3277 = vmatmul.msk.f32.vlgmr.msrb.gmra.mxu0 %vm255_vm8, %v1752_v35 }
0x11f5   :  { %2073 = vmatpush.msrb.mxu0 %v3303_v18 }
0x11fb   :  { %v1851_v36 = vpop.f32.mrf.mxu2 }
0x11fc   :  { %3281 = vmatmul.msk.f32.vlgmr.msrb.gmra.mxu3 %vm255_vm8, %v1851_v36  ;;  %3287 = vmatmul.msk.f32.vlgmr.msra.gmra.mxu0 %vm87_vm0, %v4161_v60 }
0x1203   :  { %v1973_v38 = vpop.f32.mrf.mxu2 }
0x1204   :  { %v1974_v39 = vadd.f32 %v3430_v37, %v1973_v38  ;;  %3288 = vmatmul.msk.f32.gmra.mxu0 %vm87_vm0, %v4170_v15 }
0x1206   :  { %2049 = vmatpush.msrb.mxu3 %v1974_v39 }
0x120b   :  { %v1976_v40 = vpop.f32.mrf.mxu2 }
0x120c   :  { %v1977_v41 = vadd.f32 %v3430_v37, %v1976_v40 }
0x120e   :  { %2148 = vmatpush.msrb.mxu2 %v1977_v41 }
0x1210   :  { %2267 = vmatpush.msra.mxu2 %v3329_v19 }
0x1212   :  { %2268 = vmatpush.msra.mxu2 %v3328_v57  ;;  %v3435_v57 = vld [vmem:[%s4633_s6 + $0x7] ss:$0 sm:$0xff] }
0x1214   :  { %2269 = vmatpush.msra.mxu2 %v3327_v20 }
0x1216   :  { %2270 = vmatpush.msra.mxu2 %v3326_v23 }
0x1271   :  { %v1776_v47 = vpop.f32.mrf.mxu0 }
0x1272   :  { %v1779_v48 = vadd.f32 %v1776_v47, %v1755_v46 }
0x1274   :  { %1780 = vst.msk [vmem:[#allocation2] sm:$0xff] %vm87_vm0, %v1779_v48  ;;  %v3315_v48 = vld [vmem:[%s4628_s0 + $0xd8] sm:$0xff] }
0x1275   :  { %2201 = vmatpush.msra.mxu0 %v3315_v48 }
0x1279   :  { %v1907_v50 = vpop.f32.mrf.mxu0 }
0x127a   :  { %v1908_v51 = vadd.f32 %v3431_v49, %v1907_v50  ;;  %v3313_v50 = vld [vmem:[%s4628_s0 + $0xc8] sm:$0xff] }
0x127c   :  { %3305 = vmatmul.msk.f32.vlgmr.msra.gmra.mxu3 %vm255_vm8, %v1908_v51  ;;  %v3312_v51 = vld [vmem:[%s4628_s0 + $0xc0] sm:$0xff] }
0x127d   :  { %2172 = vmatpush.msra.mxu3 %v3303_v18 }
0x127f   :  { %v1875_v53 = vpop.f32.mrf.mxu3 }
0x1280   :  { %v1878_v54 = vadd.f32 %v1875_v53, %v1854_v52 }
0x1281   :  { %v1910_v55 = vpop.f32.mrf.mxu0 }
0x1282   :  { %1879 = vst.msk [vmem:[#allocation2 + $0x8] sm:$0xff] %vm87_vm0, %v1878_v54  ;;  %v1911_v56 = vadd.f32 %v3431_v49, %v1910_v55  ;;  %v3314_v49 = vld [vmem:[%s4628_s0 + $0xd0] sm:$0xff]  ;;  %v3433_v54 = vld [vmem:[%s4635_s11 + $0x6] ss:$0 sm:$0xff] }
0x1283   :  { %2202 = vmatpush.msra.mxu0 %v3314_v49 }
0x1284   :  { %3309 = vmatmul.msk.f32.vlgmr.msra.gmra.mxu1 %vm255_vm8, %v1911_v56 }
0x1285   :  { %2203 = vmatpush.msra.mxu0 %v3313_v50 }
0x1287   :  { %2204 = vmatpush.msra.mxu0 %v3312_v51 }
0x128c   :  { %3324 = vmatmul.msk.f32.vlgmr.msrb.gmra.mxu1 %vm87_vm0, %v4161_v60 }
0x1294   :  { %3325 = vmatmul.msk.f32.gmra.mxu1 %vm87_vm0, %v4170_v15 }
0x12ff   :  { %v2004_v58 = vpop.f32.mrf.mxu3 }
0x1300   :  { %v2005_v59 = vadd.f32 %v2004_v58, %v3800_v21 }
0x1301   :  { %v2103_v61 = vpop.f32.mrf.mxu1 }
0x1302   :  { %v2104_v62 = vadd.f32 %v2103_v61, %v3802_v22  ;;  %v2007_v63 = vsel %vm255_vm8, %v2005_v59, -inf  ;;  %v3352_v61 = vld [vmem:[%s4629_s1 + $0xf8] sm:$0xff] }
0x1303   :  { %2008 = vmax.xlane.f32.xlu2 %v2007_v63  ;;  %v3350_v63 = vld [vmem:[%s4629_s1 + $0xe8] sm:$0xff] }
0x1304   :  { %v2106_v0 = vsel %vm255_vm8, %v2104_v62, -inf }
0x1305   :  { %2107 = vmax.xlane.f32.xlu1 %v2106_v0  ;;  %v3349_v0 = vld [vmem:[%s4629_s1 + $0xe0] sm:$0xff] }
0x1309   :  { %v2239_v2 = vpop.f32.mrf.mxu1 }
0x130a   :  { %v4290_v3 = vadd.f32 %v3432_v1, %v2239_v2 }
0x1311   :  { %v2242_v4 = vpop.f32.mrf.mxu1 }
0x1312   :  { %v2243_v5 = vadd.f32 %v3432_v1, %v2242_v4  ;;  %v2054_v1 = vld [vmem:[#allocation2] sm:$0xff] }
0x1313   :  { %v3434_v4 = vld [vmem:[%s4634_s10 + $0x6] ss:$0 sm:$0xff] }
0x1314   :  { %3338 = vmatpush.xpose.msk.msra.mxu1 %vm255_vm8, %v2243_v5  ;;  %v2153_v5 = vld [vmem:[#allocation2 + $0x8] sm:$0xff] }
0x1318   :  { %2533 = vmatpush.msrb.mxu1 %v3352_v61 }
0x1376   :  { %v2009_v6 = vpop.xlane.xlu2 %2008 }
0x1377   :  { %v2010_v7 = vsub.f32 %v2005_v59, %v2009_v6 }
0x1378   :  { %v2108_v8 = vpop.xlane.xlu1 %2107 }
0x1379   :  { %v2011_v9 = vmul.f32 1.442695, %v2010_v7  ;;  %v2109_v11 = vsub.f32 %v2104_v62, %v2108_v8  ;;  %v3351_v62 = vld [vmem:[%s4629_s1 + $0xf0] sm:$0xff] }
0x137a   :  { %2534 = vmatpush.msrb.mxu1 %v3351_v62 }
0x137b   :  { %3503 = vpow2.f32 %v2011_v9  ;;  %v2110_v12 = vmul.f32 1.442695, %v2109_v11 }
0x137c   :  { %2535 = vmatpush.msrb.mxu1 %v3350_v63 }
0x137d   :  { %3505 = vpow2.f32 %v2110_v12 }
0x137e   :  { %2536 = vmatpush.msrb.mxu1 %v3349_v0 }
0x1381   :  { %v3504_v13 = vpop.eup %3503 }
0x1382   :  { %v2013_v14 = vsel %vm255_vm8, %v3504_v13, 0.0 }
0x1383   :  { %v3506_v16 = vpop.eup %3505  ;;  %2014 = vadd.xlane.f32.xlu0 %v2013_v14 }
0x1384   :  { %v2112_v17 = vsel %vm255_vm8, %v3506_v16, 0.0 }
0x1385   :  { %2113 = vadd.xlane.f32.xlu2 %v2112_v17 }
0x13f6   :  { %v2015_v24 = vpop.xlane.xlu0 %2014 }
0x13f7   :  { %3507 = vrcp.f32 %v2015_v24  ;;  %v2027_v31 = vand.u32 2147483648, %v2015_v24  ;;  %v2025_v33 = vand.u32 2147483647, %v2015_v24  ;;  %vm2021_vm7 = vweird.f32 %v2015_v24 }
0x13f8   :  { %v2114_v25 = vpop.xlane.xlu2 %2113 }
0x13f9   :  { %3509 = vrcp.f32 %v2114_v25  ;;  %v2126_v35 = vand.u32 2147483648, %v2114_v25  ;;  %v2124_v38 = vand.u32 2147483647, %v2114_v25  ;;  %v2028_v39 = vor.u32 1.1754944e-38, %v2027_v31 }
0x13fa   :  { %vm2026_vm11 = vcmp.eq.f32.partialorder %v2025_v33, 8.507059e+37  ;;  %vm2120_vm12 = vweird.f32 %v2114_v25 }
0x13fb   :  { %v2127_v43 = vor.u32 1.1754944e-38, %v2126_v35  ;;  %vm2125_vm14 = vcmp.eq.f32.partialorder %v2124_v38, 8.507059e+37  ;;  %v3358_v38 = vld [vmem:[%s4630_s9 + $0xf0] sm:$0xff] }
0x13fd   :  { %v3508_v26 = vpop.eup %3507 }
0x13fe   :  { %v2017_v27 = vmul.f32 %v3508_v26, %v2015_v24  ;;  %vm2022_vm6 = vweird.f32 %v3508_v26 }
0x13ff   :  { %v3510_v28 = vpop.eup %3509  ;;  %vm2023_vm10 = vmor %vm2021_vm7, %vm2022_vm6 }
0x1400   :  { %v2018_v29 = vsub.f32 1.0, %v2017_v27  ;;  %v2116_v30 = vmul.f32 %v3510_v28, %v2114_v25  ;;  %vm2121_vm9 = vweird.f32 %v3510_v28 }
0x1401   :  { %vm2122_vm13 = vmor %vm2120_vm12, %vm2121_vm9 }
0x1402   :  { %v2019_v32 = vmul.f32 %v3508_v26, %v2018_v29  ;;  %v2117_v34 = vsub.f32 1.0, %v2116_v30 }
0x1404   :  { %v2020_v36 = vadd.f32 %v3508_v26, %v2019_v32  ;;  %v2118_v37 = vmul.f32 %v3510_v28, %v2117_v34 }
0x1406   :  { %v2024_v40 = vsel %vm2023_vm10, %v3508_v26, %v2020_v36  ;;  %v2119_v41 = vadd.f32 %v3510_v28, %v2118_v37  ;;  %v3333_v36 = vld [vmem:[%s4636_s7 + $0x30] sm:$0xff]  ;;  %v3359_v37 = vld [vmem:[%s4630_s9 + $0xf8] sm:$0xff] }
0x1407   :  { %v2029_v42 = vsel %vm2026_vm11, %v2028_v39, %v2024_v40  ;;  %v3357_v39 = vld [vmem:[%s4630_s9 + $0xe8] sm:$0xff]  ;;  %v3356_v40 = vld [vmem:[%s4630_s9 + $0xe0] sm:$0xff] }
0x1408   :  { %v2123_v44 = vsel %vm2122_vm13, %v3510_v28, %v2119_v41  ;;  %v2030_v45 = vmul.f32 %v3504_v13, %v2029_v42 }
0x1409   :  { %v2128_v46 = vsel %vm2125_vm14, %v2127_v43, %v2123_v44 }
0x140a   :  { %3306 = vmatmul.msk.f32.vlgmr.msrb.gmra.mxu3 %vm255_vm8, %v2030_v45  ;;  %v2129_v47 = vmul.f32 %v3506_v16, %v2128_v46 }
0x140b   :  { %3334 = vmatpush.xpose.msk.msrb.mxu3 %vm255_vm8, %v4290_v3 }
0x140c   :  { %3310 = vmatmul.msk.f32.vlgmr.msrb.gmra.mxu2 %vm255_vm8, %v2129_v47 }
0x1414   :  { %3331 = vmatmul.msk.f32.vlgmr.msra.gmra.mxu2 %vm87_vm0, %v4161_v60 }
0x141c   :  { %3332 = vmatmul.msk.f32.gmra.mxu2 %vm87_vm0, %v4170_v15 }
0x148d   :  { %v2051_v52 = vpop.f32.mrf.mxu3 }
0x148e   :  { %3307 = vmatmul.msk.f32.vlgmr.msrb.gmra.mxu0 %vm255_vm8, %v2051_v52 }
0x148f   :  { %v2150_v53 = vpop.f32.mrf.mxu2  ;;  %2372 = vmatpush.msrb.mxu0 %v3333_v36 }
0x1490   :  { %3311 = vmatmul.msk.f32.vlgmr.msra.gmra.mxu3 %vm255_vm8, %v2150_v53 }
0x1496   :  { %3317 = vmatmul.msk.f32.vlgmr.msra.gmra.mxu0 %vm87_vm0, %v4161_v60 }
0x1497   :  { %v2272_v55 = vpop.f32.mrf.mxu2 }
0x1498   :  { %v2273_v56 = vadd.f32 %v3433_v54, %v2272_v55 }
0x149a   :  { %2348 = vmatpush.msra.mxu3 %v2273_v56 }
0x149e   :  { %3318 = vmatmul.msk.f32.gmra.mxu0 %vm87_vm0, %v4170_v15 }
0x149f   :  { %v2275_v58 = vpop.f32.mrf.mxu2 }
0x14a0   :  { %v2276_v59 = vadd.f32 %v3433_v54, %v2275_v58 }
0x14a2   :  { %2447 = vmatpush.msrb.mxu2 %v2276_v59 }
0x14a4   :  { %2566 = vmatpush.msra.mxu2 %v3359_v37 }
0x14a6   :  { %2567 = vmatpush.msra.mxu2 %v3358_v38 }
0x14a8   :  { %2568 = vmatpush.msra.mxu2 %v3357_v39 }
0x14aa   :  { %2569 = vmatpush.msra.mxu2 %v3356_v40 }
0x150b   :  { %v2075_v2 = vpop.f32.mrf.mxu0 }
0x150c   :  { %v2078_v3 = vadd.f32 %v2075_v2, %v2054_v1 }
0x150e   :  { %2079 = vst.msk [vmem:[#allocation2] sm:$0xff] %vm87_vm0, %v2078_v3  ;;  %v3345_v3 = vld [vmem:[%s4628_s0 + $0xf8] sm:$0xff] }
0x150f   :  { %2500 = vmatpush.msra.mxu0 %v3345_v3 }
0x1513   :  { %v2174_v6 = vpop.f32.mrf.mxu3  ;;  %v2206_v7 = vpop.f32.mrf.mxu0 }
0x1514   :  { %v2177_v8 = vadd.f32 %v2174_v6, %v2153_v5  ;;  %v2207_v9 = vadd.f32 %v3434_v4, %v2206_v7  ;;  %v3343_v5 = vld [vmem:[%s4628_s0 + $0xe8] sm:$0xff]  ;;  %v3342_v6 = vld [vmem:[%s4628_s0 + $0xe0] sm:$0xff] }
0x1516   :  { %2178 = vst.msk [vmem:[#allocation2 + $0x8] sm:$0xff] %vm87_vm0, %v2177_v8  ;;  %3335 = vmatmul.msk.f32.vlgmr.msrb.gmra.mxu3 %vm255_vm8, %v2207_v9  ;;  %v3436_v9 = vld [vmem:[%s4635_s11 + $0x7] ss:$0 sm:$0xff] }
0x1517   :  { %2471 = vmatpush.msrb.mxu3 %v3333_v36 }
0x151b   :  { %v2209_v11 = vpop.f32.mrf.mxu0 }
0x151c   :  { %v2210_v12 = vadd.f32 %v3434_v4, %v2209_v11  ;;  %v3344_v4 = vld [vmem:[%s4628_s0 + $0xf0] sm:$0xff]  ;;  %s4639_s0 = sld [smem:[#allocation15_spill]] }
0x151d   :  { %2501 = vmatpush.msra.mxu0 %v3344_v4 }
0x151e   :  { %3339 = vmatmul.msk.f32.vlgmr.msra.gmra.mxu1 %vm255_vm8, %v2210_v12 }
0x151f   :  { %2502 = vmatpush.msra.mxu0 %v3343_v5 }
0x1521   :  { %2503 = vmatpush.msra.mxu0 %v3342_v6 }
0x1526   :  { %3354 = vmatmul.msk.f32.vlgmr.msrb.gmra.mxu1 %vm87_vm0, %v4161_v60 }
0x152e   :  { %3355 = vmatmul.msk.f32.gmra.mxu1 %vm87_vm0, %v4170_v15 }
0x1599   :  { %v2303_v13 = vpop.f32.mrf.mxu3 }
0x159a   :  { %v2304_v14 = vadd.f32 %v2303_v13, %v3800_v21 }
0x159b   :  { %v2402_v16 = vpop.f32.mrf.mxu1 }
0x159c   :  { %v2403_v17 = vadd.f32 %v2402_v16, %v3802_v22  ;;  %v2306_v18 = vsel %vm255_vm8, %v2304_v14, -inf  ;;  %v2353_v16 = vld [vmem:[#allocation2] sm:$0xff] }
0x159d   :  { %2307 = vmax.xlane.f32.xlu0 %v2306_v18 }
0x159e   :  { %v2405_v19 = vsel %vm255_vm8, %v2403_v17, -inf }
0x159f   :  { %2406 = vmax.xlane.f32.xlu2 %v2405_v19  ;;  %v3437_v19 = vld [vmem:[%s4634_s10 + $0x7] ss:$0 sm:$0xff] }
0x15a3   :  { %v2538_v20 = vpop.f32.mrf.mxu1 }
0x15a4   :  { %v4369_v23 = vadd.f32 %v3435_v57, %v2538_v20 }
0x15ab   :  { %v2541_v24 = vpop.f32.mrf.mxu1 }
0x15ac   :  { %v2542_v25 = vadd.f32 %v3435_v57, %v2541_v24  ;;  %v2452_v57 = vld [vmem:[#allocation2 + $0x8] sm:$0xff] }
0x15ae   :  { %3368 = vmatpush.xpose.msk.msra.mxu1 %vm255_vm8, %v2542_v25 }
0x1610   :  { %v2308_v26 = vpop.xlane.xlu0 %2307 }
0x1611   :  { %v2309_v27 = vsub.f32 %v2304_v14, %v2308_v26 }
0x1612   :  { %v2407_v28 = vpop.xlane.xlu2 %2406 }
0x1613   :  { %v2310_v29 = vmul.f32 1.442695, %v2309_v27  ;;  %v2408_v30 = vsub.f32 %v2403_v17, %v2407_v28 }
0x1615   :  { %3511 = vpow2.f32 %v2310_v29  ;;  %v2409_v31 = vmul.f32 1.442695, %v2408_v30 }
0x1617   :  { %3513 = vpow2.f32 %v2409_v31 }
0x161b   :  { %v3512_v32 = vpop.eup %3511 }
0x161c   :  { %v2312_v33 = vsel %vm255_vm8, %v3512_v32, 0.0 }
0x161d   :  { %v3514_v34 = vpop.eup %3513  ;;  %2313 = vadd.xlane.f32.xlu1 %v2312_v33 }
0x161e   :  { %v2411_v35 = vsel %vm255_vm8, %v3514_v34, 0.0 }
0x161f   :  { %2412 = vadd.xlane.f32.xlu0 %v2411_v35 }
0x1690   :  { %v2314_v41 = vpop.xlane.xlu1 %2313 }
0x1691   :  { %3515 = vrcp.f32 %v2314_v41  ;;  %v2326_v48 = vand.u32 2147483648, %v2314_v41  ;;  %v2324_v50 = vand.u32 2147483647, %v2314_v41  ;;  %vm2320_vm1 = vweird.f32 %v2314_v41 }
0x1692   :  { %v2413_v42 = vpop.xlane.xlu0 %2412 }
0x1693   :  { %3517 = vrcp.f32 %v2413_v42  ;;  %v2425_v52 = vand.u32 2147483648, %v2413_v42  ;;  %v2423_v55 = vand.u32 2147483647, %v2413_v42  ;;  %v2327_v56 = vor.u32 1.1754944e-38, %v2326_v48 }
0x1694   :  { %vm2325_vm5 = vcmp.eq.f32.partialorder %v2324_v50, 8.507059e+37  ;;  %vm2419_vm6 = vweird.f32 %v2413_v42 }
0x1695   :  { %v2426_v62 = vor.u32 1.1754944e-38, %v2425_v52  ;;  %vm2424_vm9 = vcmp.eq.f32.partialorder %v2423_v55, 8.507059e+37 }
0x1697   :  { %v3516_v43 = vpop.eup %3515 }
0x1698   :  { %v2316_v44 = vmul.f32 %v3516_v43, %v2314_v41  ;;  %vm2321_vm15 = vweird.f32 %v3516_v43 }
0x1699   :  { %v3518_v45 = vpop.eup %3517  ;;  %vm2322_vm3 = vmor %vm2320_vm1, %vm2321_vm15 }
0x169a   :  { %v2317_v46 = vsub.f32 1.0, %v2316_v44  ;;  %v2415_v47 = vmul.f32 %v3518_v45, %v2413_v42  ;;  %vm2420_vm2 = vweird.f32 %v3518_v45  ;;  %v3363_v42 = vld [vmem:[%s4636_s7 + $0x38] sm:$0xff] }
0x169b   :  { %vm2421_vm7 = vmor %vm2419_vm6, %vm2420_vm2 }
0x169c   :  { %v2318_v49 = vmul.f32 %v3516_v43, %v2317_v46  ;;  %v2416_v51 = vsub.f32 1.0, %v2415_v47 }
0x169e   :  { %v2319_v53 = vadd.f32 %v3516_v43, %v2318_v49  ;;  %v2417_v54 = vmul.f32 %v3518_v45, %v2416_v51 }
0x16a0   :  { %v2323_v58 = vsel %vm2322_vm3, %v3516_v43, %v2319_v53  ;;  %v2418_v59 = vadd.f32 %v3518_v45, %v2417_v54 }
0x16a1   :  { %v2328_v61 = vsel %vm2325_vm5, %v2327_v56, %v2323_v58 }
0x16a2   :  { %v2422_v63 = vsel %vm2421_vm7, %v3518_v45, %v2418_v59  ;;  %v2329_v0 = vmul.f32 %v3512_v32, %v2328_v61 }
0x16a3   :  { %v2427_v1 = vsel %vm2424_vm9, %v2426_v62, %v2422_v63 }
0x16a4   :  { %3336 = vmatmul.msk.f32.vlgmr.msra.gmra.mxu3 %vm255_vm8, %v2329_v0  ;;  %v2428_v2 = vmul.f32 %v3514_v34, %v2427_v1 }
0x16a5   :  { %3364 = vmatpush.xpose.msk.msra.mxu3 %vm255_vm8, %v4369_v23 }
0x16a6   :  { %3340 = vmatmul.msk.f32.vlgmr.msrb.gmra.mxu2 %vm255_vm8, %v2428_v2 }
0x16ae   :  { %3361 = vmatmul.msk.f32.vlgmr.msra.gmra.mxu2 %vm87_vm0, %v4161_v60 }
0x16b6   :  { %3362 = vmatmul.msk.f32.gmra.mxu2 %vm87_vm0, %v4170_v15 }
0x1727   :  { %v2350_v7 = vpop.f32.mrf.mxu3 }
0x1728   :  { %3337 = vmatmul.msk.f32.vlgmr.msrb.gmra.mxu0 %vm255_vm8, %v2350_v7 }
0x1729   :  { %v2449_v8 = vpop.f32.mrf.mxu2  ;;  %2671 = vmatpush.msrb.mxu0 %v3363_v42 }
0x172a   :  { %3341 = vmatmul.msk.f32.vlgmr.msrb.gmra.mxu3 %vm255_vm8, %v2449_v8 }
0x1730   :  { %3347 = vmatmul.msk.f32.vlgmr.msra.gmra.mxu0 %vm87_vm0, %v4161_v60 }
0x1731   :  { %v2571_v11 = vpop.f32.mrf.mxu2 }
0x1732   :  { %v2572_v12 = vadd.f32 %v3436_v9, %v2571_v11  ;;  %v3438_v11 = vld [vmem:[%s4588_s12 + $0x1] ss:$0 sm:$0xff] }
0x1734   :  { %2647 = vmatpush.msrb.mxu3 %v2572_v12 }
0x1738   :  { %3348 = vmatmul.msk.f32.gmra.mxu0 %vm87_vm0, %v4170_v15 }
0x1739   :  { %v2574_v13 = vpop.f32.mrf.mxu2 }
0x173a   :  { %v2575_v14 = vadd.f32 %v3436_v9, %v2574_v13 }
0x173c   :  { %2746 = vmatpush.msrb.mxu2 %v2575_v14 }
0x17a5   :  { %v2374_v17 = vpop.f32.mrf.mxu0 }
0x17a6   :  { %v2377_v18 = vadd.f32 %v2374_v17, %v2353_v16 }
0x17a8   :  { %2378 = vst.msk [vmem:[#allocation2] sm:$0xff] %vm87_vm0, %v2377_v18 }
0x17ad   :  { %v2473_v20 = vpop.f32.mrf.mxu3  ;;  %v2505_v23 = vpop.f32.mrf.mxu0 }
0x17ae   :  { %v2476_v24 = vadd.f32 %v2473_v20, %v2452_v57  ;;  %v2506_v25 = vadd.f32 %v3437_v19, %v2505_v23 }
0x17af   :  { %v2652_v7 = vld [vmem:[#allocation2] sm:$0xff] }
0x17b0   :  { %2477 = vst.msk [vmem:[#allocation2 + $0x8] sm:$0xff] %vm87_vm0, %v2476_v24  ;;  %3365 = vmatmul.msk.f32.vlgmr.msra.gmra.mxu3 %vm255_vm8, %v2506_v25 }
0x17b1   :  { %2770 = vmatpush.msra.mxu3 %v3363_v42 }
0x17b5   :  { %v2508_v26 = vpop.f32.mrf.mxu0 }
0x17b6   :  { %v2509_v27 = vadd.f32 %v3437_v19, %v2508_v26 }
0x17b7   :  { %v2751_v12 = vld [vmem:[#allocation2 + $0x8] sm:$0xff] }
0x17b8   :  { %3369 = vmatmul.msk.f32.vlgmr.msra.gmra.mxu1 %vm255_vm8, %v2509_v27 }
0x1833   :  { %v2602_v28 = vpop.f32.mrf.mxu3 }
0x1834   :  { %v2603_v29 = vadd.f32 %v2602_v28, %v3800_v21 }
0x1835   :  { %v2701_v30 = vpop.f32.mrf.mxu1 }
0x1836   :  { %v2702_v31 = vadd.f32 %v2701_v30, %v3802_v22  ;;  %v2605_v32 = vsel %vm255_vm8, %v2603_v29, -inf }
0x1837   :  { %2606 = vmax.xlane.f32.xlu1 %v2605_v32 }
0x1838   :  { %v2704_v33 = vsel %vm255_vm8, %v2702_v31, -inf }
0x1839   :  { %2705 = vmax.xlane.f32.xlu2 %v2704_v33 }
0x18aa   :  { %v2607_v34 = vpop.xlane.xlu1 %2606 }
0x18ab   :  { %v2608_v35 = vsub.f32 %v2603_v29, %v2607_v34  ;;  %v3377_v34 = vld [vmem:[%s4592_s15 + $0x30] sm:$0xff] }
0x18ac   :  { %v2706_v36 = vpop.xlane.xlu2 %2705 }
0x18ad   :  { %v2609_v37 = vmul.f32 1.442695, %v2608_v35  ;;  %v2707_v38 = vsub.f32 %v2702_v31, %v2706_v36  ;;  %v3376_v35 = vld [vmem:[%s4592_s15 + $0x28] sm:$0xff]  ;;  %v3375_v36 = vld [vmem:[%s4592_s15 + $0x20] sm:$0xff] }
0x18af   :  { %3519 = vpow2.f32 %v2609_v37  ;;  %v2708_v39 = vmul.f32 1.442695, %v2707_v38 }
0x18b1   :  { %3521 = vpow2.f32 %v2708_v39 }
0x18b5   :  { %v3520_v40 = vpop.eup %3519 }
0x18b6   :  { %v2611_v21 = vsel %vm255_vm8, %v3520_v40, 0.0 }
0x18b7   :  { %v3522_v41 = vpop.eup %3521  ;;  %2612 = vadd.xlane.f32.xlu0 %v2611_v21 }
0x18b8   :  { %v2710_v22 = vsel %vm255_vm8, %v3522_v41, 0.0 }
0x18b9   :  { %2711 = vadd.xlane.f32.xlu1 %v2710_v22 }
0x192a   :  { %v2613_v43 = vpop.xlane.xlu0 %2612 }
0x192b   :  { %3523 = vrcp.f32 %v2613_v43  ;;  %v2625_v50 = vand.u32 2147483648, %v2613_v43  ;;  %v2623_v52 = vand.u32 2147483647, %v2613_v43  ;;  %vm2619_vm11 = vweird.f32 %v2613_v43 }
0x192c   :  { %v2712_v44 = vpop.xlane.xlu1 %2711 }
0x192d   :  { %3525 = vrcp.f32 %v2712_v44  ;;  %v2724_v54 = vand.u32 2147483648, %v2712_v44  ;;  %v2722_v58 = vand.u32 2147483647, %v2712_v44  ;;  %v2626_v59 = vor.u32 1.1754944e-38, %v2625_v50 }
0x192e   :  { %vm2624_vm14 = vcmp.eq.f32.partialorder %v2623_v52, 8.507059e+37  ;;  %vm2718_vm15 = vweird.f32 %v2712_v44  ;;  %v3440_v52 = vld [vmem:[%s4590_s14 + $0x1] ss:$0 sm:$0xff] }
0x192f   :  { %v2725_v0 = vor.u32 1.1754944e-38, %v2724_v54  ;;  %vm2723_vm2 = vcmp.eq.f32.partialorder %v2722_v58, 8.507059e+37 }
0x1931   :  { %v3524_v45 = vpop.eup %3523 }
0x1932   :  { %v2615_v46 = vmul.f32 %v3524_v45, %v2613_v43  ;;  %vm2620_vm10 = vweird.f32 %v3524_v45 }
0x1933   :  { %v3526_v47 = vpop.eup %3525  ;;  %vm2621_vm13 = vmor %vm2619_vm11, %vm2620_vm10 }
0x1934   :  { %v2616_v48 = vsub.f32 1.0, %v2615_v46  ;;  %v2714_v49 = vmul.f32 %v3526_v47, %v2712_v44  ;;  %vm2719_vm12 = vweird.f32 %v3526_v47 }
0x1935   :  { %vm2720_vm1 = vmor %vm2718_vm15, %vm2719_vm12 }
0x1936   :  { %v2617_v51 = vmul.f32 %v3524_v45, %v2616_v48  ;;  %v2715_v53 = vsub.f32 1.0, %v2714_v49  ;;  %v3439_v49 = vld [vmem:[%s4589_s13 + $0x1] ss:$0 sm:$0xff] }
0x1938   :  { %v2618_v55 = vadd.f32 %v3524_v45, %v2617_v51  ;;  %v2716_v56 = vmul.f32 %v3526_v47, %v2715_v53 }
0x193a   :  { %v2622_v61 = vsel %vm2621_vm13, %v3524_v45, %v2618_v55  ;;  %v2717_v62 = vadd.f32 %v3526_v47, %v2716_v56 }
0x193b   :  { %v2627_v63 = vsel %vm2624_vm14, %v2626_v59, %v2622_v61 }
0x193c   :  { %v2628_v1 = vmul.f32 %v3520_v40, %v2627_v63  ;;  %v2721_v2 = vsel %vm2720_vm1, %v3526_v47, %v2717_v62 }
0x193d   :  { %v2726_v3 = vsel %vm2723_vm2, %v2725_v0, %v2721_v2  ;;  %v3388_v2 = vld [vmem:[%s4594_s17 + $0x70] sm:$0xff] }
0x193e   :  { %v2727_v4 = vmul.f32 %v3522_v41, %v2726_v3  ;;  %3366 = vmatmul.msk.f32.vlgmr.msrb.gmra.mxu3 %vm255_vm8, %v2628_v1  ;;  %v3389_v1 = vld [vmem:[%s4594_s17 + $0x78] sm:$0xff]  ;;  %v3387_v3 = vld [vmem:[%s4594_s17 + $0x68] sm:$0xff] }
0x193f   :  { %2931 = vmatpush.msrb.mxu1 %v3389_v1 }
0x1940   :  { %3370 = vmatmul.msk.f32.vlgmr.msrb.gmra.mxu2 %vm255_vm8, %v2727_v4  ;;  %v3386_v4 = vld [vmem:[%s4594_s17 + $0x60] sm:$0xff] }
0x1941   :  { %2932 = vmatpush.msrb.mxu1 %v3388_v2 }
0x1943   :  { %2933 = vmatpush.msrb.mxu1 %v3387_v3 }
0x1945   :  { %2934 = vmatpush.msrb.mxu1 %v3386_v4 }
0x19c1   :  { %v2649_v5 = vpop.f32.mrf.mxu3 }
0x19c2   :  { %3367 = vmatmul.msk.f32.vlgmr.msrb.gmra.mxu0 %vm255_vm8, %v2649_v5  ;;  %v3385_v5 = vld [vmem:[%s4594_s17 + $0x58] sm:$0xff] }
0x19c3   :  { %v2748_v6 = vpop.f32.mrf.mxu2  ;;  %2935 = vmatpush.msrb.mxu1 %v3385_v5 }
0x19c4   :  { %3371 = vmatmul.msk.f32.vlgmr.msra.gmra.mxu3 %vm255_vm8, %v2748_v6  ;;  %v3384_v6 = vld [vmem:[%s4594_s17 + $0x50] sm:$0xff] }
0x19c5   :  { %2936 = vmatpush.msrb.mxu1 %v3384_v6  ;;  %v3443_v6 = vld [vmem:[%s4595_s19 + $0x1] ss:$0 sm:$0xff] }
0x1a3f   :  { %v2673_v8 = vpop.f32.mrf.mxu0 }
0x1a40   :  { %v2676_v9 = vadd.f32 %v2673_v8, %v2652_v7  ;;  %v3383_v7 = vld [vmem:[%s4594_s17 + $0x48] sm:$0xff]  ;;  %v3382_v8 = vld [vmem:[%s4594_s17 + $0x40] sm:$0xff] }
0x1a41   :  { %2937 = vmatpush.msrb.mxu1 %v3383_v7 }
0x1a42   :  { %2677 = vst.msk [vmem:[#allocation2] sm:$0xff] %vm87_vm0, %v2676_v9  ;;  %v3441_v9 = vld [vmem:[%s4591_s16 + $0x1] ss:$0 sm:$0xff] }
0x1a43   :  { %2938 = vmatpush.msrb.mxu1 %v3382_v8 }
0x1a47   :  { %v2772_v13 = vpop.f32.mrf.mxu3 }
0x1a48   :  { %v2775_v14 = vadd.f32 %v2772_v13, %v2751_v12 }
0x1a49   :  { %v2777_v16 = vld [vmem:[#allocation2] sm:$0xff] }
0x1a4a   :  { %2776 = vst.msk [vmem:[#allocation2 + $0x8] sm:$0xff] %vm87_vm0, %v2775_v14  ;;  %v2784_v17 = vadd.f32 %v3438_v11, %v2777_v16 }
0x1a4c   :  { %v2786_v18 = vadd.f32 %v2784_v17, %v4161_v60 }
0x1a4e   :  { %v2792_v19 = vsel %vm87_vm0, %v2786_v18, 0.0 }
0x1a4f   :  { %2793 = vadd.xlane.f32.xlu2 %v2792_v19 }
0x1a51   :  { %v2778_v57 = vld [vmem:[#allocation2 + $0x8] sm:$0xff] }
0x1a52   :  { %v2785_v20 = vadd.f32 %v3438_v11, %v2778_v57 }
0x1a54   :  { %v2787_v23 = vadd.f32 %v2785_v20, %v4170_v15  ;;  %v3378_v15 = vld [vmem:[%s4592_s15 + $0x38] sm:$0xff] }
0x1a55   :  { %2874 = vmatpush.msra.mxu0 %v3378_v15  ;;  %v3442_v15 = vld [vmem:[%s4593_s18 + $0x1] ss:$0 sm:$0xff] }
0x1a56   :  { %v2795_v24 = vsel %vm87_vm0, %v2787_v23, 0.0 }
0x1a57   :  { %2796 = vadd.xlane.f32.xlu0 %v2795_v24  ;;  %2875 = vmatpush.msra.mxu0 %v3377_v34 }
0x1a59   :  { %2876 = vmatpush.msra.mxu0 %v3376_v35 }
0x1a5b   :  { %2877 = vmatpush.msra.mxu0 %v3375_v36 }
0x1ac2   :  { %v2794_v25 = vpop.xlane.xlu2 %2793 }
0x1ac3   :  { %v2798_v26 = vmul.f32 %v2794_v25, %v3689_v10 }
0x1ac5   :  { %v2800_v27 = vsub.f32 %v2786_v18, %v2798_v26 }
0x1ac7   :  { %v2802_v28 = vmul.f32 %v2800_v27, %v2800_v27 }
0x1ac9   :  { %v2804_v29 = vsel %vm87_vm0, %v2802_v28, 0.0 }
0x1aca   :  { %v2797_v30 = vpop.xlane.xlu0 %2796  ;;  %2805 = vadd.xlane.f32.xlu1 %v2804_v29 }
0x1acb   :  { %v2799_v60 = vmul.f32 %v2797_v30, %v3689_v10 }
0x1acd   :  { %v2801_v31 = vsub.f32 %v2787_v23, %v2799_v60 }
0x1acf   :  { %v2803_v32 = vmul.f32 %v2801_v31, %v2801_v31 }
0x1ad1   :  { %v2807_v33 = vsel %vm87_vm0, %v2803_v32, 0.0 }
0x1ad2   :  { %2808 = vadd.xlane.f32.xlu2 %v2807_v33 }
0x1b3d   :  { %v2806_v37 = vpop.xlane.xlu1 %2805 }
0x1b3e   :  { %v2810_v38 = vmul.f32 %v2806_v37, %v3689_v10 }
0x1b40   :  { %v2812_v39 = vadd.f32 1e-12, %v2810_v38 }
0x1b42   :  { %3527 = vrsqrt.f32 %v2812_v39  ;;  %vm2820_vm3 = vweird.f32 %v2812_v39 }
0x1b45   :  { %v2809_v40 = vpop.xlane.xlu2 %2808 }
0x1b46   :  { %v2811_v21 = vmul.f32 %v2809_v40, %v3689_v10 }
0x1b48   :  { %v3528_v41 = vpop.eup %3527  ;;  %v2813_v22 = vadd.f32 1e-12, %v2811_v21 }
0x1b49   :  { %v2815_v42 = vmul.f32 %v3528_v41, %v2812_v39  ;;  %vm2821_vm8 = vweird.f32 %v3528_v41 }
0x1b4a   :  { %3529 = vrsqrt.f32 %v2813_v22  ;;  %vm2822_vm5 = vmor %vm2820_vm3, %vm2821_vm8  ;;  %vm2830_vm7 = vweird.f32 %v2813_v22 }
0x1b4b   :  { %v2816_v43 = vmul.f32 %v3528_v41, %v2815_v42 }
0x1b4d   :  { %v2817_v44 = vmul.f32 0.5, %v2816_v43 }
0x1b4f   :  { %v2818_v45 = vsub.f32 1.5, %v2817_v44 }
0x1b50   :  { %v3530_v46 = vpop.eup %3529 }
0x1b51   :  { %v2819_v47 = vmul.f32 %v3528_v41, %v2818_v45  ;;  %v2825_v48 = vmul.f32 %v3530_v46, %v2813_v22  ;;  %vm2831_vm6 = vweird.f32 %v3530_v46 }
0x1b52   :  { %vm2832_vm9 = vmor %vm2830_vm7, %vm2831_vm6 }
0x1b53   :  { %v2823_v50 = vsel %vm2822_vm5, %v3528_v41, %v2819_v47  ;;  %v2826_v51 = vmul.f32 %v3530_v46, %v2825_v48 }
0x1b54   :  { %v2834_v53 = vmul.f32 %v2823_v50, %v2800_v27  ;;  %v3009_v50 = vld [vmem:[%s4597_s21 + $0x18] sm:$0xff] }
0x1b55   :  { %v2827_v54 = vmul.f32 0.5, %v2826_v51  ;;  %3026 = vmatpush.msra.mxu2 %v3009_v50  ;;  %v3008_v51 = vld [vmem:[%s4597_s21 + $0x10] sm:$0xff] }
0x1b56   :  { %v2839_v55 = vmul.f32 %v3439_v49, %v2834_v53  ;;  %v3006_v53 = vld [vmem:[%s4597_s21] sm:$0xff] }
0x1b57   :  { %v2828_v56 = vsub.f32 1.5, %v2827_v54  ;;  %3027 = vmatpush.msra.mxu2 %v3008_v51 }
0x1b58   :  { %v2844_v58 = vadd.f32 %v3440_v52, %v2839_v55 }
0x1b59   :  { %v2829_v59 = vmul.f32 %v3530_v46, %v2828_v56 }
0x1b5a   :  { %3380 = vmatmul.msk.f32.vlgmr.msra.gmra.mxu0 %vm87_vm0, %v2844_v58 }
0x1b5b   :  { %v2833_v61 = vsel %vm2832_vm9, %v3530_v46, %v2829_v59 }
0x1b5c   :  { %v2835_v62 = vmul.f32 %v2833_v61, %v2801_v31 }
0x1b5e   :  { %v2840_v63 = vmul.f32 %v3439_v49, %v2835_v62 }
0x1b60   :  { %v2845_v0 = vadd.f32 %v3440_v52, %v2840_v63  ;;  %v3007_v52 = vld [vmem:[%s4597_s21 + $0x8] sm:$0xff] }
0x1b61   :  { %3028 = vmatpush.msra.mxu2 %v3007_v52 }
0x1b62   :  { %3381 = vmatmul.msk.f32.gmra.mxu0 %vm87_vm0, %v2845_v0 }
0x1b63   :  { %3029 = vmatpush.msra.mxu2 %v3006_v53 }
0x1b65   :  { %3093 = vmatpush.msrb.mxu2 %v3009_v50 }
0x1b67   :  { %3094 = vmatpush.msrb.mxu2 %v3008_v51 }
0x1b69   :  { %3095 = vmatpush.msrb.mxu2 %v3007_v52 }
0x1b6b   :  { %3096 = vmatpush.msrb.mxu2 %v3006_v53 }
0x1bd7   :  { %v2879_v11 = vpop.f32.mrf.mxu0 }
0x1bd8   :  { %v2880_v12 = vadd.f32 %v3441_v9, %v2879_v11 }
0x1bda   :  { %v2885_v13 = vmul.f32 %v2880_v12, %v2880_v12 }
0x1bdc   :  { %v2887_v14 = vmul.f32 %v2885_v13, %v2880_v12 }
0x1bde   :  { %v2889_v16 = vmul.f32 0.044715, %v2887_v14 }
0x1bdf   :  { %v2882_v17 = vpop.f32.mrf.mxu0 }
0x1be0   :  { %v2891_v18 = vadd.f32 %v2889_v16, %v2880_v12  ;;  %v2883_v19 = vadd.f32 %v3441_v9, %v2882_v17 }
0x1be2   :  { %v2893_v57 = vmul.f32 0.7978846, %v2891_v18  ;;  %v2886_v20 = vmul.f32 %v2883_v19, %v2883_v19 }
0x1be4   :  { %3531 = vtanh.f32 %v2893_v57  ;;  %v2888_v23 = vmul.f32 %v2886_v20, %v2883_v19  ;;  %v3039_v20 = vld [vmem:[%s4598_s23 + $0x18] sm:$0xff] }
0x1be5   :  { %3062 = vmatpush.msrb.mxu3 %v3039_v20 }
0x1be6   :  { %v2890_v24 = vmul.f32 0.044715, %v2888_v23  ;;  %v3038_v23 = vld [vmem:[%s4598_s23 + $0x10] sm:$0xff] }
0x1be7   :  { %3063 = vmatpush.msrb.mxu3 %v3038_v23 }
0x1be8   :  { %v2892_v25 = vadd.f32 %v2890_v24, %v2883_v19  ;;  %v3037_v24 = vld [vmem:[%s4598_s23 + $0x8] sm:$0xff] }
0x1be9   :  { %3064 = vmatpush.msrb.mxu3 %v3037_v24 }
0x1bea   :  { %v3532_v26 = vpop.eup %3531  ;;  %v2894_v27 = vmul.f32 0.7978846, %v2892_v25  ;;  %v3036_v25 = vld [vmem:[%s4598_s23] sm:$0xff] }
0x1beb   :  { %v2897_v28 = vadd.f32 1.0, %v3532_v26  ;;  %3065 = vmatpush.msrb.mxu3 %v3036_v25  ;;  %v3035_v26 = vld [vmem:[%s4599_s2] sm:$0x1] }
0x1bec   :  { %3533 = vtanh.f32 %v2894_v27  ;;  %v3102_v27 = vld [vmem:[%s4599_s2 + $0x1] sm:$0x1] }
0x1bed   :  { %v2899_v29 = vmul.f32 0.5, %v2897_v28  ;;  %3129 = vmatpush.msra.mxu3 %v3039_v20  ;;  %v3545_v28 = vmov 0  }
0x1bee   :  { %3402 = vset.pattern.permute.xlu1 %v3545_v28  ;;  %3403 = vset.pattern.permute.xlu2 %v3545_v28 }
0x1bef   :  { %v2901_v30 = vmul.f32 %v2899_v29, %v2880_v12  ;;  %3130 = vmatpush.msra.mxu3 %v3038_v23  ;;  %3404 = vset.pattern.permute.xlu0 %v3545_v28  ;;  %v3010_v29 = vld [vmem:[%s4600_s22] sm:$0x1] }
0x1bf1   :  { %3391 = vmatmul.msk.f32.vlgmr.msrb.gmra.mxu1 %vm1485_vm4, %v2901_v30  ;;  %3131 = vmatpush.msra.mxu3 %v3037_v24 }
0x1bf2   :  { %v3534_v60 = vpop.eup %3533 }
0x1bf3   :  { %v2898_v31 = vadd.f32 1.0, %v3534_v60  ;;  %3132 = vmatpush.msra.mxu3 %v3036_v25 }
0x1bf5   :  { %v2900_v32 = vmul.f32 0.5, %v2898_v31  ;;  %v3077_v31 = vld [vmem:[%s4600_s22] sm:$0x1] }
0x1bf7   :  { %v2902_v33 = vmul.f32 %v2900_v32, %v2883_v19 }
0x1bf9   :  { %3392 = vmatmul.msk.f32.gmra.mxu1 %vm1485_vm4, %v2902_v33 }
0x1c6e   :  { %v2940_v34 = vpop.f32.mrf.mxu1 }
0x1c6f   :  { %v2941_v35 = vadd.f32 %v3442_v15, %v2940_v34 }
0x1c71   :  { %v2946_v36 = vadd.f32 %v2941_v35, %v2844_v58  ;;  %v3040_v35 = vld [vmem:[%s4601_s24] sm:$0x1] }
0x1c73   :  { %v2952_v37 = vsel %vm87_vm0, %v2946_v36, 0.0 }
0x1c74   :  { %2953 = vadd.xlane.f32.xlu0 %v2952_v37 }
0x1c76   :  { %v2943_v38 = vpop.f32.mrf.mxu1 }
0x1c77   :  { %v2944_v39 = vadd.f32 %v3442_v15, %v2943_v38 }
0x1c79   :  { %v2947_v40 = vadd.f32 %v2944_v39, %v2845_v0  ;;  %v3070_v39 = vld [vmem:[%s4638_s26] sm:$0x1] }
0x1c7b   :  { %v2955_v21 = vsel %vm87_vm0, %v2947_v40, 0.0 }
0x1c7c   :  { %2956 = vadd.xlane.f32.xlu1 %v2955_v21  ;;  %v3107_v21 = vld [vmem:[%s4601_s24] sm:$0x1] }
0x1c95   :  { %3043 = vperm.xlu1 %3402, %v3035_v26  }
0x1ce7   :  { %v2954_v41 = vpop.xlane.xlu0 %2953 }
0x1ce8   :  { %v2958_v22 = vmul.f32 %v2954_v41, %v3689_v10 }
0x1cea   :  { %v2960_v42 = vsub.f32 %v2946_v36, %v2958_v22 }
0x1cec   :  { %v2962_v43 = vmul.f32 %v2960_v42, %v2960_v42 }
0x1cee   :  { %v2964_v44 = vsel %vm87_vm0, %v2962_v43, 0.0 }
0x1cef   :  { %2965 = vadd.xlane.f32.xlu2 %v2964_v44  ;;  %v2957_v45 = vpop.xlane.xlu1 %2956  ;;  %v3137_v44 = vld [vmem:[%s4638_s26] sm:$0x1] }
0x1cf0   :  { %v2959_v46 = vmul.f32 %v2957_v45, %v3689_v10 }
0x1cf2   :  { %v2961_v47 = vsub.f32 %v2947_v40, %v2959_v46 }
0x1cf4   :  { %v2963_v48 = vmul.f32 %v2961_v47, %v2961_v47 }
0x1cf6   :  { %v2967_v49 = vsel %vm87_vm0, %v2963_v48, 0.0 }
0x1cf7   :  { %2968 = vadd.xlane.f32.xlu0 %v2967_v49 }
0x1d07   :  { %3110 = vperm.xlu2 %3403, %v3102_v27   ;;  %v3044_v36 = vpop.permute.xlu1 %3043 }
0x1d08   :  { %v3046_v37 = vmul.f32 %v3044_v36, %v3040_v35 }
0x1d62   :  { %v2966_v54 = vpop.xlane.xlu2 %2965 }
0x1d63   :  { %v2970_v55 = vmul.f32 %v2966_v54, %v3689_v10 }
0x1d65   :  { %v2972_v56 = vadd.f32 1e-12, %v2970_v55 }
0x1d67   :  { %3535 = vrsqrt.f32 %v2972_v56  ;;  %vm2980_vm10 = vweird.f32 %v2972_v56 }
0x1d6a   :  { %v2969_v58 = vpop.xlane.xlu0 %2968  ;;  %v3111_v41 = vpop.permute.xlu2 %3110 }
0x1d6b   :  { %v2971_v59 = vmul.f32 %v2969_v58, %v3689_v10  ;;  %v3444_v10 = vld [vmem:[%s4596_s20 + $0x1] ss:$0 sm:$0xff] }
0x1d6d   :  { %v3536_v61 = vpop.eup %3535  ;;  %v2973_v62 = vadd.f32 1e-12, %v2971_v59 }
0x1d6e   :  { %v2975_v63 = vmul.f32 %v3536_v61, %v2972_v56  ;;  %vm2981_vm4 = vweird.f32 %v3536_v61 }
0x1d6f   :  { %3537 = vrsqrt.f32 %v2973_v62  ;;  %vm2982_vm11 = vmor %vm2980_vm10, %vm2981_vm4  ;;  %vm2990_vm13 = vweird.f32 %v2973_v62 }
0x1d70   :  { %v2976_v0 = vmul.f32 %v3536_v61, %v2975_v63 }
0x1d72   :  { %v2977_v1 = vmul.f32 0.5, %v2976_v0 }
0x1d74   :  { %v2978_v2 = vsub.f32 1.5, %v2977_v1 }
0x1d75   :  { %v3538_v3 = vpop.eup %3537 }
0x1d76   :  { %v2979_v4 = vmul.f32 %v3536_v61, %v2978_v2  ;;  %v2985_v5 = vmul.f32 %v3538_v3, %v2973_v62  ;;  %vm2991_vm12 = vweird.f32 %v3538_v3 }
0x1d77   :  { %vm2992_vm14 = vmor %vm2990_vm13, %vm2991_vm12 }
0x1d78   :  { %v2983_v7 = vsel %vm2982_vm11, %v3536_v61, %v2979_v4  ;;  %v2986_v8 = vmul.f32 %v3538_v3, %v2985_v5 }
0x1d79   :  { %v2994_v9 = vmul.f32 %v2983_v7, %v2960_v42  ;;  %v3113_v42 = vmul.f32 %v3111_v41, %v3107_v21 }
0x1d7a   :  { %v2987_v11 = vmul.f32 0.5, %v2986_v8 }
0x1d7b   :  { %v2999_v12 = vmul.f32 %v3443_v6, %v2994_v9 }
0x1d7c   :  { %v2988_v13 = vsub.f32 1.5, %v2987_v11 }
0x1d7d   :  { %v3004_v14 = vadd.f32 %v3444_v10, %v2999_v12 }
0x1d7e   :  { %v2989_v16 = vmul.f32 %v3538_v3, %v2988_v13 }
0x1d7f   :  { %3395 = vmatmul.msk.f32.vlgmr.msra.gmra.mxu2 %vm87_vm0, %v3004_v14 }
0x1d80   :  { %v2993_v17 = vsel %vm2992_vm14, %v3538_v3, %v2989_v16 }
0x1d81   :  { %v2995_v18 = vmul.f32 %v2993_v17, %v2961_v47 }
0x1d83   :  { %v3000_v19 = vmul.f32 %v3443_v6, %v2995_v18 }
0x1d85   :  { %v3005_v57 = vadd.f32 %v3444_v10, %v3000_v19 }
0x1d87   :  { %3397 = vmatmul.msk.f32.vlgmr.msrb.gmra.mxu2 %vm87_vm0, %v3005_v57 }
0x1e02   :  { %v3031_v30 = vpop.f32.mrf.mxu2 }
0x1e03   :  { %v3032_v60 = vadd.f32 %v3031_v30, %v3010_v29 }
0x1e05   :  { %3539 = vtanh.f32 %v3032_v60 }
0x1e0a   :  { %v3098_v32 = vpop.f32.mrf.mxu2 }
0x1e0b   :  { %v3540_v33 = vpop.eup %3539  ;;  %v3099_v15 = vadd.f32 %v3098_v32, %v3077_v31 }
0x1e0c   :  { %3396 = vmatmul.msk.f32.vlgmr.msrb.gmra.mxu3 %vm87_vm0, %v3540_v33 }
0x1e0d   :  { %3541 = vtanh.f32 %v3099_v15 }
0x1e13   :  { %v3542_v34 = vpop.eup %3541 }
0x1e14   :  { %3398 = vmatmul.msk.f32.vlgmr.msra.gmra.mxu3 %vm87_vm0, %v3542_v34 }
0x1e8f   :  { %v3067_v38 = vpop.f32.mrf.mxu3 }
0x1e90   :  { %v3068_v40 = vadd.f32 %v3067_v38, %v3046_v37 }
0x1e92   :  { %v3071_v22 = vadd.f32 %v3070_v39, %v3068_v40 }
0x1e94   :  { %3072 = vst [vmem:[%s4639_s0] sm:$0x1] %v3071_v22 }
0x1e97   :  { %v3134_v43 = vpop.f32.mrf.mxu3 }
0x1e98   :  { %v3135_v45 = vadd.f32 %v3134_v43, %v3113_v42 }
0x1e9a   :  { %v3138_v46 = vadd.f32 %v3137_v44, %v3135_v45 }
0x1e9c   :  { %3139 = vst [vmem:[%s4639_s0 + $0x1] sm:$0x1] %v3138_v46 }

</bundles_post_ra>
